<compile_context>
chip_gen: v5e
topology: v5e:2x2
jax: 0.10.0
libtpu: 0.0.40
codegen_flags: <defaults>
</compile_context>

<pallas_src>
import math

import jax
import jax.numpy as jnp
from jax.experimental import pallas as pl
from jax.experimental.pallas import tpu as pltpu

_LANE = 128
_SUBLANE = 8


def _round_up(n, m):
    return ((n + m - 1) // m) * m


def _gelu_exact(x):
    # torch.nn.GELU() default = exact erf-based GELU
    return 0.5 * x * (1.0 + jax.lax.erf(x * (1.0 / math.sqrt(2.0))))


def _make_dae_kernel(n_linear, mxu_dtype):
    """Kernel over one (tb, F_pad) batch tile; all weights resident in VMEM."""

    def kernel(*refs):
        # refs = (x_ref, W0, b0, W1, b1, ..., o_ref)
        x_ref = refs[0]
        o_ref = refs[-1]
        h = x_ref[...]                                   # already f32
        for i in range(n_linear):
            w_ref = refs[1 + 2 * i]
            b_ref = refs[2 + 2 * i]                      # (1, out_pad) f32
            lhs = h if mxu_dtype == jnp.float32 else h.astype(mxu_dtype)
            h = jnp.dot(lhs, w_ref[...], preferred_element_type=jnp.float32)
            h = h + b_ref[...]
            if i < n_linear - 1:
                h = _gelu_exact(h)
                # dropout: inference-mode identity (deterministic forward)
        o_ref[...] = h.astype(o_ref.dtype)

    return kernel


def dae_forward(x, params, *, block_rows=512, use_bf16_mxu=False):
    """x: [B, F] float32. params: list of (W [in,out], b [out]) pairs."""
    B, F = x.shape
    n_linear = len(params)
    mxu_dtype = jnp.bfloat16 if use_bf16_mxu else jnp.float32

    # --- zero-pad every dim to a multiple of 128 (exact-math padding) --------
    padded = []
    for w, b in params:
        d_in, d_out = w.shape
        d_in_p, d_out_p = _round_up(d_in, _LANE), _round_up(d_out, _LANE)
        w_p = jnp.zeros((d_in_p, d_out_p), jnp.float32).at[:d_in, :d_out].set(w)
        b_p = jnp.zeros((1, d_out_p), jnp.float32).at[:, :d_out].set(b)
        padded.append((w_p.astype(mxu_dtype), b_p))      # biases stay f32

    f_in_p = padded[0][0].shape[0]
    f_out = params[-1][0].shape[1]
    f_out_p = padded[-1][0].shape[1]

    # --- batch tiling ---------------------------------------------------------
    tb = _round_up(min(block_rows, _round_up(B, _SUBLANE)), _SUBLANE)
    b_p = _round_up(B, tb)
    grid = (b_p // tb,)

    x_p = jnp.zeros((b_p, f_in_p), jnp.float32).at[:B, :F].set(
        x.astype(jnp.float32))

    flat_inputs = [x_p]
    for w_pp, b_pp in padded:
        flat_inputs += [w_pp, b_pp]

    in_specs = [pl.BlockSpec((tb, f_in_p), lambda i: (i, 0))]
    for w_pp, b_pp in padded:
        in_specs.append(pl.BlockSpec(w_pp.shape, lambda i: (0, 0)))  # resident
        in_specs.append(pl.BlockSpec(b_pp.shape, lambda i: (0, 0)))  # resident
    out_spec = pl.BlockSpec((tb, f_out_p), lambda i: (i, 0))
    out_shape = jax.ShapeDtypeStruct((b_p, f_out_p), x.dtype)

    # --- VMEM budget: resident weights + double-buffered in/out tiles --------
    w_item = jnp.dtype(mxu_dtype).itemsize
    weight_bytes = sum(w.size * w_item + b.size * 4 for w, b in padded)
    max_width = max(f_in_p, f_out_p, max(w.shape[1] for w, _ in padded))
    act_bytes = 2 * 2 * tb * max_width * 4               # 2 streams x 2 buffers
    vmem_limit = min(max(2 * (weight_bytes + act_bytes) + (8 << 20), 32 << 20),
                     48 << 20)                           # fits v7x's 64 MiB

    kernel = _make_dae_kernel(n_linear, mxu_dtype)

    out = pl.pallas_call(
        kernel,
        out_shape=out_shape,
        grid=grid,
        in_specs=in_specs,
        out_specs=out_spec,
        compiler_params=pltpu.CompilerParams(
            dimension_semantics=("parallel",),
            vmem_limit_bytes=int(vmem_limit),
        ),
    )(*flat_inputs)

    return out[:B, :f_out]


def init_dae_params(key, feature_dim, n_layer, compression_rate):
    """Deterministic init matching the DAEModule layer shapes.

    Layers: Linear(F, H), (n_layer-1) x Linear(H, H), Linear(H, F).
    Weights stored as [in, out] (transpose of torch's [out, in]).
    """
    hidden_dim = int(feature_dim * compression_rate)
    dims = [(feature_dim, hidden_dim)]
    dims += [(hidden_dim, hidden_dim) for _ in range(n_layer - 1)]
    dims += [(hidden_dim, feature_dim)]

    params = []
    for d_in, d_out in dims:
        key, kw, kb = jax.random.split(key, 3)
        bound = 1.0 / math.sqrt(d_in)  # torch Linear default init scale
        w = jax.random.uniform(kw, (d_in, d_out), jnp.float32, -bound, bound)
        b = jax.random.uniform(kb, (d_out,), jnp.float32, -bound, bound)
        params.append((w, b))
    return params


def dae_reference(x, params):
    """Pure-JAX reference for correctness check."""
    h = x
    n = len(params)
    for i, (w, b) in enumerate(params):
        h = h @ w + b
        if i < n - 1:
            h = _gelu_exact(h)
    return h


if __name__ == "__main__":
    # Module hyperparams (consistent with DAEModule.__init__)
    feature_dim = 32
    n_layer = 3
    compression_rate = 0.5
    batch = 512           # enough rows to exercise the batch grid (4 tiles)

    key = jax.random.PRNGKey(0)
    key, kx = jax.random.split(key)
    x = jax.random.normal(kx, (batch, feature_dim), jnp.float32)
    params = init_dae_params(key, feature_dim, n_layer, compression_rate)
    ref = dae_reference(x, params)

    # f32 path: bitwise-equivalent math to the torch module (exact erf GELU).
    out = dae_forward(x, params, block_rows=128, use_bf16_mxu=False)
    out = jax.block_until_ready(out)
    assert out.shape == (batch, feature_dim), out.shape
    assert jnp.allclose(out, ref, atol=1e-5, rtol=1e-5), (
        float(jnp.max(jnp.abs(out - ref))))

    # Optional bf16-MXU path (v6e/v7x fast path); numerics intentionally looser.
    out_bf16 = dae_forward(x, params, block_rows=128, use_bf16_mxu=True)
    out_bf16 = jax.block_until_ready(out_bf16)
    assert jnp.allclose(out_bf16, ref, atol=1e-1, rtol=1e-1), (
        float(jnp.max(jnp.abs(out_bf16 - ref))))

    # TODO(synk): training-mode dropout (torch.nn.Dropout) not implemented;
    # forward here is the deterministic eval-mode pass.
    print("KERNEL_OK")
</pallas_src>

<mosaic_0001>
module attributes {stable_mosaic.version = 11 : i64} {
  func.func @kernel(%arg0: i32, %arg1: memref<128x128xf32, #tpu.memory_space<vmem>>, %arg2: memref<128x128xf32, #tpu.memory_space<vmem>>, %arg3: memref<1x128xf32, #tpu.memory_space<vmem>>, %arg4: memref<128x128xf32, #tpu.memory_space<vmem>>, %arg5: memref<1x128xf32, #tpu.memory_space<vmem>>, %arg6: memref<128x128xf32, #tpu.memory_space<vmem>>, %arg7: memref<1x128xf32, #tpu.memory_space<vmem>>, %arg8: memref<128x128xf32, #tpu.memory_space<vmem>>, %arg9: memref<1x128xf32, #tpu.memory_space<vmem>>, %arg10: memref<128x128xf32, #tpu.memory_space<vmem>>) attributes {dimension_semantics = [#tpu.dimension_semantics<parallel>], iteration_bounds = array<i64: 4>, scalar_prefetch = 0 : i64, scratch_operands = 0 : i64, tpu.core_type = #tpu.core_type<tc>, window_params = [{transform_indices = @transform_0, window_bounds = array<i64: 128, 128>}, {pipeline_mode = #tpu.pipeline_mode<synchronous>, transform_indices = @transform_1, window_bounds = array<i64: 128, 128>}, {pipeline_mode = #tpu.pipeline_mode<synchronous>, transform_indices = @transform_2, window_bounds = array<i64: 1, 128>}, {pipeline_mode = #tpu.pipeline_mode<synchronous>, transform_indices = @transform_3, window_bounds = array<i64: 128, 128>}, {pipeline_mode = #tpu.pipeline_mode<synchronous>, transform_indices = @transform_4, window_bounds = array<i64: 1, 128>}, {pipeline_mode = #tpu.pipeline_mode<synchronous>, transform_indices = @transform_5, window_bounds = array<i64: 128, 128>}, {pipeline_mode = #tpu.pipeline_mode<synchronous>, transform_indices = @transform_6, window_bounds = array<i64: 1, 128>}, {pipeline_mode = #tpu.pipeline_mode<synchronous>, transform_indices = @transform_7, window_bounds = array<i64: 128, 128>}, {pipeline_mode = #tpu.pipeline_mode<synchronous>, transform_indices = @transform_8, window_bounds = array<i64: 1, 128>}, {transform_indices = @transform_9, window_bounds = array<i64: 128, 128>}]} {
    %c0 = arith.constant 0 : index
    %c0_0 = arith.constant 0 : index
    %0 = vector.load %arg1[%c0, %c0_0] : memref<128x128xf32, #tpu.memory_space<vmem>>, vector<128x128xf32>
    %c0_1 = arith.constant 0 : index
    %c0_2 = arith.constant 0 : index
    %1 = vector.load %arg2[%c0_1, %c0_2] : memref<128x128xf32, #tpu.memory_space<vmem>>, vector<128x128xf32>
    %cst = arith.constant dense<0.000000e+00> : vector<128x128xf32>
    %2 = tpu.matmul %0, %1, %cst {dimension_numbers = #tpu.dot_dimension_numbers<[1], [0], [0], [1], [0, 0, 1, 1], [], []>} : vector<128x128xf32>, vector<128x128xf32>, vector<128x128xf32> -> vector<128x128xf32>
    %c0_3 = arith.constant 0 : index
    %c0_4 = arith.constant 0 : index
    %3 = vector.load %arg3[%c0_3, %c0_4] : memref<1x128xf32, #tpu.memory_space<vmem>>, vector<1x128xf32>
    %4 = vector.broadcast %3 : vector<1x128xf32> to vector<128x128xf32>
    %5 = arith.addf %2, %4 : vector<128x128xf32>
    %cst_5 = arith.constant 5.000000e-01 : f32
    %6 = vector.broadcast %cst_5 : f32 to vector<128x128xf32>
    %7 = arith.mulf %6, %5 : vector<128x128xf32>
    %cst_6 = arith.constant 0.707106769 : f32
    %8 = vector.broadcast %cst_6 : f32 to vector<128x128xf32>
    %9 = arith.mulf %5, %8 : vector<128x128xf32>
    %10 = math.erf %9 : vector<128x128xf32>
    %cst_7 = arith.constant 1.000000e+00 : f32
    %11 = vector.broadcast %cst_7 : f32 to vector<128x128xf32>
    %12 = arith.addf %11, %10 : vector<128x128xf32>
    %13 = arith.mulf %7, %12 : vector<128x128xf32>
    %c0_8 = arith.constant 0 : index
    %c0_9 = arith.constant 0 : index
    %14 = vector.load %arg4[%c0_8, %c0_9] : memref<128x128xf32, #tpu.memory_space<vmem>>, vector<128x128xf32>
    %cst_10 = arith.constant dense<0.000000e+00> : vector<128x128xf32>
    %15 = tpu.matmul %13, %14, %cst_10 {dimension_numbers = #tpu.dot_dimension_numbers<[1], [0], [0], [1], [0, 0, 1, 1], [], []>} : vector<128x128xf32>, vector<128x128xf32>, vector<128x128xf32> -> vector<128x128xf32>
    %c0_11 = arith.constant 0 : index
    %c0_12 = arith.constant 0 : index
    %16 = vector.load %arg5[%c0_11, %c0_12] : memref<1x128xf32, #tpu.memory_space<vmem>>, vector<1x128xf32>
    %17 = vector.broadcast %16 : vector<1x128xf32> to vector<128x128xf32>
    %18 = arith.addf %15, %17 : vector<128x128xf32>
    %cst_13 = arith.constant 5.000000e-01 : f32
    %19 = vector.broadcast %cst_13 : f32 to vector<128x128xf32>
    %20 = arith.mulf %19, %18 : vector<128x128xf32>
    %cst_14 = arith.constant 0.707106769 : f32
    %21 = vector.broadcast %cst_14 : f32 to vector<128x128xf32>
    %22 = arith.mulf %18, %21 : vector<128x128xf32>
    %23 = math.erf %22 : vector<128x128xf32>
    %cst_15 = arith.constant 1.000000e+00 : f32
    %24 = vector.broadcast %cst_15 : f32 to vector<128x128xf32>
    %25 = arith.addf %24, %23 : vector<128x128xf32>
    %26 = arith.mulf %20, %25 : vector<128x128xf32>
    %c0_16 = arith.constant 0 : index
    %c0_17 = arith.constant 0 : index
    %27 = vector.load %arg6[%c0_16, %c0_17] : memref<128x128xf32, #tpu.memory_space<vmem>>, vector<128x128xf32>
    %cst_18 = arith.constant dense<0.000000e+00> : vector<128x128xf32>
    %28 = tpu.matmul %26, %27, %cst_18 {dimension_numbers = #tpu.dot_dimension_numbers<[1], [0], [0], [1], [0, 0, 1, 1], [], []>} : vector<128x128xf32>, vector<128x128xf32>, vector<128x128xf32> -> vector<128x128xf32>
    %c0_19 = arith.constant 0 : index
    %c0_20 = arith.constant 0 : index
    %29 = vector.load %arg7[%c0_19, %c0_20] : memref<1x128xf32, #tpu.memory_space<vmem>>, vector<1x128xf32>
    %30 = vector.broadcast %29 : vector<1x128xf32> to vector<128x128xf32>
    %31 = arith.addf %28, %30 : vector<128x128xf32>
    %cst_21 = arith.constant 5.000000e-01 : f32
    %32 = vector.broadcast %cst_21 : f32 to vector<128x128xf32>
    %33 = arith.mulf %32, %31 : vector<128x128xf32>
    %cst_22 = arith.constant 0.707106769 : f32
    %34 = vector.broadcast %cst_22 : f32 to vector<128x128xf32>
    %35 = arith.mulf %31, %34 : vector<128x128xf32>
    %36 = math.erf %35 : vector<128x128xf32>
    %cst_23 = arith.constant 1.000000e+00 : f32
    %37 = vector.broadcast %cst_23 : f32 to vector<128x128xf32>
    %38 = arith.addf %37, %36 : vector<128x128xf32>
    %39 = arith.mulf %33, %38 : vector<128x128xf32>
    %c0_24 = arith.constant 0 : index
    %c0_25 = arith.constant 0 : index
    %40 = vector.load %arg8[%c0_24, %c0_25] : memref<128x128xf32, #tpu.memory_space<vmem>>, vector<128x128xf32>
    %cst_26 = arith.constant dense<0.000000e+00> : vector<128x128xf32>
    %41 = tpu.matmul %39, %40, %cst_26 {dimension_numbers = #tpu.dot_dimension_numbers<[1], [0], [0], [1], [0, 0, 1, 1], [], []>} : vector<128x128xf32>, vector<128x128xf32>, vector<128x128xf32> -> vector<128x128xf32>
    %c0_27 = arith.constant 0 : index
    %c0_28 = arith.constant 0 : index
    %42 = vector.load %arg9[%c0_27, %c0_28] : memref<1x128xf32, #tpu.memory_space<vmem>>, vector<1x128xf32>
    %43 = vector.broadcast %42 : vector<1x128xf32> to vector<128x128xf32>
    %44 = arith.addf %41, %43 : vector<128x128xf32>
    %c0_29 = arith.constant 0 : index
    %c0_30 = arith.constant 0 : index
    %45 = vector.load %arg10[%c0_29, %c0_30] : memref<128x128xf32, #tpu.memory_space<vmem>>, vector<128x128xf32>
    tpu.vector_store %arg10[%c0_29, %c0_30], %44 {strides = array<i32>} : memref<128x128xf32, #tpu.memory_space<vmem>>, vector<128x128xf32>,
    return
  }
  func.func @transform_0(%arg0: i32) -> (i32, i32) {
    %c0_i32 = arith.constant 0 : i32
    %c0_i32_0 = arith.constant 0 : i32
    return %arg0, %c0_i32 : i32, i32
  }
  func.func @transform_1(%arg0: i32) -> (i32, i32) {
    %c0_i32 = arith.constant 0 : i32
    %c0_i32_0 = arith.constant 0 : i32
    %c0_i32_1 = arith.constant 0 : i32
    return %c0_i32, %c0_i32_0 : i32, i32
  }
  func.func @transform_2(%arg0: i32) -> (i32, i32) {
    %c0_i32 = arith.constant 0 : i32
    %c0_i32_0 = arith.constant 0 : i32
    %c0_i32_1 = arith.constant 0 : i32
    return %c0_i32, %c0_i32_0 : i32, i32
  }
  func.func @transform_3(%arg0: i32) -> (i32, i32) {
    %c0_i32 = arith.constant 0 : i32
    %c0_i32_0 = arith.constant 0 : i32
    %c0_i32_1 = arith.constant 0 : i32
    return %c0_i32, %c0_i32_0 : i32, i32
  }
  func.func @transform_4(%arg0: i32) -> (i32, i32) {
    %c0_i32 = arith.constant 0 : i32
    %c0_i32_0 = arith.constant 0 : i32
    %c0_i32_1 = arith.constant 0 : i32
    return %c0_i32, %c0_i32_0 : i32, i32
  }
  func.func @transform_5(%arg0: i32) -> (i32, i32) {
    %c0_i32 = arith.constant 0 : i32
    %c0_i32_0 = arith.constant 0 : i32
    %c0_i32_1 = arith.constant 0 : i32
    return %c0_i32, %c0_i32_0 : i32, i32
  }
  func.func @transform_6(%arg0: i32) -> (i32, i32) {
    %c0_i32 = arith.constant 0 : i32
    %c0_i32_0 = arith.constant 0 : i32
    %c0_i32_1 = arith.constant 0 : i32
    return %c0_i32, %c0_i32_0 : i32, i32
  }
  func.func @transform_7(%arg0: i32) -> (i32, i32) {
    %c0_i32 = arith.constant 0 : i32
    %c0_i32_0 = arith.constant 0 : i32
    %c0_i32_1 = arith.constant 0 : i32
    return %c0_i32, %c0_i32_0 : i32, i32
  }
  func.func @transform_8(%arg0: i32) -> (i32, i32) {
    %c0_i32 = arith.constant 0 : i32
    %c0_i32_0 = arith.constant 0 : i32
    %c0_i32_1 = arith.constant 0 : i32
    return %c0_i32, %c0_i32_0 : i32, i32
  }
  func.func @transform_9(%arg0: i32) -> (i32, i32) {
    %c0_i32 = arith.constant 0 : i32
    %c0_i32_0 = arith.constant 0 : i32
    return %arg0, %c0_i32 : i32, i32
  }
}

</mosaic_0001>

<bundles_post_ra>
// kernel: tpu_custom_call.1
= control target key start
LH: loop header
LB: loop body
LE: loop exit
PB: predicated region body
PF: predicated region fallthrough
CT: control target
= control target key end

     0   :  { %s5299_s0 = inlined_call_operand.hbm [shape: f32[512,128], index: 0, kind: input, shape index: {}]   ;;  %s5300_s1 = inlined_call_operand.hbm [shape: f32[128,128], index: 1, kind: input, shape index: {}]   ;;  %s5301_s2 = inlined_call_operand.vmem [shape: f32[1,128], index: 2, kind: input, shape index: {}]   ;;  %s5302_s3 = inlined_call_operand.hbm [shape: f32[128,128], index: 3, kind: input, shape index: {}]   ;;  %s5303_s4 = inlined_call_operand.vmem [shape: f32[1,128], index: 4, kind: input, shape index: {}]   ;;  %s5304_s5 = inlined_call_operand.hbm [shape: f32[128,128], index: 5, kind: input, shape index: {}]   ;;  %s5305_s6 = inlined_call_operand.vmem [shape: f32[1,128], index: 6, kind: input, shape index: {}]   ;;  %s5306_s7 = inlined_call_operand.hbm [shape: f32[128,128], index: 7, kind: input, shape index: {}]   ;;  %s5307_s8 = inlined_call_operand.vmem [shape: f32[1,128], index: 8, kind: input, shape index: {}]   ;;  %s5308_s9 = inlined_call_operand.hbm [shape: f32[512,128], index: 9, kind: output, shape index: {}]  }
   0x1   :  { %5311 = sst [smem:[#allocation16_spill]] %s5300_s1 }
   0x2   :  { %5312 = sst [smem:[#allocation17_spill]] %s5302_s3 }
   0x3   :  { %5313 = sst [smem:[#allocation18_spill]] %s5304_s5 }
   0x4   :  { %14 = vsyncpa [#allocation3], 0 }
   0x5   :  { %16 = vsyncpa [#allocation3 + $0x1], 0 }
   0x6   :  { %17 = vsyncpa [#allocation6], 0 }
   0x7   :  { %18 = vsyncpa [#allocation9], 0 }
   0x8   :  { %19 = vsyncpa [#allocation4], 0 }
   0x9   :  { %21 = vsyncpa [#allocation4 + $0x1], 0  ;;  %s3582_s30 = smov 0   ;;  %s3584_s10 = smov 0  }
   0xa   :  { %s3586_s11 = smov 0   ;;  %s3588_s12 = smov 0  }
   0xb LB: > { %s3603_s13 = sadd.s32 4294967295, %s3522_s12   ;;  %s3032_s14 = sadd.s32 4294967294, %s3522_s12   ;;  %s3522_s12 = sphi %s3588_s12, %s5330_s12   ;;  %s3518_s11 = sphi %s3586_s11, %s5329_s11   ;;  %s3514_s10 = sphi %s3584_s10, %s5328_s10   ;;  %s3510_s30 = sphi %s3582_s30, %s5327_s30  }
   0xc   : > { %p47_p0 = scmp.ne.s32.totalorder %s3514_s10, %s3510_s30  ;;  %p48_p1 = scmp.eq.s32.totalorder %s3603_s13, 0 }
   0xd   : > { %p239_p2 = scmp.eq.s32.totalorder %s3603_s13, 3  ;;  %p245_p3 = scmp.eq.s32.totalorder %s3032_s14, 3 }
   0xe   : > { %p3612_p4 = por %p48_p1, %p47_p0  ;;  %p3033_p5 = scmp.ge.s32.totalorder %s3522_s12, 1 }
   0xf   : > { %p3617_p6 = por %p245_p3, %p47_p0  ;;  %p252_p7 = scmp.lt.s32.totalorder %s3522_s12, 5 }
  0x10   : > { %s5316_s1 = sld [smem:[#allocation16_spill]]  ;;  %s3524_s21 = smov [#allocation5]  }
  0x11   : > { %p3625_p8 = pnand %p3033_p5, %p252_p7  ;;  %s265_s22 = sshll.u32 %s3524_s21, 4  ;;  %s266_s22 = int_to_ptr.vmem [resolvable:$true] %s265_s22 }
  0x12   : > { %s5319_s5 = sld [smem:[#allocation18_spill]]  ;;  %s5309_s27 = smov 128  }
  0x13   : > { %p3124_p9 = pneg %p3625_p8  ;;  %s5310_s28 = smov 8  }
  0x14   : > { %s3527_s29 = smov [#allocation8]   ;;  %s5320_s3 = sld [smem:[#allocation17_spill]] }
  0x15   : > { %p3633_p10 = pnand %p3124_p9, %p48_p1  ;;  %s299_s14 = sshll.u32 %s3527_s29, 4  ;;  %s300_s14 = int_to_ptr.vmem [resolvable:$true] %s299_s14 }
  0x16   : > { %s263_s19 = sshll.u32 %s5316_s1, 4  ;;  %s314_s24 = sshll.u32 %s5306_s7, 4  ;;  %s264_s19 = int_to_ptr.hbm [resolvable:$true] %s263_s19  ;;  %s315_s24 = int_to_ptr.hbm [resolvable:$true] %s314_s24 }
  0x17   : > { %3127 = dma.hbm_to_vmem [thread:$0]  (!%p3633_p10), %s264_s19, 2048, %s266_s22, [#allocation6], %s5309_s27, %s5309_s27, %s5310_s28  }
  0x18   : > { %s297_s26 = sshll.u32 %s5319_s5, 4  ;;  %s3528_s25 = smov [#allocation7]   ;;  %s298_s26 = int_to_ptr.hbm [resolvable:$true] %s297_s26 }
  0x19   : > { %3133 = dma.hbm_to_vmem [thread:$0]  (!%p3633_p10), %s298_s26, 2048, %s300_s14, [#allocation9], %s5309_s27, %s5309_s27, %s5310_s28  }
  0x1a   : > { %s280_s21 = sshll.u32 %s5320_s3, 4  ;;  %s282_s29 = sshll.u32 %s3528_s25, 4  ;;  %s281_s21 = int_to_ptr.hbm [resolvable:$true] %s280_s21  ;;  %s283_s29 = int_to_ptr.vmem [resolvable:$true] %s282_s29 }
  0x1b   : > { %3130 = dma.hbm_to_vmem [thread:$0]  (!%p3633_p10), %s281_s21, 2048, %s283_s29, [#allocation6], %s5309_s27, %s5309_s27, %s5310_s28  }
  0x1c   : > { %s3529_s17 = smov [#allocation10]   ;;  %s3667_s14 = sadd.s32 1, %s3522_s12  }
  0x1d   : > { %s316_s26 = sshll.u32 %s3529_s17, 4  ;;  %s34_s18 = sadd.s32 1, %s3518_s11  ;;  %s317_s26 = int_to_ptr.vmem [resolvable:$true] %s316_s26 }
  0x1e   : > { %3136 = dma.hbm_to_vmem [thread:$0]  (!%p3633_p10), %s315_s24, 2048, %s317_s26, [#allocation9], %s5309_s27, %s5309_s27, %s5310_s28  }
  0x1f   : > { %s31_s19 = ssub.s32 %s3522_s12, %s3667_s14  ;;  %p41_p11 = scmp.ne.s32.totalorder %s3518_s11, %s3514_s10 }
  0x20   : > { %p32_p12 = scmp.eq.s32.totalorder %s31_s19, 0  ;;  %p42_p13 = scmp.eq.s32.totalorder %s3522_s12, 0 }
  0x21   : > { %p3677_p0 = por %p239_p2, %p41_p11  ;;  %p3149_p3 = scmp.lt.s32.totalorder %s3522_s12, 4 }
  0x22   : > { %s3683_s22 = scalar_select %p32_p12, %s3518_s11, %s34_s18  }
  0x23   : > { %p43_p5 = por %p42_p13, %p41_p11  ;;  %s333_s23 = sand.u32 1, %s3518_s11  }
  0x24   : > { %s3039_s25 = sshll.u32 %s333_s23, 7  ;;  %s3102_s24 = sshll.u32 %s3522_s12, 7 }
  0x25   : > { %s342_s26 = scalar_lea.hbm %s5299_s0, %s3102_s24  ;;  %s337_s27 = scalar_lea.vmem [#allocation2], %s3039_s25 }
  0x26   : > { %s345_s28 = sshll.u32 %s337_s27, 4  ;;  %s343_s19 = sshll.u32 %s342_s26, 4  ;;  %s346_s28 = int_to_ptr.vmem [resolvable:$true] %s345_s28  ;;  %s344_s19 = int_to_ptr.hbm [resolvable:$true] %s343_s19 }
  0x27   : > { %p3690_p2 = pnand %p3149_p3, %p43_p5  ;;  %s334_s18 = scalar_lea.sflag [#allocation3], %s333_s23 }
  0x28   : > { %s3418_s3 = sshra.s32 %s344_s19, 4  ;;  %s3425_s27 = scalar_lea.hbm %s5299_s0, 512  ;;  %s3419_s3 = int_to_ptr.hbm [resolvable:$true] %s3418_s3 }
  0x29   : > { %s3420_s5 = scalar_lea.hbm %s3419_s3, 128  ;;  %p3422_p9 = pneg %p3690_p2 }
  0x2a   : > { %p3421_p7 = scmp.ne.s32.totalorder %s3419_s3, %s3420_s5  ;;  %p3426_p12 = scmp.lt.s32.totalorder %s3419_s3, %s5299_s0 }
  0x2b   : > { %p3427_p13 = scmp.lt.s32.totalorder %s3425_s27, %s3420_s5 }
  0x2c   : > { %p3423_p10 = pnand %p3422_p9, %p3421_p7 }
  0x2d   : > { %p3428_p3 = por %p3427_p13, %p3426_p12 }
  0x2e   : > { %p3424_p11 = pneg %p3423_p10 }
  0x30   : > { %p3429_p5 = pnand %p3428_p3, %p3424_p11 }
  0x32   : > { %3432 = shalt.err (!%p3429_p5)
}
  0x33   : > { %s5323_s23 = smov 8   ;;  %s5324_s26 = smov 128  }
  0x34   : > { %3140 = dma.hbm_to_vmem [thread:$0]  (!%p3690_p2), %s344_s19, 2048, %s346_s28, %s334_s18, %s5324_s26, %s5324_s26, %s5323_s23  }
  0x35   : > { %357 = sbr.rel (%p3625_p8) target bundleno = 950 (0x3b6), region = 56  ;;  %s3710_s24 = sand.u32 (!%p3625_p8), 1, %s3514_s10  }
  0x36   : > { %s3043_s3 = sshll.u32 (!%p3625_p8), %s3710_s24, 7  ;;  %s360_s5 = scalar_lea.sflag (!%p3625_p8), [#allocation3], %s3710_s24 }
  0x37   : > { %s3716_s25 = scalar_lea.vmem (!%p3625_p8), [#allocation2], %s3043_s3 }
  0x3a   : > { %3493 = dma.done.wait (%p3612_p4), %s360_s5, 2048  }
  0x3b   : > { %3495 = vsyncadd (%p3612_p4), %s360_s5, 4294965248 }
  0x3c   : > { %3497 = dma.done.wait (%p48_p1), [#allocation6], 4096  }
  0x3d   : > { %3499 = vsyncadd (%p48_p1), [#allocation6], 4294963200 }
  0x3e   : > { %3501 = dma.done.wait (%p48_p1), [#allocation9], 4096  }
  0x3f   : > { %3503 = vsyncadd (%p48_p1), [#allocation9], 4294963200  ;;  %v452_v0 = vld [vmem:[#allocation5 + $0x78] sm:$0xff]  ;;  %v451_v1 = vld [vmem:[#allocation5 + $0x70] sm:$0xff]  ;;  %s5220_s15 = scalar_lea.vmem [#allocation11], %s3043_s3  ;;  %s3103_s3 = sshll.u32 %s3603_s13, 7 }
  0x40   : > { %457 = vmatpush.msra.mxu0 %v452_v0  ;;  %v450_v2 = vld [vmem:[#allocation5 + $0x68] sm:$0xff]  ;;  %v449_v3 = vld [vmem:[#allocation5 + $0x60] sm:$0xff]  ;;  %v448_v4 = vld [vmem:[#allocation5 + $0x58] sm:$0xff]  ;;  %s2917_s19 = scalar_lea.hbm %s5308_s9, %s3103_s3  ;;  %s2918_s18 = sshll.u32 %s5220_s15, 4  ;;  %s2919_s18 = int_to_ptr.vmem [resolvable:$true] %s2918_s18 }
  0x41   : > { %v447_v5 = vld [vmem:[#allocation5 + $0x50] sm:$0xff]  ;;  %v446_v6 = vld [vmem:[#allocation5 + $0x48] sm:$0xff]  ;;  %v445_v7 = vld [vmem:[#allocation5 + $0x40] sm:$0xff]  ;;  %s2920_s27 = sshll.u32 %s2917_s19, 4  ;;  %s2906_s29 = scalar_lea.sflag [#allocation4], %s3710_s24  ;;  %s2921_s27 = int_to_ptr.hbm [resolvable:$true] %s2920_s27 }
  0x42   : > { %458 = vmatpush.msra.mxu0 %v451_v1  ;;  %v444_v8 = vld [vmem:[#allocation5 + $0x38] sm:$0xff]  ;;  %v443_v9 = vld [vmem:[#allocation5 + $0x30] sm:$0xff]  ;;  %v442_v10 = vld [vmem:[#allocation5 + $0x28] sm:$0xff]  ;;  %s3462_s17 = sshra.s32 %s2921_s27, 4  ;;  %s3468_s5 = scalar_lea.hbm %s5308_s9, 512  ;;  %s3463_s17 = int_to_ptr.hbm [resolvable:$true] %s3462_s17 }
  0x43   : > { %v441_v11 = vld [vmem:[#allocation5 + $0x20] sm:$0xff]  ;;  %v440_v12 = vld [vmem:[#allocation5 + $0x18] sm:$0xff]  ;;  %v439_v13 = vld [vmem:[#allocation5 + $0x10] sm:$0xff]  ;;  %s3464_s13 = scalar_lea.hbm %s3463_s17, 128  ;;  %p3469_p2 = scmp.lt.s32.totalorder %s3463_s17, %s5308_s9 }
  0x44   : > { %459 = vmatpush.msra.mxu0 %v450_v2  ;;  %v438_v14 = vld [vmem:[#allocation5 + $0x8] sm:$0xff]  ;;  %v437_v15 = vld [vmem:[#allocation5] sm:$0xff]  ;;  %v423_v18 = vld [vmem:[%s3716_s25 + $0x10] sm:$0xff]  ;;  %p3465_p1 = scmp.ne.s32.totalorder %s3463_s17, %s3464_s13  ;;  %p3470_p7 = scmp.lt.s32.totalorder %s3468_s5, %s3464_s13 }
  0x45   : > { %v421_v16 = vld [vmem:[%s3716_s25] sm:$0xff]  ;;  %v422_v17 = vld [vmem:[%s3716_s25 + $0x8] sm:$0xff]  ;;  %v424_v19 = vld [vmem:[%s3716_s25 + $0x18] sm:$0xff] }
  0x46   : > { %460 = vmatpush.msra.mxu0 %v449_v3  ;;  %v425_v20 = vld [vmem:[%s3716_s25 + $0x20] sm:$0xff]  ;;  %v426_v21 = vld [vmem:[%s3716_s25 + $0x28] sm:$0xff]  ;;  %v427_v22 = vld [vmem:[%s3716_s25 + $0x30] sm:$0xff]  ;;  %p3466_p4 = pnand %p3465_p1, %p3677_p0  ;;  %p3471_p9 = por %p3470_p7, %p3469_p2 }
  0x47   : > { %v428_v23 = vld [vmem:[%s3716_s25 + $0x38] sm:$0xff]  ;;  %v429_v24 = vld [vmem:[%s3716_s25 + $0x40] sm:$0xff]  ;;  %v430_v25 = vld [vmem:[%s3716_s25 + $0x48] sm:$0xff] }
  0x48   : > { %461 = vmatpush.msra.mxu0 %v448_v4  ;;  %v431_v26 = vld [vmem:[%s3716_s25 + $0x50] sm:$0xff]  ;;  %v432_v27 = vld [vmem:[%s3716_s25 + $0x58] sm:$0xff]  ;;  %v433_v28 = vld [vmem:[%s3716_s25 + $0x60] sm:$0xff]  ;;  %p3467_p8 = pneg %p3466_p4 }
  0x49   : > { %v434_v29 = vld [vmem:[%s3716_s25 + $0x68] sm:$0xff]  ;;  %v435_v30 = vld [vmem:[%s3716_s25 + $0x70] sm:$0xff]  ;;  %v1241_v31 = vld [vmem:[#allocation7 + $0x78] sm:$0xff] }
  0x4a   : > { %462 = vmatpush.msra.mxu0 %v447_v5  ;;  %v436_v32 = vld [vmem:[%s3716_s25 + $0x78] sm:$0xff]  ;;  %1246 = vmatpush.msra.mxu1 %v1241_v31  ;;  %v1240_v33 = vld [vmem:[#allocation7 + $0x70] sm:$0xff]  ;;  %v1239_v34 = vld [vmem:[#allocation7 + $0x68] sm:$0xff]  ;;  %p3472_p10 = pnand %p3471_p9, %p3467_p8 }
  0x4b   : > { %v3749_v35 = vld [vmem:[%s5301_s2] ss:$0 sm:$0xff]  ;;  %v1237_v37 = vld [vmem:[#allocation7 + $0x58] sm:$0xff]  ;;  %v1236_v40 = vld [vmem:[#allocation7 + $0x50] sm:$0xff] }
  0x4c   : > { %463 = vmatpush.msra.mxu0 %v446_v6  ;;  %1247 = vmatpush.msra.mxu1 %v1240_v33  ;;  %v1238_v36 = vld [vmem:[#allocation7 + $0x60] sm:$0xff]  ;;  %v1235_v42 = vld [vmem:[#allocation7 + $0x48] sm:$0xff]  ;;  %v1233_v46 = vld [vmem:[#allocation7 + $0x38] sm:$0xff] }
  0x4d   : > { %v1234_v44 = vld [vmem:[#allocation7 + $0x40] sm:$0xff]  ;;  %v1232_v50 = vld [vmem:[#allocation7 + $0x30] sm:$0xff]  ;;  %v1231_v54 = vld [vmem:[#allocation7 + $0x28] sm:$0xff] }
  0x4e   : > { %464 = vmatpush.msra.mxu0 %v445_v7  ;;  %1248 = vmatpush.msra.mxu1 %v1239_v34  ;;  %v1230_v58 = vld [vmem:[#allocation7 + $0x20] sm:$0xff]  ;;  %v1229_v62 = vld [vmem:[#allocation7 + $0x18] sm:$0xff]  ;;  %v1228_v3 = vld [vmem:[#allocation7 + $0x10] sm:$0xff] }
  0x50   : > { %465 = vmatpush.msra.mxu0 %v444_v8  ;;  %1249 = vmatpush.msra.mxu1 %v1238_v36  ;;  %v1227_v8 = vld [vmem:[#allocation7 + $0x8] sm:$0xff] }
  0x52   : > { %466 = vmatpush.msra.mxu0 %v443_v9  ;;  %1250 = vmatpush.msra.mxu1 %v1237_v37 }
  0x54   : > { %467 = vmatpush.msra.mxu0 %v442_v10  ;;  %1251 = vmatpush.msra.mxu1 %v1236_v40 }
  0x56   : > { %468 = vmatpush.msra.mxu0 %v441_v11  ;;  %1252 = vmatpush.msra.mxu1 %v1235_v42 }
  0x58   : > { %469 = vmatpush.msra.mxu0 %v440_v12  ;;  %1253 = vmatpush.msra.mxu1 %v1234_v44 }
  0x5a   : > { %470 = vmatpush.msra.mxu0 %v439_v13  ;;  %1254 = vmatpush.msra.mxu1 %v1233_v46  ;;  %v1226_v13 = vld [vmem:[#allocation7] sm:$0xff] }
  0x5c   : > { %471 = vmatpush.msra.mxu0 %v438_v14  ;;  %1255 = vmatpush.msra.mxu1 %v1232_v50 }
  0x5e   : > { %472 = vmatpush.msra.mxu0 %v437_v15  ;;  %1256 = vmatpush.msra.mxu1 %v1231_v54 }
  0x5f   : > { %473 = vmatmul.f32.vlgmr.msra.gmra.mxu0 %v421_v16 }
  0x60   : > { %1257 = vmatpush.msra.mxu1 %v1230_v58 }
  0x62   : > { %1258 = vmatpush.msra.mxu1 %v1229_v62 }
  0x64   : > { %1259 = vmatpush.msra.mxu1 %v1228_v3 }
  0x66   : > { %1260 = vmatpush.msra.mxu1 %v1227_v8 }
  0x67   : > { %476 = vmatmul.f32.gmra.mxu0 %v422_v17 }
  0x68   : > { %1261 = vmatpush.msra.mxu1 %v1226_v13 }
  0x6f   : > { %479 = vmatmul.f32.gmra.mxu0 %v423_v18 }
  0x77   : > { %482 = vmatmul.f32.gmra.mxu0 %v424_v19 }
  0x7f   : > { %485 = vmatmul.f32.gmra.mxu0 %v425_v20 }
  0x87   : > { %488 = vmatmul.f32.gmra.mxu0 %v426_v21 }
  0x8f   : > { %491 = vmatmul.f32.gmra.mxu0 %v427_v22 }
  0x97   : > { %494 = vmatmul.f32.gmra.mxu0 %v428_v23 }
  0x9f   : > { %497 = vmatmul.f32.gmra.mxu0 %v429_v24 }
  0xa7   : > { %500 = vmatmul.f32.gmra.mxu0 %v430_v25 }
  0xaf   : > { %503 = vmatmul.f32.gmra.mxu0 %v431_v26 }
  0xb7   : > { %506 = vmatmul.f32.gmra.mxu0 %v432_v27 }
  0xbf   : > { %509 = vmatmul.f32.gmra.mxu0 %v433_v28 }
  0xc7   : > { %512 = vmatmul.f32.gmra.mxu0 %v434_v29 }
  0xcf   : > { %515 = vmatmul.f32.gmra.mxu0 %v435_v30 }
  0xd7   : > { %518 = vmatmul.f32.gmra.mxu0 %v436_v32 }
  0xdc   : > { %v474_v38 = vpop.f32.mrf.mxu0 }
  0xdd   : > { %v3752_v39 = vadd.f32 %v3749_v35, %v474_v38 }
  0xdf   : > { %v3755_v41 = vmul.f32 0.70710677, %v3752_v39 }
  0xe1   : > { %v554_v43 = vmul.f32 %v3755_v41, %v3755_v41 }
  0xe3   : > { %v3759_v45 = vmin.f32 %v554_v43, 16.0 }
  0xe4   : > { %v477_v47 = vpop.f32.mrf.mxu0 }
  0xe5   : > { %v556_v48 = vmul.f32 2.1237322e-06, %v3759_v45  ;;  %v3763_v49 = vadd.f32 %v3749_v35, %v477_v47  ;;  %v567_v51 = vmul.f32 3.8918573e-05, %v3759_v45 }
  0xe7   : > { %v557_v52 = vadd.f32 0.00028619796, %v556_v48  ;;  %v3767_v53 = vmul.f32 0.70710677, %v3763_v49  ;;  %v568_v55 = vadd.f32 0.001143296, %v567_v51 }
  0xe9   : > { %v558_v56 = vmul.f32 %v557_v52, %v3759_v45  ;;  %v594_v57 = vmul.f32 %v3767_v53, %v3767_v53  ;;  %v569_v59 = vmul.f32 %v568_v55, %v3759_v45 }
  0xeb   : > { %v559_v60 = vadd.f32 0.0036580483, %v558_v56  ;;  %v3773_v61 = vmin.f32 %v594_v57, 16.0  ;;  %v570_v0 = vadd.f32 0.014752088, %v569_v59 }
  0xec   : > { %v480_v63 = vpop.f32.mrf.mxu0 }
  0xed   : > { %v596_v1 = vmul.f32 2.1237322e-06, %v3773_v61  ;;  %v3777_v2 = vadd.f32 %v3749_v35, %v480_v63  ;;  %v607_v4 = vmul.f32 3.8918573e-05, %v3773_v61  ;;  %v571_v5 = vmul.f32 %v570_v0, %v3759_v45 }
  0xee   : > { %v560_v6 = vmul.f32 %v559_v60, %v3759_v45 }
  0xef   : > { %v597_v7 = vadd.f32 0.00028619796, %v596_v1  ;;  %v3783_v9 = vmul.f32 0.70710677, %v3777_v2  ;;  %v572_v10 = vadd.f32 0.112945676, %v571_v5 }
  0xf0   : > { %v608_v11 = vadd.f32 0.001143296, %v607_v4  ;;  %v561_v17 = vadd.f32 0.05243302, %v560_v6 }
  0xf1   : > { %v598_v12 = vmul.f32 %v597_v7, %v3773_v61  ;;  %v634_v14 = vmul.f32 %v3783_v9, %v3783_v9  ;;  %v573_v15 = vmul.f32 %v572_v10, %v3759_v45 }
  0xf2   : > { %v609_v16 = vmul.f32 %v608_v11, %v3773_v61  ;;  %v562_v28 = vmul.f32 %v561_v17, %v3759_v45 }
  0xf3   : > { %v599_v18 = vadd.f32 0.0036580483, %v598_v12  ;;  %v3790_v19 = vmin.f32 %v634_v14, 16.0  ;;  %v574_v21 = vadd.f32 0.4994258, %v573_v15 }
  0xf4   : > { %v483_v20 = vpop.f32.mrf.mxu0  ;;  %v610_v22 = vadd.f32 0.014752088, %v609_v16  ;;  %v563_v38 = vadd.f32 0.18741608, %v562_v28 }
  0xf5   : > { %v3793_v23 = vadd.f32 %v3749_v35, %v483_v20  ;;  %v636_v24 = vmul.f32 2.1237322e-06, %v3790_v19  ;;  %v575_v25 = vmul.f32 %v574_v21, %v3759_v45  ;;  %v647_v27 = vmul.f32 3.8918573e-05, %v3790_v19 }
  0xf6   : > { %v611_v26 = vmul.f32 %v610_v22, %v3773_v61  ;;  %v600_v29 = vmul.f32 %v599_v18, %v3773_v61  ;;  %v564_v54 = vmul.f32 %v563_v38, %v3759_v45 }
  0xf7   : > { %v637_v30 = vadd.f32 0.00028619796, %v636_v24  ;;  %v3802_v31 = vmul.f32 0.70710677, %v3793_v23  ;;  %v576_v32 = vadd.f32 1.0, %v575_v25 }
  0xf8   : > { %v612_v33 = vadd.f32 0.112945676, %v611_v26  ;;  %v648_v34 = vadd.f32 0.001143296, %v647_v27  ;;  %v601_v40 = vadd.f32 0.05243302, %v600_v29 }
  0xf9   : > { %v638_v36 = vmul.f32 %v637_v30, %v3790_v19  ;;  %v674_v37 = vmul.f32 %v3802_v31, %v3802_v31  ;;  %3199 = vrcp.f32 %v576_v32  ;;  %v565_v3 = vadd.f32 1.1283791, %v564_v54 }
  0xfa   : > { %v613_v42 = vmul.f32 %v612_v33, %v3773_v61  ;;  %v649_v47 = vmul.f32 %v648_v34, %v3790_v19  ;;  %v602_v55 = vmul.f32 %v601_v40, %v3773_v61  ;;  %v586_v10 = vand.u32 2147483647, %v576_v32 }
  0xfb   : > { %v639_v43 = vadd.f32 0.0036580483, %v638_v36  ;;  %v3808_v44 = vmin.f32 %v674_v37, 16.0  ;;  %v588_v11 = vand.u32 2147483648, %v576_v32  ;;  %v566_v18 = vmul.f32 %v565_v3, %v3755_v41 }
  0xfc   : > { %v486_v46 = vpop.f32.mrf.mxu0  ;;  %v614_v51 = vadd.f32 0.4994258, %v613_v42  ;;  %v650_v52 = vadd.f32 0.014752088, %v649_v47  ;;  %v603_v4 = vadd.f32 0.18741608, %v602_v55  ;;  %vm582_vm1 = vweird.f32 %v576_v32 }
  0xfd   : > { %v3812_v48 = vadd.f32 %v3749_v35, %v486_v46  ;;  %v676_v50 = vmul.f32 2.1237322e-06, %v3808_v44  ;;  %v640_v58 = vmul.f32 %v639_v43, %v3790_v19  ;;  %v687_v17 = vmul.f32 3.8918573e-05, %v3808_v44 }
  0xfe   : > { %v615_v59 = vmul.f32 %v614_v51, %v3773_v61  ;;  %v651_v60 = vmul.f32 %v650_v52, %v3790_v19  ;;  %v604_v22 = vmul.f32 %v603_v4, %v3773_v61  ;;  %vm587_vm3 = vcmp.eq.f32.partialorder %v586_v10, 8.507059e+37 }
  0xff   : > { %v3818_v56 = vmul.f32 0.70710677, %v3812_v48  ;;  %v3200_v57 = vpop.eup %3199  ;;  %v677_v0 = vadd.f32 0.00028619796, %v676_v50  ;;  %v641_v7 = vadd.f32 0.05243302, %v640_v58 }
 0x100   : > { %v578_v63 = vmul.f32 %v3200_v57, %v576_v32  ;;  %v3825_v1 = vadd.f32 1.0, %v615_v59  ;;  %v652_v45 = vadd.f32 0.112945676, %v651_v60  ;;  %vm583_vm0 = vweird.f32 %v3200_v57 }
 0x101   : > { %v714_v62 = vmul.f32 %v3818_v56, %v3818_v56  ;;  %v678_v15 = vmul.f32 %v677_v0, %v3808_v44  ;;  %vm584_vm2 = vmor %vm582_vm1, %vm583_vm0  ;;  %v589_v25 = vor.u32 1.1754944e-38, %v588_v11  ;;  %v642_v26 = vmul.f32 %v641_v7, %v3790_v19 }
 0x102   : > { %v579_v6 = vsub.f32 1.0, %v578_v63  ;;  %3201 = vrcp.f32 %v3825_v1  ;;  %v653_v16 = vmul.f32 %v652_v45, %v3790_v19  ;;  %v688_v34 = vadd.f32 0.001143296, %v687_v17 }
 0x103   : > { %v3827_v5 = vmin.f32 %v714_v62, 16.0  ;;  %v679_v41 = vadd.f32 0.0036580483, %v678_v15  ;;  %v522_v61 = vmul.f32 0.5, %v3752_v39  ;;  %v605_v43 = vadd.f32 1.1283791, %v604_v22 }
 0x104   : > { %v489_v8 = vpop.f32.mrf.mxu0  ;;  %v580_v14 = vmul.f32 %v3200_v57, %v579_v6  ;;  %v654_v29 = vadd.f32 0.4994258, %v653_v16  ;;  %v689_v42 = vmul.f32 %v688_v34, %v3808_v44  ;;  %v643_v46 = vadd.f32 0.18741608, %v642_v26 }
 0x105   : > { %v716_v12 = vmul.f32 2.1237322e-06, %v3827_v5  ;;  %v3832_v13 = vadd.f32 %v3749_v35, %v489_v8  ;;  %v680_v51 = vmul.f32 %v679_v41, %v3808_v44  ;;  %v626_v54 = vand.u32 2147483647, %v3825_v1 }
 0x106   : > { %v581_v21 = vadd.f32 %v3200_v57, %v580_v14  ;;  %v655_v40 = vmul.f32 %v654_v29, %v3790_v19  ;;  %v628_v58 = vand.u32 2147483648, %v3825_v1  ;;  %v690_v59 = vadd.f32 0.014752088, %v689_v42 }
 0x107   : > { %v3839_v20 = vmul.f32 0.70710677, %v3832_v13  ;;  %v717_v24 = vadd.f32 0.00028619796, %v716_v12  ;;  %v606_v45 = vmul.f32 %v605_v43, %v3767_v53  ;;  %vm622_vm5 = vweird.f32 %v3825_v1 }
 0x108   : > { %v585_v28 = vsel %vm584_vm2, %v3200_v57, %v581_v21  ;;  %v3202_v30 = vpop.eup %3201  ;;  %v3854_v55 = vadd.f32 1.0, %v655_v40  ;;  %v644_v4 = vmul.f32 %v643_v46, %v3790_v19  ;;  %v629_v7 = vor.u32 1.1754944e-38, %v628_v58 }
 0x109   : > { %v754_v27 = vmul.f32 %v3839_v20, %v3839_v20  ;;  %v590_v33 = vsel %vm587_vm3, %v589_v25, %v585_v28  ;;  %v618_v32 = vmul.f32 %v3202_v30, %v3825_v1  ;;  %v718_v37 = vmul.f32 %v717_v24, %v3827_v5 }
 0x10a   : > { %v591_v36 = vmul.f32 %v590_v33, %v566_v18  ;;  %vm623_vm4 = vweird.f32 %v3202_v30  ;;  %3203 = vrcp.f32 %v3854_v55  ;;  %v691_v8 = vmul.f32 %v690_v59, %v3808_v44 }
 0x10b   : > { %v3850_v47 = vmin.f32 %v754_v27, 16.0  ;;  %v619_v52 = vsub.f32 1.0, %v618_v32  ;;  %v719_v60 = vadd.f32 0.0036580483, %v718_v37  ;;  %vm624_vm6 = vmor %vm622_vm5, %vm623_vm4  ;;  %v681_v10 = vadd.f32 0.05243302, %v680_v51 }
 0x10c   : > { %v492_v38 = vpop.f32.mrf.mxu0  ;;  %v3049_v50 = vclamps-f32 %v591_v36, 1.0  ;;  %vm627_vm7 = vcmp.eq.f32.partialorder %v626_v54, 8.507059e+37  ;;  %v692_v17 = vadd.f32 0.112945676, %v691_v8  ;;  %v727_v18 = vmul.f32 3.8918573e-05, %v3827_v5 }
 0x10d   : > { %v3857_v39 = vadd.f32 %v3749_v35, %v492_v38  ;;  %v620_v62 = vmul.f32 %v3202_v30, %v619_v52  ;;  %v756_v63 = vmul.f32 2.1237322e-06, %v3850_v47  ;;  %v720_v11 = vmul.f32 %v719_v60, %v3827_v5 }
 0x10e   : > { %v1194_v57 = vadd.f32 1.0, %v3049_v50  ;;  %v523_v21 = vmul.f32 0.5, %v3763_v49  ;;  %v645_v22 = vadd.f32 1.1283791, %v644_v4  ;;  %v682_v26 = vmul.f32 %v681_v10, %v3808_v44 }
 0x10f   : > { %v621_v3 = vadd.f32 %v3202_v30, %v620_v62  ;;  %v3866_v6 = vmul.f32 0.70710677, %v3857_v39  ;;  %v757_v53 = vadd.f32 0.00028619796, %v756_v63  ;;  %v721_v27 = vadd.f32 0.05243302, %v720_v11 }
 0x110   : > { %v1210_v0 = vmul.f32 %v1194_v57, %v522_v61  ;;  %v3204_v19 = vpop.eup %3203  ;;  %v666_v33 = vand.u32 2147483647, %v3854_v55  ;;  %v693_v49 = vmul.f32 %v692_v17, %v3808_v44  ;;  %v668_v32 = vand.u32 2147483648, %v3854_v55 }
 0x111   : > { %v625_v14 = vsel %vm624_vm6, %v3202_v30, %v621_v3  ;;  %v794_v24 = vmul.f32 %v3866_v6, %v3866_v6  ;;  %v658_v25 = vmul.f32 %v3204_v19, %v3854_v55  ;;  %v758_v30 = vmul.f32 %v757_v53, %v3850_v47 }
 0x112   : > { %1262 = vmatmul.f32.vlgmr.msra.gmra.mxu1 %v1210_v0  ;;  %v630_v1 = vsel %vm627_vm7, %v629_v7, %v625_v14  ;;  %v728_v61 = vadd.f32 0.001143296, %v727_v18  ;;  %vm663_vm8 = vweird.f32 %v3204_v19  ;;  %v694_v40 = vadd.f32 0.4994258, %v693_v49 }
 0x113   : > { %v631_v16 = vmul.f32 %v630_v1, %v606_v45  ;;  %v659_v41 = vsub.f32 1.0, %v658_v25  ;;  %v3888_v37 = vmin.f32 %v794_v24, 16.0  ;;  %vm662_vm9 = vweird.f32 %v3854_v55 }
 0x114   : > { %v495_v12 = vpop.f32.mrf.mxu0  ;;  %v729_v50 = vmul.f32 %v728_v61, %v3827_v5  ;;  %v759_v51 = vadd.f32 0.0036580483, %v758_v30  ;;  %v695_v57 = vmul.f32 %v694_v40, %v3808_v44  ;;  %v646_v58 = vmul.f32 %v645_v22, %v3783_v9  ;;  %vm664_vm10 = vmor %vm662_vm9, %vm663_vm8 }
 0x115   : > { %v3871_v15 = vadd.f32 %v3749_v35, %v495_v12  ;;  %v3050_v29 = vclamps-f32 %v631_v16, 1.0  ;;  %v660_v38 = vmul.f32 %v3204_v19, %v659_v41  ;;  %v669_v59 = vor.u32 1.1754944e-38, %v668_v32 }
 0x116   : > { %v730_v60 = vadd.f32 0.014752088, %v729_v50  ;;  %v767_v62 = vmul.f32 3.8918573e-05, %v3850_v47  ;;  %v796_v63 = vmul.f32 2.1237322e-06, %v3888_v37  ;;  %v722_v9 = vmul.f32 %v721_v27, %v3827_v5 }
 0x117   : > { %v3880_v28 = vmul.f32 0.70710677, %v3871_v15  ;;  %v1195_v36 = vadd.f32 1.0, %v3050_v29  ;;  %v661_v54 = vadd.f32 %v3204_v19, %v660_v38  ;;  %vm667_vm11 = vcmp.eq.f32.partialorder %v666_v33, 8.507059e+37 }
 0x118   : > { %v683_v45 = vadd.f32 0.18741608, %v682_v26  ;;  %v3905_v7 = vadd.f32 1.0, %v695_v57  ;;  %v731_v11 = vmul.f32 %v730_v60, %v3827_v5  ;;  %v760_v12 = vmul.f32 %v759_v51, %v3850_v47 }
 0x119   : > { %v834_v34 = vmul.f32 %v3880_v28, %v3880_v28  ;;  %v1211_v43 = vmul.f32 %v1195_v36, %v523_v21  ;;  %v665_v0 = vsel %vm664_vm10, %v3204_v19, %v661_v54  ;;  %v768_v14 = vadd.f32 0.001143296, %v767_v62 }
 0x11a   : > { %v670_v4 = vsel %vm667_vm11, %v669_v59, %v665_v0  ;;  %3205 = vrcp.f32 %v3905_v7  ;;  %v797_v53 = vadd.f32 0.00028619796, %v796_v63  ;;  %v524_v16 = vmul.f32 0.5, %v3777_v2 }
 0x11b   : > { %v3890_v42 = vmin.f32 %v834_v34, 16.0  ;;  %1265 = vmatmul.f32.gmra.mxu1 %v1211_v43  ;;  %v671_v10 = vmul.f32 %v670_v4, %v646_v58  ;;  %v732_v21 = vadd.f32 0.112945676, %v731_v11  ;;  %v684_v22 = vmul.f32 %v683_v45, %v3808_v44 }
 0x11c   : > { %v498_v46 = vpop.f32.mrf.mxu0  ;;  %v723_v24 = vadd.f32 0.18741608, %v722_v9  ;;  %v761_v27 = vadd.f32 0.05243302, %v760_v12  ;;  %v769_v41 = vmul.f32 %v768_v14, %v3850_v47  ;;  %v798_v33 = vmul.f32 %v797_v53, %v3888_v37 }
 0x11d   : > { %v3895_v52 = vadd.f32 %v3749_v35, %v498_v46  ;;  %v836_v3 = vmul.f32 2.1237322e-06, %v3890_v42  ;;  %v3051_v19 = vclamps-f32 %v671_v10, 1.0  ;;  %v733_v30 = vmul.f32 %v732_v21, %v3827_v5 }
 0x11e   : > { %v685_v32 = vadd.f32 1.1283791, %v684_v22  ;;  %v724_v61 = vmul.f32 %v723_v24, %v3827_v5  ;;  %v762_v43 = vmul.f32 %v761_v27, %v3850_v47  ;;  %v770_v51 = vadd.f32 0.014752088, %v769_v41 }
 0x11f   : > { %v3902_v55 = vmul.f32 0.70710677, %v3895_v52  ;;  %v837_v17 = vadd.f32 0.00028619796, %v836_v3  ;;  %v1196_v25 = vadd.f32 1.0, %v3051_v19  ;;  %v708_v62 = vand.u32 2147483648, %v3905_v7 }
 0x120   : > { %v3206_v34 = vpop.eup %3205  ;;  %v734_v36 = vadd.f32 0.4994258, %v733_v30  ;;  %v799_v54 = vadd.f32 0.0036580483, %v798_v33  ;;  %v706_v59 = vand.u32 2147483647, %v3905_v7  ;;  %v686_v9 = vmul.f32 %v685_v32, %v3802_v31 }
 0x121   : > { %v874_v8 = vmul.f32 %v3902_v55, %v3902_v55  ;;  %v1212_v2 = vmul.f32 %v1196_v25, %v524_v16  ;;  %v838_v44 = vmul.f32 %v837_v17, %v3890_v42  ;;  %v698_v40 = vmul.f32 %v3206_v34, %v3905_v7 }
 0x122   : > { %v735_v50 = vmul.f32 %v734_v36, %v3827_v5  ;;  %vm703_vm12 = vweird.f32 %v3206_v34  ;;  %v771_v5 = vmul.f32 %v770_v51, %v3850_v47  ;;  %v725_v10 = vadd.f32 1.1283791, %v724_v61 }
 0x123   : > { %v3913_v1 = vmin.f32 %v874_v8, 16.0  ;;  %1268 = vmatmul.f32.gmra.mxu1 %v1212_v2  ;;  %v699_v58 = vsub.f32 1.0, %v698_v40  ;;  %v839_v60 = vadd.f32 0.0036580483, %v838_v44  ;;  %v763_v11 = vadd.f32 0.18741608, %v762_v43 }
 0x124   : > { %v501_v18 = vpop.f32.mrf.mxu0  ;;  %v3938_v0 = vadd.f32 1.0, %v735_v50  ;;  %vm702_vm13 = vweird.f32 %v3905_v7  ;;  %v800_v14 = vmul.f32 %v799_v54, %v3888_v37  ;;  %v709_v19 = vor.u32 1.1754944e-38, %v708_v62 }
 0x125   : > { %v3918_v26 = vadd.f32 %v3749_v35, %v501_v18  ;;  %v876_v29 = vmul.f32 2.1237322e-06, %v3913_v1  ;;  %v700_v3 = vmul.f32 %v3206_v34, %v699_v58  ;;  %vm704_vm14 = vmor %vm702_vm13, %vm703_vm12  ;;  %v840_v31 = vmul.f32 %v839_v60, %v3890_v42 }
 0x126   : > { %3207 = vrcp.f32 %v3938_v0  ;;  %vm707_vm15 = vcmp.eq.f32.partialorder %v706_v59, 8.507059e+37  ;;  %v772_v18 = vadd.f32 0.112945676, %v771_v5  ;;  %v525_v7 = vmul.f32 0.5, %v3793_v23 }
 0x127   : > { %v3925_v49 = vmul.f32 0.70710677, %v3918_v26  ;;  %v877_v46 = vadd.f32 0.00028619796, %v876_v29  ;;  %v701_v12 = vadd.f32 %v3206_v34, %v700_v3  ;;  %v726_v25 = vmul.f32 %v725_v10, %v3818_v56 }
 0x128   : > { %v773_v29 = vmul.f32 %v772_v18, %v3850_v47  ;;  %v764_v41 = vmul.f32 %v763_v11, %v3850_v47  ;;  %v801_v33 = vadd.f32 0.05243302, %v800_v14  ;;  %v841_v36 = vadd.f32 0.05243302, %v840_v31 }
 0x129   : > { %v914_v38 = vmul.f32 %v3925_v49, %v3925_v49  ;;  %v878_v8 = vmul.f32 %v877_v46, %v3913_v1  ;;  %v705_v17 = vsel %vm704_vm14, %v3206_v34, %v701_v12  ;;  %v807_v23 = vmul.f32 3.8918573e-05, %v3888_v37 }
 0x12a   : > { %v710_v22 = vsel %vm707_vm15, %v709_v19, %v705_v17  ;;  %v774_v40 = vadd.f32 0.4994258, %v773_v29  ;;  %v847_v43 = vmul.f32 3.8918573e-05, %v3890_v42  ;;  %v746_v51 = vand.u32 2147483647, %v3938_v0 }
 0x12b   : > { %v3934_v57 = vmin.f32 %v914_v38, 16.0  ;;  %v879_v21 = vadd.f32 0.0036580483, %v878_v8  ;;  %v711_v27 = vmul.f32 %v710_v22, %v686_v9  ;;  %v748_v54 = vand.u32 2147483648, %v3938_v0 }
 0x12c   : > { %v504_v63 = vpop.f32.mrf.mxu0  ;;  %v3208_v30 = vpop.eup %3207  ;;  %v775_v62 = vmul.f32 %v774_v40, %v3850_v47  ;;  %v808_v3 = vadd.f32 0.001143296, %v807_v23  ;;  %v802_v5 = vmul.f32 %v801_v33, %v3888_v37  ;;  %v848_v10 = vadd.f32 0.001143296, %v847_v43 }
 0x12d   : > { %v916_v45 = vmul.f32 2.1237322e-06, %v3934_v57  ;;  %v3942_v4 = vadd.f32 %v3749_v35, %v504_v63  ;;  %v3052_v32 = vclamps-f32 %v711_v27, 1.0  ;;  %v738_v61 = vmul.f32 %v3208_v30, %v3938_v0 }
 0x12e   : > { %v880_v56 = vmul.f32 %v879_v21, %v3913_v1  ;;  %vm743_vm0 = vweird.f32 %v3208_v30  ;;  %v3981_v8 = vadd.f32 1.0, %v775_v62  ;;  %v842_v11 = vmul.f32 %v841_v36, %v3890_v42 }
 0x12f   : > { %v917_v53 = vadd.f32 0.00028619796, %v916_v45  ;;  %v3952_v16 = vmul.f32 0.70710677, %v3942_v4  ;;  %v1197_v46 = vadd.f32 1.0, %v3052_v32  ;;  %v739_v50 = vsub.f32 1.0, %v738_v61 }
 0x130   : > { %v881_v12 = vadd.f32 0.05243302, %v880_v56  ;;  %vm742_vm1 = vweird.f32 %v3938_v0  ;;  %3209 = vrcp.f32 %v3981_v8  ;;  %vm747_vm3 = vcmp.eq.f32.partialorder %v746_v51, 8.507059e+37 }
 0x131   : > { %v954_v24 = vmul.f32 %v3952_v16, %v3952_v16  ;;  %v918_v2 = vmul.f32 %v917_v53, %v3934_v57  ;;  %v1213_v63 = vmul.f32 %v1197_v46, %v525_v7  ;;  %v740_v45 = vmul.f32 %v3208_v30, %v739_v50  ;;  %vm744_vm2 = vmor %vm742_vm1, %vm743_vm0 }
 0x132   : > { %v749_v53 = vor.u32 1.1754944e-38, %v748_v54  ;;  %v809_v21 = vmul.f32 %v808_v3, %v3888_v37  ;;  %v849_v0 = vmul.f32 %v848_v10, %v3890_v42  ;;  %v887_v7 = vmul.f32 3.8918573e-05, %v3913_v1 }
 0x133   : > { %v3962_v34 = vmin.f32 %v954_v24, 16.0  ;;  %v919_v58 = vadd.f32 0.0036580483, %v918_v2  ;;  %1271 = vmatmul.f32.gmra.mxu1 %v1213_v63  ;;  %v741_v14 = vadd.f32 %v3208_v30, %v740_v45  ;;  %v765_v33 = vadd.f32 1.1283791, %v764_v41 }
 0x134   : > { %v507_v44 = vpop.f32.mrf.mxu0  ;;  %v803_v2 = vadd.f32 0.18741608, %v802_v5  ;;  %v810_v23 = vadd.f32 0.014752088, %v809_v21  ;;  %v882_v40 = vmul.f32 %v881_v12, %v3913_v1  ;;  %v850_v46 = vadd.f32 0.014752088, %v849_v0 }
 0x135   : > { %v3968_v38 = vadd.f32 %v3749_v35, %v507_v44  ;;  %v956_v59 = vmul.f32 2.1237322e-06, %v3962_v34  ;;  %v920_v17 = vmul.f32 %v919_v58, %v3934_v57  ;;  %v745_v18 = vsel %vm744_vm2, %v3208_v30, %v741_v14 }
 0x136   : > { %v750_v22 = vsel %vm747_vm3, %v749_v53, %v745_v18  ;;  %v843_v44 = vadd.f32 0.18741608, %v842_v11  ;;  %v526_v30 = vmul.f32 0.5, %v3812_v48  ;;  %v3210_v56 = vpop.eup %3209  ;;  %v786_v48 = vand.u32 2147483647, %v3981_v8 }
 0x137   : > { %v3975_v60 = vmul.f32 0.70710677, %v3968_v38  ;;  %v957_v47 = vadd.f32 0.00028619796, %v956_v59  ;;  %v751_v27 = vmul.f32 %v750_v22, %v726_v25  ;;  %v921_v43 = vadd.f32 0.05243302, %v920_v17 }
 0x138   : > { %v888_v25 = vadd.f32 0.001143296, %v887_v7  ;;  %v778_v41 = vmul.f32 %v3210_v56, %v3981_v8  ;;  %v811_v59 = vmul.f32 %v810_v23, %v3888_v37  ;;  %v851_v62 = vmul.f32 %v850_v46, %v3890_v42 }
 0x139   : > { %v994_v9 = vmul.f32 %v3975_v60, %v3975_v60  ;;  %v958_v36 = vmul.f32 %v957_v47, %v3962_v34  ;;  %v3053_v32 = vclamps-f32 %v751_v27, 1.0  ;;  %v788_v10 = vand.u32 2147483648, %v3981_v8 }
 0x13a   : > { %v779_v45 = vsub.f32 1.0, %v778_v41  ;;  %v889_v5 = vmul.f32 %v888_v25, %v3913_v1  ;;  %v812_v11 = vadd.f32 0.112945676, %v811_v59  ;;  %v852_v12 = vadd.f32 0.112945676, %v851_v62 }
 0x13b   : > { %v3985_v19 = vmin.f32 %v994_v9, 16.0  ;;  %v1198_v50 = vadd.f32 1.0, %v3053_v32  ;;  %v959_v58 = vadd.f32 0.0036580483, %v958_v36  ;;  %v766_v9 = vmul.f32 %v765_v33, %v3839_v20 }
 0x13c   : > { %v510_v31 = vpop.f32.mrf.mxu0  ;;  %v780_v47 = vmul.f32 %v3210_v56, %v779_v45  ;;  %vm783_vm4 = vweird.f32 %v3210_v56  ;;  %v890_v53 = vadd.f32 0.014752088, %v889_v5  ;;  %v922_v17 = vmul.f32 %v921_v43, %v3934_v57 }
 0x13d   : > { %v3991_v24 = vadd.f32 %v3749_v35, %v510_v31  ;;  %v996_v29 = vmul.f32 2.1237322e-06, %v3985_v19  ;;  %v1214_v63 = vmul.f32 %v1198_v50, %v526_v30  ;;  %v883_v31 = vadd.f32 0.18741608, %v882_v40 }
 0x13e   : > { %v813_v18 = vmul.f32 %v812_v11, %v3888_v37  ;;  %v853_v21 = vmul.f32 %v852_v12, %v3890_v42  ;;  %v781_v22 = vadd.f32 %v3210_v56, %v780_v47  ;;  %vm782_vm5 = vweird.f32 %v3981_v8 }
 0x13f   : > { %v3999_v61 = vmul.f32 0.70710677, %v3991_v24  ;;  %v997_v51 = vadd.f32 0.00028619796, %v996_v29  ;;  %1274 = vmatmul.f32.gmra.mxu1 %v1214_v63  ;;  %v891_v7 = vmul.f32 %v890_v53, %v3913_v1  ;;  %v960_v27 = vmul.f32 %v959_v58, %v3962_v34  ;;  %vm784_vm6 = vmor %vm782_vm5, %vm783_vm4 }
 0x140   : > { %v789_v29 = vor.u32 1.1754944e-38, %v788_v10  ;;  %v814_v33 = vadd.f32 0.4994258, %v813_v18  ;;  %v785_v32 = vsel %vm784_vm6, %v3210_v56, %v781_v22  ;;  %vm787_vm7 = vcmp.eq.f32.partialorder %v786_v48, 8.507059e+37 }
 0x141   : > { %v1034_v54 = vmul.f32 %v3999_v61, %v3999_v61  ;;  %v998_v14 = vmul.f32 %v997_v51, %v3985_v19  ;;  %v854_v23 = vadd.f32 0.4994258, %v853_v21  ;;  %v892_v43 = vadd.f32 0.112945676, %v891_v7 }
 0x142   : > { %v790_v40 = vsel %vm787_vm7, %v789_v29, %v785_v32  ;;  %v815_v8 = vmul.f32 %v814_v33, %v3888_v37  ;;  %v927_v46 = vmul.f32 3.8918573e-05, %v3934_v57  ;;  %v844_v58 = vmul.f32 %v843_v44, %v3890_v42 }
 0x143   : > { %v4008_v3 = vmin.f32 %v1034_v54, 16.0  ;;  %v999_v30 = vadd.f32 0.0036580483, %v998_v14  ;;  %v791_v25 = vmul.f32 %v790_v40, %v766_v9  ;;  %v855_v41 = vmul.f32 %v854_v23, %v3890_v42 }
 0x144   : > { %v513_v0 = vpop.f32.mrf.mxu0  ;;  %v804_v54 = vmul.f32 %v803_v2, %v3888_v37  ;;  %v884_v56 = vmul.f32 %v883_v31, %v3913_v1  ;;  %v4033_v48 = vadd.f32 1.0, %v815_v8  ;;  %v923_v59 = vadd.f32 0.18741608, %v922_v17 }
 0x145   : > { %v1036_v20 = vmul.f32 2.1237322e-06, %v4008_v3  ;;  %v4022_v36 = vadd.f32 %v3749_v35, %v513_v0  ;;  %v3054_v62 = vclamps-f32 %v791_v25, 1.0  ;;  %v4037_v45 = vadd.f32 1.0, %v855_v41 }
 0x146   : > { %v961_v5 = vadd.f32 0.05243302, %v960_v27  ;;  %3211 = vrcp.f32 %v4033_v48  ;;  %v893_v9 = vmul.f32 %v892_v43, %v3913_v1  ;;  %v928_v10 = vadd.f32 0.001143296, %v927_v46 }
 0x147   : > { %v1037_v50 = vadd.f32 0.00028619796, %v1036_v20  ;;  %v4027_v51 = vmul.f32 0.70710677, %v4022_v36  ;;  %v527_v37 = vmul.f32 0.5, %v3832_v13  ;;  %v1000_v42 = vmul.f32 %v999_v30, %v3985_v19 }
 0x148   : > { %v1199_v2 = vadd.f32 1.0, %v3054_v62  ;;  %v805_v11 = vadd.f32 1.1283791, %v804_v54  ;;  %v845_v12 = vadd.f32 1.1283791, %v844_v58  ;;  %3213 = vrcp.f32 %v4037_v45 }
 0x149   : > { %v1074_v63 = vmul.f32 %v4027_v51, %v4027_v51  ;;  %v1038_v44 = vmul.f32 %v1037_v50, %v4008_v3  ;;  %v4048_v47 = vmul.f32 0.5, %v3857_v39  ;;  %v885_v53 = vadd.f32 1.1283791, %v884_v56 }
 0x14a   : > { %v924_v31 = vmul.f32 %v923_v59, %v3934_v57  ;;  %v1215_v17 = vmul.f32 %v1199_v2, %v527_v37  ;;  %v4052_v13 = vmul.f32 0.5, %v3871_v15  ;;  %v962_v18 = vmul.f32 %v961_v5, %v3962_v34 }
 0x14b   : > { %v4044_v14 = vmin.f32 %v1074_v63, 16.0  ;;  %v894_v21 = vadd.f32 0.4994258, %v893_v9  ;;  %v929_v22 = vmul.f32 %v928_v10, %v3934_v57  ;;  %v4057_v20 = vmul.f32 0.5, %v3895_v52 }
 0x14c   : > { %v4060_v0 = vmul.f32 0.5, %v3918_v26  ;;  %v1001_v39 = vadd.f32 0.05243302, %v1000_v42  ;;  %1277 = vmatmul.f32.gmra.mxu1 %v1215_v17  ;;  %v1039_v7 = vadd.f32 0.0036580483, %v1038_v44  ;;  %v516_v27 = vpop.f32.mrf.mxu0  ;;  %v3212_v29 = vpop.eup %3211  ;;  %v806_v33 = vmul.f32 %v805_v11, %v3866_v6 }
 0x14d   : > { %v846_v15 = vmul.f32 %v845_v12, %v3880_v28  ;;  %v4065_v30 = vmul.f32 0.5, %v3942_v4  ;;  %v1076_v32 = vmul.f32 2.1237322e-06, %v4044_v14  ;;  %v4069_v52 = vmul.f32 %v885_v53, %v3902_v55 }
 0x14e   : > { %v925_v23 = vadd.f32 1.1283791, %v924_v31  ;;  %v4072_v26 = vmul.f32 0.5, %v3968_v38  ;;  %v818_v40 = vmul.f32 %v3212_v29, %v4033_v48  ;;  %v3214_v8 = vpop.eup %3213  ;;  %v963_v43 = vadd.f32 0.18741608, %v962_v18 }
 0x14f   : > { %v4076_v6 = vadd.f32 %v3749_v35, %v516_v27  ;;  %v895_v28 = vmul.f32 %v894_v21, %v3913_v1  ;;  %v930_v4 = vadd.f32 0.014752088, %v929_v22  ;;  %v1002_v46 = vmul.f32 %v1001_v39, %v3985_v19 }
 0x150   : > { %v1040_v25 = vmul.f32 %v1039_v7, %v4008_v3  ;;  %v819_v55 = vsub.f32 1.0, %v818_v40  ;;  %v858_v50 = vmul.f32 %v3214_v8, %v4037_v45  ;;  %vm822_vm8 = vweird.f32 %v4033_v48 }
 0x151   : > { %v828_v38 = vand.u32 2147483648, %v4033_v48  ;;  %v1077_v41 = vadd.f32 0.00028619796, %v1076_v32  ;;  %v4084_v54 = vadd.f32 1.0, %v895_v28  ;;  %vm823_vm9 = vweird.f32 %v3212_v29 }
 0x152   : > { %v820_v58 = vmul.f32 %v3212_v29, %v819_v55  ;;  %v826_v35 = vand.u32 2147483647, %v4033_v48  ;;  %v859_v1 = vsub.f32 1.0, %v858_v50  ;;  %v868_v56 = vand.u32 2147483648, %v4037_v45  ;;  %vm824_vm11 = vmor %vm822_vm8, %vm823_vm9 }
 0x153   : > { %v4089_v59 = vmul.f32 0.70710677, %v4076_v6  ;;  %3215 = vrcp.f32 %v4084_v54  ;;  %v931_v62 = vmul.f32 %v930_v4, %v3934_v57  ;;  %vm863_vm10 = vweird.f32 %v3214_v8 }
 0x154   : > { %v821_v63 = vadd.f32 %v3212_v29, %v820_v58  ;;  %v860_v5 = vmul.f32 %v3214_v8, %v859_v1  ;;  %v866_v9 = vand.u32 2147483647, %v4037_v45  ;;  %v1041_v10 = vadd.f32 0.05243302, %v1040_v25  ;;  %v519_v27 = vpop.f32.mrf.mxu0 }
 0x155   : > { %v829_v37 = vor.u32 1.1754944e-38, %v828_v38  ;;  %v1078_v42 = vmul.f32 %v1077_v41, %v4044_v14  ;;  %v967_v2 = vmul.f32 3.8918573e-05, %v3962_v34  ;;  %vm827_vm12 = vcmp.eq.f32.partialorder %v826_v35, 8.507059e+37  ;;  %v3295_v38 = vld [vmem:[%s5301_s2] ss:$0 sm:$0xff] }
 0x156   : > { %v825_v44 = vsel %vm824_vm11, %v3212_v29, %v821_v63  ;;  %v861_v11 = vadd.f32 %v3214_v8, %v860_v5  ;;  %vm862_vm13 = vweird.f32 %v4037_v45  ;;  %v869_v53 = vor.u32 1.1754944e-38, %v868_v56 }
 0x157   : > { %v830_v12 = vsel %vm827_vm12, %v829_v37, %v825_v44  ;;  %vm864_vm14 = vmor %vm862_vm13, %vm863_vm10  ;;  %v1114_v31 = vmul.f32 %v4089_v59, %v4089_v59  ;;  %v932_v17 = vadd.f32 0.112945676, %v931_v62  ;;  %v4102_v48 = vmul.f32 %v925_v23, %v3925_v49 }
 0x158   : > { %v831_v18 = vmul.f32 %v830_v12, %v806_v33  ;;  %v865_v21 = vsel %vm864_vm14, %v3214_v8, %v861_v11  ;;  %vm867_vm15 = vcmp.eq.f32.partialorder %v866_v9, 8.507059e+37  ;;  %v1079_v39 = vadd.f32 0.0036580483, %v1078_v42 }
 0x159   : > { %v3216_v22 = vpop.eup %3215  ;;  %v870_v7 = vsel %vm867_vm15, %v869_v53, %v865_v21  ;;  %v933_v29 = vmul.f32 %v932_v17, %v3934_v57  ;;  %v968_v45 = vadd.f32 0.001143296, %v967_v2  ;;  %v964_v32 = vmul.f32 %v963_v43, %v3962_v34 }
 0x15a   : > { %v3055_v40 = vclamps-f32 %v831_v18, 1.0  ;;  %v871_v28 = vmul.f32 %v870_v7, %v846_v15  ;;  %v898_v4 = vmul.f32 %v3216_v22, %v4084_v54  ;;  %v1003_v25 = vadd.f32 0.18741608, %v1002_v46 }
 0x15b   : > { %v1042_v49 = vmul.f32 %v1041_v10, %v4008_v3  ;;  %v4108_v23 = vmin.f32 %v1114_v31, 16.0  ;;  %v934_v33 = vadd.f32 0.4994258, %v933_v29  ;;  %v4113_v41 = vadd.f32 %v3295_v38, %v519_v27 }
 0x15c   : > { %v1200_v8 = vadd.f32 1.0, %v3055_v40  ;;  %v3056_v55 = vclamps-f32 %v871_v28, 1.0  ;;  %v899_v50 = vsub.f32 1.0, %v898_v4  ;;  %v1080_v43 = vmul.f32 %v1079_v39, %v4044_v14 }
 0x15d   : > { %v908_v15 = vand.u32 2147483648, %v4084_v54  ;;  %v935_v46 = vmul.f32 %v934_v33, %v3934_v57  ;;  %v969_v58 = vmul.f32 %v968_v45, %v3962_v34  ;;  %vm903_vm0 = vweird.f32 %v3216_v22 }
 0x15e   : > { %v1216_v35 = vmul.f32 %v1200_v8, %v4048_v47  ;;  %v900_v1 = vmul.f32 %v3216_v22, %v899_v50  ;;  %v906_v56 = vand.u32 2147483647, %v4084_v54  ;;  %v1116_v62 = vmul.f32 2.1237322e-06, %v4108_v23 }
 0x15f   : > { %vm902_vm1 = vweird.f32 %v4084_v54  ;;  %v4123_v63 = vadd.f32 1.0, %v935_v46  ;;  %v970_v5 = vadd.f32 0.014752088, %v969_v58  ;;  %v1201_v9 = vadd.f32 1.0, %v3056_v55 }
 0x160   : > { %1280 = vmatmul.f32.gmra.mxu1 %v1216_v35  ;;  %v901_v10 = vadd.f32 %v3216_v22, %v900_v1  ;;  %v4126_v57 = vmul.f32 0.70710677, %v4113_v41  ;;  %v1007_v37 = vmul.f32 3.8918573e-05, %v3985_v19  ;;  %v1043_v47 = vadd.f32 0.18741608, %v1042_v49  ;;  %vm904_vm2 = vmor %vm902_vm1, %vm903_vm0 }
 0x161   : > { %v909_v42 = vor.u32 1.1754944e-38, %v908_v15  ;;  %3217 = vrcp.f32 %v4123_v63  ;;  %v1047_v2 = vmul.f32 3.8918573e-05, %v4008_v3  ;;  %v4131_v44 = vadd.f32 1.1283791, %v964_v32 }
 0x162   : > { %v905_v54 = vsel %vm904_vm2, %v3216_v22, %v901_v10  ;;  %vm907_vm3 = vcmp.eq.f32.partialorder %v906_v56, 8.507059e+37  ;;  %v971_v11 = vmul.f32 %v970_v5, %v3962_v34  ;;  %v1081_v12 = vadd.f32 0.05243302, %v1080_v43 }
 0x163   : > { %v1117_v53 = vadd.f32 0.00028619796, %v1116_v62  ;;  %v910_v31 = vsel %vm907_vm3, %v909_v42, %v905_v54  ;;  %v1008_v17 = vadd.f32 0.001143296, %v1007_v37  ;;  %v1217_v18 = vmul.f32 %v1201_v9, %v4052_v13 }
 0x164   : > { %v911_v21 = vmul.f32 %v910_v31, %v4069_v52  ;;  %v1154_v39 = vmul.f32 %v4126_v57, %v4126_v57  ;;  %v972_v7 = vadd.f32 0.112945676, %v971_v11  ;;  %v1004_v27 = vmul.f32 %v1003_v25, %v3985_v19 }
 0x165   : > { %v4140_v29 = vmul.f32 %v1043_v47, %v4008_v3  ;;  %v1009_v22 = vmul.f32 %v1008_v17, %v3985_v19  ;;  %v1048_v45 = vadd.f32 0.001143296, %v1047_v2  ;;  %v1087_v28 = vmul.f32 3.8918573e-05, %v4044_v14 }
 0x166   : > { %v3057_v32 = vclamps-f32 %v911_v21, 1.0  ;;  %v973_v40 = vmul.f32 %v972_v7, %v3962_v34  ;;  %v1127_v13 = vmul.f32 3.8918573e-05, %v4108_v23  ;;  %v1082_v4 = vmul.f32 %v1081_v12, %v4044_v14 }
 0x167   : > { %v3218_v52 = vpop.eup %3217  ;;  %v1118_v49 = vmul.f32 %v1117_v53, %v4108_v23  ;;  %v1010_v33 = vadd.f32 0.014752088, %v1009_v22  ;;  %v1049_v25 = vmul.f32 %v1048_v45, %v4008_v3  ;;  %v4149_v55 = vmin.f32 %v1154_v39, 16.0 }
 0x168   : > { %1283 = vmatmul.f32.gmra.mxu1 %v1217_v18  ;;  %v1202_v8 = vadd.f32 1.0, %v3057_v32  ;;  %v938_v50 = vmul.f32 %v3218_v52, %v4123_v63  ;;  %v974_v38 = vadd.f32 0.4994258, %v973_v40  ;;  %v946_v43 = vand.u32 2147483647, %v4123_v63 }
 0x169   : > { %v1011_v15 = vmul.f32 %v1010_v33, %v3985_v19  ;;  %v1050_v46 = vadd.f32 0.014752088, %v1049_v25  ;;  %v1088_v58 = vadd.f32 0.001143296, %v1087_v28  ;;  %v948_v1 = vand.u32 2147483648, %v4123_v63 }
 0x16a   : > { %v939_v35 = vsub.f32 1.0, %v938_v50  ;;  %v975_v56 = vmul.f32 %v974_v38, %v3962_v34  ;;  %v1128_v62 = vadd.f32 0.001143296, %v1127_v13  ;;  %vm943_vm4 = vweird.f32 %v3218_v52 }
 0x16b   : > { %v1012_v5 = vadd.f32 0.112945676, %v1011_v15  ;;  %v1051_v9 = vmul.f32 %v1050_v46, %v4008_v3  ;;  %v1089_v10 = vmul.f32 %v1088_v58, %v4044_v14  ;;  %v1218_v37 = vmul.f32 %v1202_v8, %v4057_v20 }
 0x16c   : > { %v940_v47 = vmul.f32 %v3218_v52, %v939_v35  ;;  %v4159_v42 = vadd.f32 1.0, %v975_v56  ;;  %v1129_v2 = vmul.f32 %v1128_v62, %v4108_v23  ;;  %v1083_v54 = vadd.f32 0.18741608, %v1082_v4 }
 0x16d   : > { %v1013_v11 = vmul.f32 %v1012_v5, %v3985_v19  ;;  %v1052_v12 = vadd.f32 0.112945676, %v1051_v9  ;;  %v1090_v53 = vadd.f32 0.014752088, %v1089_v10  ;;  %vm942_vm5 = vweird.f32 %v4123_v63 }
 0x16e   : > { %v941_v34 = vadd.f32 %v3218_v52, %v940_v47  ;;  %3219 = vrcp.f32 %v4159_v42  ;;  %v1167_v31 = vmul.f32 3.8918573e-05, %v4149_v55  ;;  %v1119_v17 = vadd.f32 0.0036580483, %v1118_v49  ;;  %vm944_vm6 = vmor %vm942_vm5, %vm943_vm4 }
 0x16f   : > { %v949_v20 = vor.u32 1.1754944e-38, %v948_v1  ;;  %v1014_v18 = vadd.f32 0.4994258, %v1013_v11  ;;  %v1053_v21 = vmul.f32 %v1052_v12, %v4008_v3  ;;  %vm947_vm7 = vcmp.eq.f32.partialorder %v946_v43, 8.507059e+37 }
 0x170   : > { %1286 = vmatmul.f32.gmra.mxu1 %v1218_v37  ;;  %v945_v39 = vsel %vm944_vm6, %v3218_v52, %v941_v34  ;;  %v1091_v7 = vmul.f32 %v1090_v53, %v4044_v14  ;;  %v1130_v22 = vadd.f32 0.014752088, %v1129_v2  ;;  %v1156_v45 = vmul.f32 2.1237322e-06, %v4149_v55 }
 0x171   : > { %v950_v63 = vsel %vm947_vm7, %v949_v20, %v945_v39  ;;  %v1015_v32 = vmul.f32 %v1014_v18, %v3985_v19  ;;  %v1054_v40 = vadd.f32 0.4994258, %v1053_v21  ;;  %v1168_v49 = vadd.f32 0.001143296, %v1167_v31 }
 0x172   : > { %v951_v28 = vmul.f32 %v950_v63, %v4102_v48  ;;  %v1092_v13 = vadd.f32 0.112945676, %v1091_v7  ;;  %v1131_v4 = vmul.f32 %v1130_v22, %v4108_v23  ;;  %v966_v33 = vmul.f32 %v4131_v44, %v3952_v16 }
 0x173   : > { %v1005_v52 = vadd.f32 1.1283791, %v1004_v27  ;;  %v4175_v25 = vadd.f32 1.0, %v1015_v32  ;;  %v1055_v8 = vmul.f32 %v1054_v40, %v4008_v3  ;;  %v1169_v15 = vmul.f32 %v1168_v49, %v4149_v55 }
 0x174   : > { %v3220_v50 = vpop.eup %3219  ;;  %v3058_v38 = vclamps-f32 %v951_v28, 1.0  ;;  %v1093_v43 = vmul.f32 %v1092_v13, %v4044_v14  ;;  %v1132_v19 = vadd.f32 0.112945676, %v1131_v4  ;;  %v1045_v48 = vadd.f32 1.1283791, %v4140_v29 }
 0x175   : > { %v1157_v46 = vadd.f32 0.00028619796, %v1156_v45  ;;  %v978_v58 = vmul.f32 %v3220_v50, %v4159_v42  ;;  %3221 = vrcp.f32 %v4175_v25  ;;  %v1084_v16 = vmul.f32 %v1083_v54, %v4044_v14 }
 0x176   : > { %v1120_v44 = vmul.f32 %v1119_v17, %v4108_v23  ;;  %v1203_v27 = vadd.f32 1.0, %v3058_v38  ;;  %v4185_v3 = vadd.f32 1.0, %v1055_v8  ;;  %v1094_v1 = vadd.f32 0.4994258, %v1093_v43 }
 0x177   : > { %v979_v35 = vsub.f32 1.0, %v978_v58  ;;  %v1133_v56 = vmul.f32 %v1132_v19, %v4108_v23  ;;  %v1170_v62 = vadd.f32 0.014752088, %v1169_v15  ;;  %v4189_v5 = vmul.f32 %v1005_v52, %v3975_v60 }
 0x178   : > { %v1219_v29 = vmul.f32 %v1203_v27, %v4060_v0  ;;  %v988_v9 = vand.u32 2147483648, %v4159_v42  ;;  %3223 = vrcp.f32 %v4185_v3  ;;  %v1158_v10 = vmul.f32 %v1157_v46, %v4149_v55 }
 0x179   : > { %v980_v37 = vmul.f32 %v3220_v50, %v979_v35  ;;  %vm983_vm8 = vweird.f32 %v3220_v50  ;;  %v986_v47 = vand.u32 2147483647, %v4159_v42  ;;  %v4197_v2 = vmul.f32 %v1045_v48, %v3999_v61 }
 0x17a   : > { %1289 = vmatmul.f32.gmra.mxu1 %v1219_v29  ;;  %v1095_v54 = vmul.f32 %v1094_v1, %v4044_v14  ;;  %v1134_v60 = vadd.f32 0.4994258, %v1133_v56  ;;  %v1171_v11 = vmul.f32 %v1170_v62, %v4149_v55  ;;  %v4201_v12 = vadd.f32 1.1283791, %v1084_v16 }
 0x17b   : > { %v3222_v0 = vpop.eup %3221  ;;  %v1121_v53 = vadd.f32 0.05243302, %v1120_v44  ;;  %v981_v34 = vadd.f32 %v3220_v50, %v980_v37  ;;  %vm982_vm9 = vweird.f32 %v4159_v42  ;;  %v989_v31 = vor.u32 1.1754944e-38, %v988_v9 }
 0x17c   : > { %vm984_vm10 = vmor %vm982_vm9, %vm983_vm8  ;;  %v1018_v17 = vmul.f32 %v3222_v0, %v4175_v25  ;;  %v4205_v20 = vadd.f32 1.0, %v1095_v54  ;;  %v1135_v61 = vmul.f32 %v1134_v60, %v4108_v23  ;;  %v1159_v18 = vadd.f32 0.0036580483, %v1158_v10 }
 0x17d   : > { %v985_v14 = vsel %vm984_vm10, %v3220_v50, %v981_v34  ;;  %vm987_vm11 = vcmp.eq.f32.partialorder %v986_v47, 8.507059e+37  ;;  %v1172_v21 = vadd.f32 0.112945676, %v1171_v11  ;;  %v1028_v45 = vand.u32 2147483648, %v4175_v25 }
 0x17e   : > { %v3224_v39 = vpop.eup %3223  ;;  %v990_v7 = vsel %vm987_vm11, %v989_v31, %v985_v14  ;;  %v1019_v22 = vsub.f32 1.0, %v1018_v17  ;;  %3225 = vrcp.f32 %v4205_v20  ;;  %v1122_v42 = vmul.f32 %v1121_v53, %v4108_v23 }
 0x17f   : > { %v991_v63 = vmul.f32 %v990_v7, %v966_v33  ;;  %v1026_v32 = vand.u32 2147483647, %v4175_v25  ;;  %v1058_v40 = vmul.f32 %v3224_v39, %v4185_v3  ;;  %vm1023_vm12 = vweird.f32 %v3222_v0 }
 0x180   : > { %v1020_v28 = vmul.f32 %v3222_v0, %v1019_v22  ;;  %v4213_v13 = vadd.f32 1.0, %v1135_v61  ;;  %v1173_v4 = vmul.f32 %v1172_v21, %v4149_v55  ;;  %v1160_v49 = vmul.f32 %v1159_v18, %v4149_v55 }
 0x181   : > { %v3059_v52 = vclamps-f32 %v991_v63, 1.0  ;;  %vm1022_vm13 = vweird.f32 %v4175_v25  ;;  %v1059_v8 = vsub.f32 1.0, %v1058_v40  ;;  %v1029_v38 = vor.u32 1.1754944e-38, %v1028_v45 }
 0x182   : > { %v1021_v50 = vadd.f32 %v3222_v0, %v1020_v28  ;;  %v1068_v33 = vand.u32 2147483648, %v4185_v3  ;;  %3227 = vrcp.f32 %v4213_v13  ;;  %vm1024_vm14 = vmor %vm1022_vm13, %vm1023_vm12  ;;  %vm1063_vm15 = vweird.f32 %v3224_v39 }
 0x183   : > { %v1204_v43 = vadd.f32 1.0, %v3059_v52  ;;  %v1060_v19 = vmul.f32 %v3224_v39, %v1059_v8  ;;  %v1066_v15 = vand.u32 2147483647, %v4185_v3  ;;  %vm1027_vm0 = vcmp.eq.f32.partialorder %v1026_v32, 8.507059e+37 }
 0x184   : > { %v3226_v48 = vpop.eup %3225  ;;  %v1025_v46 = vsel %vm1024_vm14, %v3222_v0, %v1021_v50  ;;  %vm1062_vm1 = vweird.f32 %v4185_v3  ;;  %v1174_v58 = vadd.f32 0.4994258, %v1173_v4  ;;  %v1123_v35 = vadd.f32 0.18741608, %v1122_v42 }
 0x185   : > { %v1220_v25 = vmul.f32 %v1204_v43, %v4065_v30  ;;  %v1030_v16 = vsel %vm1027_vm0, %v1029_v38, %v1025_v46  ;;  %v1061_v44 = vadd.f32 %v3224_v39, %v1060_v19  ;;  %v1098_v27 = vmul.f32 %v3226_v48, %v4205_v20  ;;  %vm1064_vm2 = vmor %vm1062_vm1, %vm1063_vm15 }
 0x186   : > { %v1161_v1 = vadd.f32 0.05243302, %v1160_v49  ;;  %v1031_v56 = vmul.f32 %v1030_v16, %v4189_v5  ;;  %v1069_v62 = vor.u32 1.1754944e-38, %v1068_v33  ;;  %vm1067_vm3 = vcmp.eq.f32.partialorder %v1066_v15, 8.507059e+37 }
 0x187   : > { %1292 = vmatmul.f32.gmra.mxu1 %v1220_v25  ;;  %v1065_v29 = vsel %vm1064_vm2, %v3224_v39, %v1061_v44  ;;  %v1099_v9 = vsub.f32 1.0, %v1098_v27  ;;  %v1175_v10 = vmul.f32 %v1174_v58, %v4149_v55  ;;  %v1106_v30 = vand.u32 2147483647, %v4205_v20 }
 0x188   : > { %v3228_v3 = vpop.eup %3227  ;;  %v3060_v37 = vclamps-f32 %v1031_v56, 1.0  ;;  %v1070_v47 = vsel %vm1067_vm3, %v1069_v62, %v1065_v29  ;;  %v1108_v54 = vand.u32 2147483648, %v4205_v20  ;;  %vm1103_vm4 = vweird.f32 %v3226_v48 }
 0x189   : > { %v1071_v60 = vmul.f32 %v1070_v47, %v4197_v2  ;;  %v1100_v11 = vmul.f32 %v3226_v48, %v1099_v9  ;;  %v1138_v5 = vmul.f32 %v3228_v3, %v4213_v13  ;;  %v1086_v0 = vmul.f32 %v4201_v12, %v4027_v51 }
 0x18a   : > { %v1124_v53 = vmul.f32 %v1123_v35, %v4108_v23  ;;  %v1205_v34 = vadd.f32 1.0, %v3060_v37  ;;  %v4233_v31 = vadd.f32 1.0, %v1175_v10  ;;  %vm1102_vm5 = vweird.f32 %v4205_v20 }
 0x18b   : > { %v3061_v17 = vclamps-f32 %v1071_v60, 1.0  ;;  %v1101_v61 = vadd.f32 %v3226_v48, %v1100_v11  ;;  %v1139_v18 = vsub.f32 1.0, %v1138_v5  ;;  %v1162_v14 = vmul.f32 %v1161_v1, %v4149_v55  ;;  %vm1104_vm6 = vmor %vm1102_vm5, %vm1103_vm4 }
 0x18c   : > { %v1221_v2 = vmul.f32 %v1205_v34, %v4072_v26  ;;  %v1109_v21 = vor.u32 1.1754944e-38, %v1108_v54  ;;  %3229 = vrcp.f32 %v4233_v31  ;;  %vm1107_vm7 = vcmp.eq.f32.partialorder %v1106_v30, 8.507059e+37  ;;  %v4245_v26 = vld [vmem:[%s5303_s4] ss:$0 sm:$0xff]  ;;  %v2030_v30 = vld [vmem:[#allocation8 + $0x78] sm:$0xff] }
 0x18d   : > { %v1105_v39 = vsel %vm1104_vm6, %v3226_v48, %v1101_v61  ;;  %v1140_v51 = vmul.f32 %v3228_v3, %v1139_v18  ;;  %vm1143_vm8 = vweird.f32 %v3228_v3  ;;  %vm1142_vm9 = vweird.f32 %v4213_v13  ;;  %2035 = vmatpush.msra.mxu2 %v2030_v30 }
 0x18e   : > { %v1110_v23 = vsel %vm1107_vm7, %v1109_v21, %v1105_v39  ;;  %v1148_v12 = vand.u32 2147483648, %v4213_v13  ;;  %v1206_v20 = vadd.f32 1.0, %v3061_v17  ;;  %v1146_v45 = vand.u32 2147483647, %v4213_v13  ;;  %vm1144_vm10 = vmor %vm1142_vm9, %vm1143_vm8 }
 0x18f   : > { %1295 = vmatmul.f32.gmra.mxu1 %v1221_v2  ;;  %v1111_v7 = vmul.f32 %v1110_v23, %v1086_v0  ;;  %v1141_v22 = vadd.f32 %v3228_v3, %v1140_v51  ;;  %v1263_v42 = vpop.f32.mrf.mxu1  ;;  %v534_v63 = vmul.f32 0.5, %v3991_v24  ;;  %v1125_v32 = vadd.f32 1.1283791, %v1124_v53 }
 0x190   : > { %v1163_v40 = vadd.f32 0.18741608, %v1162_v14  ;;  %v4249_v4 = vadd.f32 %v4245_v26, %v1263_v42  ;;  %v1149_v52 = vor.u32 1.1754944e-38, %v1148_v12  ;;  %vm1147_vm11 = vcmp.eq.f32.partialorder %v1146_v45, 8.507059e+37 }
 0x191   : > { %v1145_v28 = vsel %vm1144_vm10, %v3228_v3, %v1141_v22  ;;  %v1222_v8 = vmul.f32 %v1206_v20, %v534_v63  ;;  %v3062_v50 = vclamps-f32 %v1111_v7, 1.0  ;;  %v1126_v24 = vmul.f32 %v1125_v32, %v4089_v59 }
 0x192   : > { %v3230_v49 = vpop.eup %3229  ;;  %v1150_v38 = vsel %vm1147_vm11, %v1149_v52, %v1145_v28  ;;  %v4253_v33 = vmul.f32 0.70710677, %v4249_v4  ;;  %v1164_v43 = vmul.f32 %v1163_v40, %v4149_v55  ;;  %v1186_v15 = vand.u32 2147483647, %v4233_v31 }
 0x193   : > { %v1178_v13 = vmul.f32 %v3230_v49, %v4233_v31  ;;  %v1188_v48 = vand.u32 2147483648, %v4233_v31  ;;  %v1207_v58 = vadd.f32 1.0, %v3062_v50  ;;  %v1151_v25 = vmul.f32 %v1150_v38, %v1126_v24 }
 0x194   : > { %v1343_v46 = vmul.f32 %v4253_v33, %v4253_v33  ;;  %vm1183_vm12 = vweird.f32 %v3230_v49  ;;  %v535_v55 = vmul.f32 0.5, %v4022_v36  ;;  %v1165_v35 = vadd.f32 1.1283791, %v1164_v43 }
 0x195   : > { %v1179_v19 = vsub.f32 1.0, %v1178_v13  ;;  %vm1182_vm13 = vweird.f32 %v4233_v31  ;;  %v1189_v56 = vor.u32 1.1754944e-38, %v1188_v48  ;;  %v3063_v10 = vclamps-f32 %v1151_v25, 1.0  ;;  %v2028_v48 = vld [vmem:[#allocation8 + $0x68] sm:$0xff] }
 0x196   : > { %v4261_v27 = vmin.f32 %v1343_v46, 16.0  ;;  %vm1184_vm14 = vmor %vm1182_vm13, %vm1183_vm12  ;;  %v1223_v9 = vmul.f32 %v1207_v58, %v535_v55  ;;  %vm1187_vm15 = vcmp.eq.f32.partialorder %v1186_v15, 8.507059e+37  ;;  %v1166_v54 = vmul.f32 %v1165_v35, %v4126_v57  ;;  %v2029_v15 = vld [vmem:[#allocation8 + $0x70] sm:$0xff] }
 0x197   : > { %1298 = vmatmul.f32.gmra.mxu1 %v1222_v8  ;;  %v1180_v16 = vmul.f32 %v3230_v49, %v1179_v19  ;;  %v1208_v5 = vadd.f32 1.0, %v3063_v10  ;;  %v536_v18 = vmul.f32 0.5, %v4076_v6  ;;  %v537_v28 = vmul.f32 0.5, %v4113_v41  ;;  %2036 = vmatpush.msra.mxu2 %v2029_v15 }
 0x198   : > { %v1266_v44 = vpop.f32.mrf.mxu1  ;;  %v1345_v62 = vmul.f32 2.1237322e-06, %v4261_v27  ;;  %v1356_v11 = vmul.f32 3.8918573e-05, %v4261_v27 }
 0x199   : > { %v4264_v59 = vadd.f32 %v4245_v26, %v1266_v44  ;;  %v1181_v1 = vadd.f32 %v3230_v49, %v1180_v16  ;;  %v1224_v2 = vmul.f32 %v1208_v5, %v536_v18  ;;  %v2027_v44 = vld [vmem:[#allocation8 + $0x60] sm:$0xff]  ;;  %2037 = vmatpush.msra.mxu2 %v2028_v48 }
 0x19a   : > { %v1346_v47 = vadd.f32 0.00028619796, %v1345_v62  ;;  %v1357_v61 = vadd.f32 0.001143296, %v1356_v11 }
 0x19b   : > { %v4270_v29 = vmul.f32 0.70710677, %v4264_v59  ;;  %v1185_v3 = vsel %vm1184_vm14, %v3230_v49, %v1181_v1  ;;  %2038 = vmatpush.msra.mxu2 %v2027_v44 }
 0x19c   : > { %v1190_v37 = vsel %vm1187_vm15, %v1189_v56, %v1185_v3  ;;  %v1347_v53 = vmul.f32 %v1346_v47, %v4261_v27  ;;  %v1358_v51 = vmul.f32 %v1357_v61, %v4261_v27 }
 0x19d   : > { %v1383_v36 = vmul.f32 %v4270_v29, %v4270_v29  ;;  %v1191_v0 = vmul.f32 %v1190_v37, %v1166_v54 }
 0x19e   : > { %v1348_v39 = vadd.f32 0.0036580483, %v1347_v53  ;;  %v1359_v20 = vadd.f32 0.014752088, %v1358_v51 }
 0x19f   : > { %v4275_v60 = vmin.f32 %v1383_v36, 16.0  ;;  %1301 = vmatmul.f32.gmra.mxu1 %v1223_v9  ;;  %v3064_v21 = vclamps-f32 %v1191_v0, 1.0  ;;  %v2026_v9 = vld [vmem:[#allocation8 + $0x58] sm:$0xff]  ;;  %v2025_v0 = vld [vmem:[#allocation8 + $0x50] sm:$0xff] }
 0x1a0   : > { %v1269_v34 = vpop.f32.mrf.mxu1  ;;  %v1349_v45 = vmul.f32 %v1348_v39, %v4261_v27  ;;  %v1360_v63 = vmul.f32 %v1359_v20, %v4261_v27  ;;  %2039 = vmatpush.msra.mxu2 %v2026_v9  ;;  %v2023_v39 = vld [vmem:[#allocation8 + $0x40] sm:$0xff]  ;;  %v2022_v20 = vld [vmem:[#allocation8 + $0x38] sm:$0xff] }
 0x1a1   : > { %v1385_v31 = vmul.f32 2.1237322e-06, %v4275_v60  ;;  %v4281_v17 = vadd.f32 %v4245_v26, %v1269_v34  ;;  %v1396_v22 = vmul.f32 3.8918573e-05, %v4275_v60  ;;  %v1209_v6 = vadd.f32 1.0, %v3064_v21 }
 0x1a2   : > { %v1361_v49 = vadd.f32 0.112945676, %v1360_v63  ;;  %v1350_v13 = vadd.f32 0.05243302, %v1349_v45  ;;  %2040 = vmatpush.msra.mxu2 %v2025_v0 }
 0x1a3   : > { %v1386_v57 = vadd.f32 0.00028619796, %v1385_v31  ;;  %v4285_v14 = vmul.f32 0.70710677, %v4281_v17  ;;  %v1397_v40 = vadd.f32 0.001143296, %v1396_v22  ;;  %v1225_v50 = vmul.f32 %v1209_v6, %v537_v28 }
 0x1a4   : > { %v1362_v24 = vmul.f32 %v1361_v49, %v4261_v27  ;;  %v1351_v41 = vmul.f32 %v1350_v13, %v4261_v27 }
 0x1a5   : > { %v1387_v23 = vmul.f32 %v1386_v57, %v4275_v60  ;;  %v1423_v12 = vmul.f32 %v4285_v14, %v4285_v14  ;;  %v1398_v8 = vmul.f32 %v1397_v40, %v4275_v60  ;;  %v2024_v57 = vld [vmem:[#allocation8 + $0x48] sm:$0xff] }
 0x1a6   : > { %v1363_v46 = vadd.f32 0.4994258, %v1362_v24  ;;  %v1352_v47 = vadd.f32 0.18741608, %v1351_v41  ;;  %2041 = vmatpush.msra.mxu2 %v2024_v57 }
 0x1a7   : > { %v4291_v7 = vmin.f32 %v1423_v12, 16.0  ;;  %1304 = vmatmul.f32.gmra.mxu1 %v1224_v2  ;;  %v1388_v42 = vadd.f32 0.0036580483, %v1387_v23  ;;  %v1399_v19 = vadd.f32 0.014752088, %v1398_v8 }
 0x1a8   : > { %v1364_v55 = vmul.f32 %v1363_v46, %v4261_v27  ;;  %v1353_v31 = vmul.f32 %v1352_v47, %v4261_v27  ;;  %2042 = vmatpush.msra.mxu2 %v2023_v39  ;;  %v2020_v46 = vld [vmem:[#allocation8 + $0x28] sm:$0xff]  ;;  %v2018_v47 = vld [vmem:[#allocation8 + $0x18] sm:$0xff] }
 0x1a9   : > { %v1425_v32 = vmul.f32 2.1237322e-06, %v4291_v7  ;;  %v1389_v38 = vmul.f32 %v1388_v42, %v4275_v60  ;;  %v1400_v58 = vmul.f32 %v1399_v19, %v4275_v60  ;;  %v1436_v35 = vmul.f32 3.8918573e-05, %v4291_v7 }
 0x1aa   : > { %v4309_v10 = vadd.f32 1.0, %v1364_v55  ;;  %v1354_v45 = vadd.f32 1.1283791, %v1353_v31  ;;  %2043 = vmatpush.msra.mxu2 %v2022_v20  ;;  %v1311_v20 = vmul.f32 0.5, %v4249_v4  ;;  %v2015_v4 = vld [vmem:[#allocation8] sm:$0xff] }
 0x1ab   : > { %v1426_v52 = vadd.f32 0.00028619796, %v1425_v32  ;;  %v1390_v25 = vadd.f32 0.05243302, %v1389_v38  ;;  %v1401_v62 = vadd.f32 0.112945676, %v1400_v58 }
 0x1ac   : > { %v1437_v3 = vadd.f32 0.001143296, %v1436_v35  ;;  %3231 = vrcp.f32 %v4309_v10  ;;  %v1375_v49 = vand.u32 2147483647, %v4309_v10  ;;  %v1377_v13 = vand.u32 2147483648, %v4309_v10  ;;  %v2019_v35 = vld [vmem:[#allocation8 + $0x20] sm:$0xff] }
 0x1ad   : > { %v1427_v43 = vmul.f32 %v1426_v52, %v4291_v7  ;;  %v1402_v37 = vmul.f32 %v1401_v62, %v4275_v60  ;;  %v1391_v36 = vmul.f32 %v1390_v25, %v4275_v60  ;;  %v1355_v15 = vmul.f32 %v1354_v45, %v4253_v33 }
 0x1ae   : > { %v1438_v53 = vmul.f32 %v1437_v3, %v4291_v7  ;;  %vm1371_vm1 = vweird.f32 %v4309_v10  ;;  %vm1376_vm2 = vcmp.eq.f32.partialorder %v1375_v49, 8.507059e+37 }
 0x1af   : > { %1307 = vmatmul.f32.gmra.mxu1 %v1225_v50  ;;  %v1428_v1 = vadd.f32 0.0036580483, %v1427_v43  ;;  %v1403_v11 = vadd.f32 0.4994258, %v1402_v37  ;;  %v1392_v61 = vadd.f32 0.18741608, %v1391_v36 }
 0x1b0   : > { %v1272_v16 = vpop.f32.mrf.mxu1  ;;  %v1439_v2 = vadd.f32 0.014752088, %v1438_v53  ;;  %v2021_v50 = vld [vmem:[#allocation8 + $0x30] sm:$0xff] }
 0x1b1   : > { %v4307_v56 = vadd.f32 %v4245_v26, %v1272_v16  ;;  %v1429_v54 = vmul.f32 %v1428_v1, %v4291_v7  ;;  %v1404_v34 = vmul.f32 %v1403_v11, %v4275_v60  ;;  %v1393_v42 = vmul.f32 %v1392_v61, %v4275_v60  ;;  %2044 = vmatpush.msra.mxu2 %v2021_v50  ;;  %v2017_v61 = vld [vmem:[#allocation8 + $0x10] sm:$0xff] }
 0x1b2   : > { %v3232_v23 = vpop.eup %3231  ;;  %v1440_v22 = vmul.f32 %v1439_v2, %v4291_v7  ;;  %v1378_v1 = vor.u32 1.1754944e-38, %v1377_v13 }
 0x1b3   : > { %v4314_v30 = vmul.f32 0.70710677, %v4307_v56  ;;  %v1430_v21 = vadd.f32 0.05243302, %v1429_v54  ;;  %v4325_v51 = vadd.f32 1.0, %v1404_v34  ;;  %v1367_v27 = vmul.f32 %v3232_v23, %v4309_v10  ;;  %2045 = vmatpush.msra.mxu2 %v2020_v46 }
 0x1b4   : > { %v1441_v52 = vadd.f32 0.112945676, %v1440_v22  ;;  %vm1372_vm0 = vweird.f32 %v3232_v23  ;;  %v1394_v48 = vadd.f32 1.1283791, %v1393_v42  ;;  %v2016_v22 = vld [vmem:[#allocation8 + $0x8] sm:$0xff] }
 0x1b5   : > { %v1463_v5 = vmul.f32 %v4314_v30, %v4314_v30  ;;  %3233 = vrcp.f32 %v4325_v51  ;;  %v1368_v28 = vsub.f32 1.0, %v1367_v27  ;;  %v1431_v8 = vmul.f32 %v1430_v21, %v4291_v7  ;;  %vm1373_vm3 = vmor %vm1371_vm1, %vm1372_vm0  ;;  %2046 = vmatpush.msra.mxu2 %v2019_v35 }
 0x1b6   : > { %v1442_v19 = vmul.f32 %v1441_v52, %v4291_v7  ;;  %v1417_v11 = vand.u32 2147483648, %v4325_v51  ;;  %v1415_v2 = vand.u32 2147483647, %v4325_v51  ;;  %vm1411_vm5 = vweird.f32 %v4325_v51 }
 0x1b7   : > { %v4323_v18 = vmin.f32 %v1463_v5, 16.0  ;;  %v1369_v43 = vmul.f32 %v3232_v23, %v1368_v28  ;;  %v1432_v55 = vadd.f32 0.18741608, %v1431_v8  ;;  %2047 = vmatpush.msra.mxu2 %v2018_v47  ;;  %v1395_v28 = vmul.f32 %v1394_v48, %v4270_v29 }
 0x1b8   : > { %v1443_v44 = vadd.f32 0.4994258, %v1442_v19  ;;  %v1418_v27 = vor.u32 1.1754944e-38, %v1417_v11  ;;  %vm1416_vm7 = vcmp.eq.f32.partialorder %v1415_v2, 8.507059e+37 }
 0x1b9   : > { %v1465_v12 = vmul.f32 2.1237322e-06, %v4323_v18  ;;  %v1476_v6 = vmul.f32 3.8918573e-05, %v4323_v18  ;;  %v1370_v16 = vadd.f32 %v3232_v23, %v1369_v43  ;;  %2048 = vmatpush.msra.mxu2 %v2017_v61  ;;  %v1433_v49 = vmul.f32 %v1432_v55, %v4291_v7 }
 0x1ba   : > { %v1444_v37 = vmul.f32 %v1443_v44, %v4291_v7  ;;  %v1312_v7 = vmul.f32 0.5, %v4264_v59 }
 0x1bb   : > { %v1466_v63 = vadd.f32 0.00028619796, %v1465_v12  ;;  %v1477_v38 = vadd.f32 0.001143296, %v1476_v6  ;;  %v3234_v41 = vpop.eup %3233  ;;  %v1374_v3 = vsel %vm1373_vm3, %v3232_v23, %v1370_v16  ;;  %2049 = vmatpush.msra.mxu2 %v2016_v22  ;;  %v1434_v55 = vadd.f32 1.1283791, %v1433_v49 }
 0x1bc   : > { %v1275_v32 = vpop.f32.mrf.mxu1  ;;  %v1407_v33 = vmul.f32 %v3234_v41, %v4325_v51  ;;  %v1379_v36 = vsel %vm1376_vm2, %v1378_v1, %v1374_v3  ;;  %v4357_v34 = vadd.f32 1.0, %v1444_v37  ;;  %vm1412_vm4 = vweird.f32 %v3234_v41 }
 0x1bd   : > { %v4334_v40 = vadd.f32 %v4245_v26, %v1275_v32  ;;  %v1467_v24 = vmul.f32 %v1466_v63, %v4323_v18  ;;  %v1478_v58 = vmul.f32 %v1477_v38, %v4323_v18  ;;  %v1380_v53 = vmul.f32 %v1379_v36, %v1355_v15  ;;  %vm1413_vm6 = vmor %vm1411_vm5, %vm1412_vm4  ;;  %2050 = vmatpush.msra.mxu2 %v2015_v4 }
 0x1be   : > { %v1408_v54 = vsub.f32 1.0, %v1407_v33  ;;  %3235 = vrcp.f32 %v4357_v34  ;;  %v1457_v59 = vand.u32 2147483648, %v4357_v34  ;;  %v1455_v36 = vand.u32 2147483647, %v4357_v34 }
 0x1bf   : > { %v4341_v60 = vmul.f32 0.70710677, %v4334_v40  ;;  %v1479_v62 = vadd.f32 0.014752088, %v1478_v58  ;;  %v1468_v9 = vadd.f32 0.0036580483, %v1467_v24  ;;  %vm1451_vm9 = vweird.f32 %v4357_v34 }
 0x1c0   : > { %v1409_v57 = vmul.f32 %v3234_v41, %v1408_v54  ;;  %v3065_v12 = vclamps-f32 %v1380_v53, 1.0  ;;  %v1458_v61 = vor.u32 1.1754944e-38, %v1457_v59  ;;  %v1435_v2 = vmul.f32 %v1434_v55, %v4285_v14 }
 0x1c1   : > { %v1503_v25 = vmul.f32 %v4341_v60, %v4341_v60  ;;  %v1480_v5 = vmul.f32 %v1479_v62, %v4323_v18  ;;  %v1469_v39 = vmul.f32 %v1468_v9, %v4323_v18  ;;  %vm1456_vm11 = vcmp.eq.f32.partialorder %v1455_v36, 8.507059e+37 }
 0x1c2   : > { %v1410_v6 = vadd.f32 %v3234_v41, %v1409_v57  ;;  %v1983_v42 = vadd.f32 1.0, %v3065_v12  ;;  %v1313_v49 = vmul.f32 0.5, %v4281_v17 }
 0x1c3   : > { %v4351_v10 = vmin.f32 %v1503_v25, 16.0  ;;  %v1481_v21 = vadd.f32 0.112945676, %v1480_v5  ;;  %v1470_v50 = vadd.f32 0.05243302, %v1469_v39 }
 0x1c4   : > { %v1414_v8 = vsel %vm1413_vm6, %v3234_v41, %v1410_v6  ;;  %v1999_v13 = vmul.f32 %v1983_v42, %v1311_v20  ;;  %v3236_v46 = vpop.eup %3235 }
 0x1c5   : > { %v1505_v0 = vmul.f32 2.1237322e-06, %v4351_v10  ;;  %v1516_v31 = vmul.f32 3.8918573e-05, %v4351_v10  ;;  %v1482_v63 = vmul.f32 %v1481_v21, %v4323_v18  ;;  %v1419_v38 = vsel %vm1416_vm7, %v1418_v27, %v1414_v8 }
 0x1c6   : > { %v1420_v43 = vmul.f32 %v1419_v38, %v1395_v28  ;;  %2051 = vmatmul.f32.vlgmr.msra.gmra.mxu2 %v1999_v13  ;;  %v1447_v58 = vmul.f32 %v3236_v46, %v4357_v34  ;;  %v1471_v41 = vmul.f32 %v1470_v50, %v4323_v18  ;;  %vm1452_vm8 = vweird.f32 %v3236_v46 }
 0x1c7   : > { %v1506_v23 = vadd.f32 0.00028619796, %v1505_v0  ;;  %v1517_v32 = vadd.f32 0.001143296, %v1516_v31  ;;  %v1483_v19 = vadd.f32 0.4994258, %v1482_v63  ;;  %vm1453_vm10 = vmor %vm1451_vm9, %vm1452_vm8 }
 0x1c8   : > { %v3066_v48 = vclamps-f32 %v1420_v43, 1.0  ;;  %v1448_v33 = vsub.f32 1.0, %v1447_v58  ;;  %v1472_v54 = vadd.f32 0.18741608, %v1471_v41 }
 0x1c9   : > { %v1507_v45 = vmul.f32 %v1506_v23, %v4351_v10  ;;  %v1278_v52 = vpop.f32.mrf.mxu1  ;;  %v1518_v15 = vmul.f32 %v1517_v32, %v4351_v10  ;;  %v1484_v16 = vmul.f32 %v1483_v19, %v4323_v18 }
 0x1ca   : > { %v4371_v51 = vadd.f32 %v4245_v26, %v1278_v52  ;;  %v1984_v1 = vadd.f32 1.0, %v3066_v48  ;;  %v1449_v47 = vmul.f32 %v3236_v46, %v1448_v33  ;;  %v1473_v23 = vmul.f32 %v1472_v54, %v4323_v18 }
 0x1cb   : > { %v1508_v24 = vadd.f32 0.0036580483, %v1507_v45  ;;  %v1519_v44 = vadd.f32 0.014752088, %v1518_v15  ;;  %v4387_v9 = vadd.f32 1.0, %v1484_v16 }
 0x1cc   : > { %v4375_v29 = vmul.f32 0.70710677, %v4371_v51  ;;  %v2000_v37 = vmul.f32 %v1984_v1, %v1312_v7  ;;  %v1450_v0 = vadd.f32 %v3236_v46, %v1449_v47  ;;  %v1474_v18 = vadd.f32 1.1283791, %v1473_v23 }
 0x1cd   : > { %v1509_v35 = vmul.f32 %v1508_v24, %v4351_v10  ;;  %v1520_v3 = vmul.f32 %v1519_v44, %v4351_v10  ;;  %3237 = vrcp.f32 %v4387_v9  ;;  %v1495_v38 = vand.u32 2147483647, %v4387_v9 }
 0x1ce   : > { %v1543_v25 = vmul.f32 %v4375_v29, %v4375_v29  ;;  %2054 = vmatmul.f32.gmra.mxu2 %v2000_v37  ;;  %v1454_v21 = vsel %vm1453_vm10, %v3236_v46, %v1450_v0  ;;  %v1497_v24 = vand.u32 2147483648, %v4387_v9  ;;  %vm1491_vm13 = vweird.f32 %v4387_v9 }
 0x1cf   : > { %v1510_v5 = vadd.f32 0.05243302, %v1509_v35  ;;  %v1521_v53 = vadd.f32 0.112945676, %v1520_v3  ;;  %v1459_v20 = vsel %vm1456_vm11, %v1458_v61, %v1454_v21  ;;  %v1475_v41 = vmul.f32 %v1474_v18, %v4314_v30 }
 0x1d0   : > { %v4384_v62 = vmin.f32 %v1543_v25, 16.0  ;;  %v1460_v6 = vmul.f32 %v1459_v20, %v1435_v2  ;;  %v1498_v44 = vor.u32 1.1754944e-38, %v1497_v24  ;;  %vm1496_vm15 = vcmp.eq.f32.partialorder %v1495_v38, 8.507059e+37 }
 0x1d1   : > { %v1522_v39 = vmul.f32 %v1521_v53, %v4351_v10  ;;  %v1511_v34 = vmul.f32 %v1510_v5, %v4351_v10 }
 0x1d2   : > { %v1545_v11 = vmul.f32 2.1237322e-06, %v4384_v62  ;;  %v1556_v57 = vmul.f32 3.8918573e-05, %v4384_v62  ;;  %v3067_v32 = vclamps-f32 %v1460_v6, 1.0 }
 0x1d3   : > { %v1523_v27 = vadd.f32 0.4994258, %v1522_v39  ;;  %v3238_v45 = vpop.eup %3237  ;;  %v1512_v4 = vadd.f32 0.18741608, %v1511_v34 }
 0x1d4   : > { %v1546_v31 = vadd.f32 0.00028619796, %v1545_v11  ;;  %v1557_v22 = vadd.f32 0.001143296, %v1556_v57  ;;  %v1487_v14 = vmul.f32 %v3238_v45, %v4387_v9  ;;  %v1985_v8 = vadd.f32 1.0, %v3067_v32 }
 0x1d5   : > { %v1524_v28 = vmul.f32 %v1523_v27, %v4351_v10  ;;  %vm1492_vm12 = vweird.f32 %v3238_v45  ;;  %v1513_v25 = vmul.f32 %v1512_v4, %v4351_v10  ;;  %v1314_v10 = vmul.f32 0.5, %v4307_v56 }
 0x1d6   : > { %v1547_v12 = vmul.f32 %v1546_v31, %v4384_v62  ;;  %v1558_v42 = vmul.f32 %v1557_v22, %v4384_v62  ;;  %v1488_v50 = vsub.f32 1.0, %v1487_v14  ;;  %v2001_v46 = vmul.f32 %v1985_v8, %v1313_v49  ;;  %vm1493_vm14 = vmor %vm1491_vm13, %vm1492_vm12 }
 0x1d7   : > { %v4404_v13 = vadd.f32 1.0, %v1524_v28  ;;  %v1514_v36 = vadd.f32 1.1283791, %v1513_v25 }
 0x1d8   : > { %v1548_v63 = vadd.f32 0.0036580483, %v1547_v12  ;;  %v1559_v52 = vadd.f32 0.014752088, %v1558_v42  ;;  %v1489_v7 = vmul.f32 %v3238_v45, %v1488_v50  ;;  %2057 = vmatmul.f32.gmra.mxu2 %v2001_v46  ;;  %v1315_v46 = vmul.f32 0.5, %v4334_v40 }
 0x1d9   : > { %3239 = vrcp.f32 %v4404_v13  ;;  %v1535_v57 = vand.u32 2147483647, %v4404_v13  ;;  %v1537_v2 = vand.u32 2147483648, %v4404_v13  ;;  %vm1531_vm1 = vweird.f32 %v4404_v13 }
 0x1da   : > { %v1560_v43 = vmul.f32 %v1559_v52, %v4384_v62  ;;  %v1549_v19 = vmul.f32 %v1548_v63, %v4384_v62  ;;  %v1490_v48 = vadd.f32 %v3238_v45, %v1489_v7  ;;  %v1515_v32 = vmul.f32 %v1514_v36, %v4341_v60 }
 0x1db   : > { %v1538_v42 = vor.u32 1.1754944e-38, %v1537_v2  ;;  %vm1536_vm3 = vcmp.eq.f32.partialorder %v1535_v57, 8.507059e+37 }
 0x1dc   : > { %v1561_v58 = vadd.f32 0.112945676, %v1560_v43  ;;  %v1550_v55 = vadd.f32 0.05243302, %v1549_v19  ;;  %v1494_v35 = vsel %vm1493_vm14, %v3238_v45, %v1490_v48 }
 0x1dd   : > { %v1281_v15 = vpop.f32.mrf.mxu1  ;;  %v1499_v59 = vsel %vm1496_vm15, %v1498_v44, %v1494_v35 }
 0x1de   : > { %v4412_v17 = vadd.f32 %v4245_v26, %v1281_v15  ;;  %v1562_v1 = vmul.f32 %v1561_v58, %v4384_v62  ;;  %v1500_v3 = vmul.f32 %v1499_v59, %v1475_v41  ;;  %v1551_v54 = vmul.f32 %v1550_v55, %v4384_v62 }
 0x1df   : > { %v3240_v9 = vpop.eup %3239 }
 0x1e0   : > { %v4418_v16 = vmul.f32 0.70710677, %v4412_v17  ;;  %v1563_v30 = vadd.f32 0.4994258, %v1562_v1  ;;  %v1527_v47 = vmul.f32 %v3240_v9, %v4404_v13  ;;  %v3068_v5 = vclamps-f32 %v1500_v3, 1.0 }
 0x1e1   : > { %vm1532_vm0 = vweird.f32 %v3240_v9  ;;  %v1552_v45 = vadd.f32 0.18741608, %v1551_v54 }
 0x1e2   : > { %v1583_v33 = vmul.f32 %v4418_v16, %v4418_v16  ;;  %v1564_v0 = vmul.f32 %v1563_v30, %v4384_v62  ;;  %v1528_v61 = vsub.f32 1.0, %v1527_v47  ;;  %v1986_v56 = vadd.f32 1.0, %v3068_v5  ;;  %vm1533_vm2 = vmor %vm1531_vm1, %vm1532_vm0 }
 0x1e3   : > { %v1553_v24 = vmul.f32 %v1552_v45, %v4384_v62 }
 0x1e4   : > { %v4425_v37 = vmin.f32 %v1583_v33, 16.0  ;;  %v4436_v21 = vadd.f32 1.0, %v1564_v0  ;;  %v1529_v20 = vmul.f32 %v3240_v9, %v1528_v61  ;;  %v2002_v22 = vmul.f32 %v1986_v56, %v1314_v10 }
 0x1e5   : > { %v1284_v11 = vpop.f32.mrf.mxu1  ;;  %v1554_v55 = vadd.f32 1.1283791, %v1553_v24 }
 0x1e6   : > { %v1585_v53 = vmul.f32 2.1237322e-06, %v4425_v37  ;;  %v4432_v31 = vadd.f32 %v4245_v26, %v1284_v11  ;;  %v1596_v39 = vmul.f32 3.8918573e-05, %v4425_v37  ;;  %3241 = vrcp.f32 %v4436_v21  ;;  %2060 = vmatmul.f32.gmra.mxu2 %v2002_v22 }
 0x1e7   : > { %v1530_v27 = vadd.f32 %v3240_v9, %v1529_v20  ;;  %vm1571_vm5 = vweird.f32 %v4436_v21  ;;  %v1575_v54 = vand.u32 2147483647, %v4436_v21 }
 0x1e8   : > { %v1586_v23 = vadd.f32 0.00028619796, %v1585_v53  ;;  %v4440_v12 = vmul.f32 0.70710677, %v4432_v31  ;;  %v1597_v63 = vadd.f32 0.001143296, %v1596_v39 }
 0x1e9   : > { %v1534_v28 = vsel %vm1533_vm2, %v3240_v9, %v1530_v27  ;;  %v1577_v9 = vand.u32 2147483648, %v4436_v21  ;;  %vm1576_vm7 = vcmp.eq.f32.partialorder %v1575_v54, 8.507059e+37 }
 0x1ea   : > { %v1587_v34 = vmul.f32 %v1586_v23, %v4425_v37  ;;  %v1623_v6 = vmul.f32 %v4440_v12, %v4440_v12  ;;  %v1539_v18 = vsel %vm1536_vm3, %v1538_v42, %v1534_v28  ;;  %v1598_v52 = vmul.f32 %v1597_v63, %v4425_v37 }
 0x1eb   : > { %v1540_v13 = vmul.f32 %v1539_v18, %v1515_v32  ;;  %v1578_v39 = vor.u32 1.1754944e-38, %v1577_v9 }
 0x1ec   : > { %v4448_v14 = vmin.f32 %v1623_v6, 16.0  ;;  %v1588_v4 = vadd.f32 0.0036580483, %v1587_v34  ;;  %v3242_v38 = vpop.eup %3241  ;;  %v1599_v43 = vadd.f32 0.014752088, %v1598_v52  ;;  %v1555_v6 = vmul.f32 %v1554_v55, %v4375_v29 }
 0x1ed   : > { %v1287_v49 = vpop.f32.mrf.mxu1  ;;  %v3069_v15 = vclamps-f32 %v1540_v13, 1.0  ;;  %v1567_v48 = vmul.f32 %v3242_v38, %v4436_v21  ;;  %vm1572_vm4 = vweird.f32 %v3242_v38 }
 0x1ee   : > { %v1625_v8 = vmul.f32 2.1237322e-06, %v4448_v14  ;;  %v4453_v50 = vadd.f32 %v4245_v26, %v1287_v49  ;;  %v1636_v60 = vmul.f32 3.8918573e-05, %v4448_v14  ;;  %v1600_v58 = vmul.f32 %v1599_v43, %v4425_v37  ;;  %vm1573_vm6 = vmor %vm1571_vm5, %vm1572_vm4 }
 0x1ef   : > { %v1589_v41 = vmul.f32 %v1588_v4, %v4425_v37  ;;  %v1987_v44 = vadd.f32 1.0, %v3069_v15  ;;  %v1568_v1 = vsub.f32 1.0, %v1567_v48 }
 0x1f0   : > { %v1626_v19 = vadd.f32 0.00028619796, %v1625_v8  ;;  %v4459_v7 = vmul.f32 0.70710677, %v4453_v50  ;;  %v1637_v62 = vadd.f32 0.001143296, %v1636_v60 }
 0x1f1   : > { %v1601_v33 = vadd.f32 0.112945676, %v1600_v58  ;;  %v2003_v59 = vmul.f32 %v1987_v44, %v1315_v46  ;;  %v1569_v10 = vmul.f32 %v3242_v38, %v1568_v1  ;;  %v1590_v36 = vadd.f32 0.05243302, %v1589_v41 }
 0x1f2   : > { %v1627_v25 = vmul.f32 %v1626_v19, %v4448_v14  ;;  %v1663_v35 = vmul.f32 %v4459_v7, %v4459_v7  ;;  %v1638_v3 = vmul.f32 %v1637_v62, %v4448_v14  ;;  %v1316_v19 = vmul.f32 0.5, %v4371_v51 }
 0x1f3   : > { %v1602_v47 = vmul.f32 %v1601_v33, %v4425_v37  ;;  %2063 = vmatmul.f32.gmra.mxu2 %v2003_v59  ;;  %v1570_v53 = vadd.f32 %v3242_v38, %v1569_v10  ;;  %v1591_v27 = vmul.f32 %v1590_v36, %v4425_v37 }
 0x1f4   : > { %v1628_v40 = vadd.f32 0.0036580483, %v1627_v25  ;;  %v4469_v30 = vmin.f32 %v1663_v35, 16.0  ;;  %v1639_v11 = vadd.f32 0.014752088, %v1638_v3 }
 0x1f5   : > { %v1603_v61 = vadd.f32 0.4994258, %v1602_v47  ;;  %v1574_v22 = vsel %vm1573_vm6, %v3242_v38, %v1570_v53  ;;  %v1592_v8 = vadd.f32 0.18741608, %v1591_v27 }
 0x1f6   : > { %v1665_v5 = vmul.f32 2.1237322e-06, %v4469_v30  ;;  %v1676_v57 = vmul.f32 3.8918573e-05, %v4469_v30  ;;  %v1629_v56 = vmul.f32 %v1628_v40, %v4448_v14  ;;  %v1640_v23 = vmul.f32 %v1639_v11, %v4448_v14 }
 0x1f7   : > { %v1290_v0 = vpop.f32.mrf.mxu1  ;;  %v1604_v21 = vmul.f32 %v1603_v61, %v4425_v37  ;;  %v1579_v63 = vsel %vm1576_vm7, %v1578_v39, %v1574_v22  ;;  %v1593_v44 = vmul.f32 %v1592_v8, %v4425_v37 }
 0x1f8   : > { %v4478_v2 = vadd.f32 %v4245_v26, %v1290_v0  ;;  %v1666_v20 = vadd.f32 0.00028619796, %v1665_v5  ;;  %v1677_v34 = vadd.f32 0.001143296, %v1676_v57  ;;  %v1641_v28 = vadd.f32 0.112945676, %v1640_v23 }
 0x1f9   : > { %v4488_v32 = vadd.f32 1.0, %v1604_v21  ;;  %v1630_v49 = vadd.f32 0.05243302, %v1629_v56  ;;  %v1580_v52 = vmul.f32 %v1579_v63, %v1555_v6  ;;  %v1594_v54 = vadd.f32 1.1283791, %v1593_v44 }
 0x1fa   : > { %v4485_v45 = vmul.f32 0.70710677, %v4478_v2  ;;  %v1667_v42 = vmul.f32 %v1666_v20, %v4469_v30  ;;  %v1678_v4 = vmul.f32 %v1677_v34, %v4469_v30  ;;  %v1642_v43 = vmul.f32 %v1641_v28, %v4448_v14 }
 0x1fb   : > { %3243 = vrcp.f32 %v4488_v32  ;;  %v3070_v38 = vclamps-f32 %v1580_v52, 1.0  ;;  %v1631_v15 = vmul.f32 %v1630_v49, %v4448_v14  ;;  %v1615_v61 = vand.u32 2147483647, %v4488_v32 }
 0x1fc   : > { %v1703_v18 = vmul.f32 %v4485_v45, %v4485_v45  ;;  %v1668_v29 = vadd.f32 0.0036580483, %v1667_v42  ;;  %v1679_v60 = vadd.f32 0.014752088, %v1678_v4  ;;  %v1643_v58 = vadd.f32 0.4994258, %v1642_v43 }
 0x1fd   : > { %v1988_v48 = vadd.f32 1.0, %v3070_v38  ;;  %v1632_v59 = vadd.f32 0.18741608, %v1631_v15  ;;  %v1617_v57 = vand.u32 2147483648, %v4488_v32  ;;  %v1317_v20 = vmul.f32 0.5, %v4412_v17 }
 0x1fe   : > { %v4494_v13 = vmin.f32 %v1703_v18, 16.0  ;;  %v1669_v24 = vmul.f32 %v1668_v29, %v4469_v30  ;;  %v1680_v41 = vmul.f32 %v1679_v60, %v4469_v30  ;;  %v1644_v33 = vmul.f32 %v1643_v58, %v4448_v14 }
 0x1ff   : > { %v2004_v35 = vmul.f32 %v1988_v48, %v1316_v19  ;;  %v1633_v56 = vmul.f32 %v1632_v59, %v4448_v14  ;;  %vm1611_vm9 = vweird.f32 %v4488_v32  ;;  %v1595_v42 = vmul.f32 %v1594_v54, %v4418_v16 }
 0x200   : > { %v1705_v46 = vmul.f32 2.1237322e-06, %v4494_v13  ;;  %v1716_v25 = vmul.f32 3.8918573e-05, %v4494_v13  ;;  %v1670_v62 = vadd.f32 0.05243302, %v1669_v24 }
 0x201   : > { %v3244_v1 = vpop.eup %3243  ;;  %v1681_v40 = vadd.f32 0.112945676, %v1680_v41  ;;  %2066 = vmatmul.f32.gmra.mxu2 %v2004_v35  ;;  %v4510_v36 = vadd.f32 1.0, %v1644_v33  ;;  %v1618_v14 = vor.u32 1.1754944e-38, %v1617_v57  ;;  %v1634_v49 = vadd.f32 1.1283791, %v1633_v56 }
 0x202   : > { %v1706_v55 = vadd.f32 0.00028619796, %v1705_v46  ;;  %v1717_v51 = vadd.f32 0.001143296, %v1716_v25  ;;  %v1607_v10 = vmul.f32 %v3244_v1, %v4488_v32  ;;  %v1671_v11 = vmul.f32 %v1670_v62, %v4469_v30 }
 0x203   : > { %v1682_v37 = vmul.f32 %v1681_v40, %v4469_v30  ;;  %3245 = vrcp.f32 %v4510_v36  ;;  %vm1612_vm8 = vweird.f32 %v3244_v1  ;;  %vm1616_vm11 = vcmp.eq.f32.partialorder %v1615_v61, 8.507059e+37 }
 0x204   : > { %v1707_v9 = vmul.f32 %v1706_v55, %v4494_v13  ;;  %v1293_v3 = vpop.f32.mrf.mxu1  ;;  %v1608_v5 = vsub.f32 1.0, %v1607_v10  ;;  %v1718_v0 = vmul.f32 %v1717_v51, %v4494_v13  ;;  %v1672_v34 = vadd.f32 0.18741608, %v1671_v11  ;;  %vm1613_vm10 = vmor %vm1611_vm9, %vm1612_vm8 }
 0x205   : > { %v4508_v47 = vadd.f32 %v4245_v26, %v1293_v3  ;;  %v1683_v21 = vadd.f32 0.4994258, %v1682_v37  ;;  %v1655_v46 = vand.u32 2147483647, %v4510_v36  ;;  %v4546_v48 = vmul.f32 0.5, %v4432_v31 }
 0x206   : > { %v1708_v39 = vadd.f32 0.0036580483, %v1707_v9  ;;  %v1609_v23 = vmul.f32 %v3244_v1, %v1608_v5  ;;  %v1719_v27 = vadd.f32 0.014752088, %v1718_v0  ;;  %v1673_v38 = vmul.f32 %v1672_v34, %v4469_v30 }
 0x207   : > { %v4516_v53 = vmul.f32 0.70710677, %v4508_v47  ;;  %v1684_v28 = vmul.f32 %v1683_v21, %v4469_v30  ;;  %v1657_v30 = vand.u32 2147483648, %v4510_v36  ;;  %v1635_v25 = vmul.f32 %v1634_v49, %v4440_v12 }
 0x208   : > { %v1610_v6 = vadd.f32 %v3244_v1, %v1609_v23  ;;  %v1709_v17 = vmul.f32 %v1708_v39, %v4494_v13  ;;  %v1720_v60 = vmul.f32 %v1719_v27, %v4494_v13  ;;  %vm1651_vm12 = vweird.f32 %v4510_v36 }
 0x209   : > { %v1743_v22 = vmul.f32 %v4516_v53, %v4516_v53  ;;  %v3246_v4 = vpop.eup %3245  ;;  %v4535_v16 = vadd.f32 1.0, %v1684_v28  ;;  %v1674_v33 = vadd.f32 1.1283791, %v1673_v38  ;;  %vm4556_vm14 = vcmp.eq.f32.partialorder %v1655_v46, 8.507059e+37 }
 0x20a   : > { %v1614_v52 = vsel %vm1613_vm10, %v3244_v1, %v1610_v6  ;;  %v1647_v43 = vmul.f32 %v3246_v4, %v4510_v36  ;;  %v1710_v44 = vadd.f32 0.05243302, %v1709_v17  ;;  %vm1652_vm13 = vweird.f32 %v3246_v4 }
 0x20b   : > { %v4527_v63 = vmin.f32 %v1743_v22, 16.0  ;;  %v1619_v8 = vsel %vm1616_vm11, %v1618_v14, %v1614_v52  ;;  %3247 = vrcp.f32 %v4535_v16  ;;  %v1721_v1 = vadd.f32 0.112945676, %v1720_v60  ;;  %vm1653_vm15 = vmor %vm1651_vm12, %vm1652_vm13 }
 0x20c   : > { %v1296_v18 = vpop.f32.mrf.mxu1  ;;  %v1620_v24 = vmul.f32 %v1619_v8, %v1595_v42  ;;  %v1648_v41 = vsub.f32 1.0, %v1647_v43  ;;  %v1658_v3 = vor.u32 1.1754944e-38, %v1657_v30  ;;  %v1711_v54 = vmul.f32 %v1710_v44, %v4494_v13 }
 0x20d   : > { %v1745_v29 = vmul.f32 2.1237322e-06, %v4527_v63  ;;  %v4533_v32 = vadd.f32 %v4245_v26, %v1296_v18  ;;  %v1722_v10 = vmul.f32 %v1721_v1, %v4494_v13  ;;  %v1756_v0 = vmul.f32 3.8918573e-05, %v4527_v63 }
 0x20e   : > { %v3071_v58 = vclamps-f32 %v1620_v24, 1.0  ;;  %v1649_v35 = vmul.f32 %v3246_v4, %v1648_v41  ;;  %v1695_v56 = vand.u32 2147483647, %v4535_v16  ;;  %v1712_v52 = vadd.f32 0.18741608, %v1711_v54 }
 0x20f   : > { %v1746_v19 = vadd.f32 0.00028619796, %v1745_v29  ;;  %v4541_v15 = vmul.f32 0.70710677, %v4533_v32  ;;  %v1723_v39 = vadd.f32 0.4994258, %v1722_v10  ;;  %vm1691_vm1 = vweird.f32 %v4535_v16 }
 0x210   : > { %v1989_v55 = vadd.f32 1.0, %v3071_v58  ;;  %v1650_v9 = vadd.f32 %v3246_v4, %v1649_v35  ;;  %v1757_v42 = vadd.f32 0.001143296, %v1756_v0  ;;  %v1675_v60 = vmul.f32 %v1674_v33, %v4459_v7 }
 0x211   : > { %v1783_v62 = vmul.f32 %v4541_v15, %v4541_v15  ;;  %v1747_v31 = vmul.f32 %v1746_v19, %v4527_v63  ;;  %v3248_v37 = vpop.eup %3247  ;;  %v1724_v6 = vmul.f32 %v1723_v39, %v4494_v13  ;;  %v4594_v19 = vld [vmem:[%s5303_s4] ss:$0 sm:$0xff]  ;;  %vm1696_vm3 = vcmp.eq.f32.partialorder %v1695_v56, 8.507059e+37 }
 0x212   : > { %v2005_v59 = vmul.f32 %v1989_v55, %v1317_v20  ;;  %v1654_v61 = vsel %vm1653_vm15, %v3246_v4, %v1650_v9  ;;  %v1687_v57 = vmul.f32 %v3248_v37, %v4535_v16  ;;  %vm1692_vm0 = vweird.f32 %v3248_v37 }
 0x213   : > { %v4554_v40 = vmin.f32 %v1783_v62, 16.0  ;;  %v1748_v23 = vadd.f32 0.0036580483, %v1747_v31  ;;  %v1659_v22 = vsel %vm4556_vm14, %v1658_v3, %v1654_v61  ;;  %v4583_v18 = vadd.f32 1.0, %v1724_v6  ;;  %vm1693_vm2 = vmor %vm1691_vm1, %vm1692_vm0 }
 0x214   : > { %v1299_v12 = vpop.f32.mrf.mxu1  ;;  %2069 = vmatmul.f32.gmra.mxu2 %v2005_v59  ;;  %v1660_v36 = vmul.f32 %v1659_v22, %v1635_v25  ;;  %v1688_v34 = vsub.f32 1.0, %v1687_v57  ;;  %v1758_v58 = vmul.f32 %v1757_v42, %v4527_v63  ;;  %v1713_v7 = vmul.f32 %v1712_v52, %v4494_v13 }
 0x215   : > { %v1785_v11 = vmul.f32 2.1237322e-06, %v4554_v40  ;;  %v4564_v5 = vadd.f32 %v4245_v26, %v1299_v12  ;;  %v1697_v26 = vand.u32 2147483648, %v4535_v16  ;;  %v1796_v14 = vmul.f32 3.8918573e-05, %v4554_v40 }
 0x216   : > { %v3072_v49 = vclamps-f32 %v1660_v36, 1.0  ;;  %v1689_v17 = vmul.f32 %v3248_v37, %v1688_v34  ;;  %v1749_v4 = vmul.f32 %v1748_v23, %v4527_v63  ;;  %3249 = vrcp.f32 %v4583_v18 }
 0x217   : > { %v1786_v20 = vadd.f32 0.00028619796, %v1785_v11  ;;  %v4576_v21 = vmul.f32 0.70710677, %v4564_v5  ;;  %v1698_v16 = vor.u32 1.1754944e-38, %v1697_v26  ;;  %v1319_v13 = vmul.f32 0.5, %v4453_v50 }
 0x218   : > { %v1990_v24 = vadd.f32 1.0, %v3072_v49  ;;  %v1690_v43 = vadd.f32 %v3248_v37, %v1689_v17  ;;  %v1797_v25 = vadd.f32 0.001143296, %v1796_v14  ;;  %v1750_v44 = vadd.f32 0.05243302, %v1749_v4 }
 0x219   : > { %v1787_v27 = vmul.f32 %v1786_v20, %v4554_v40  ;;  %v1823_v28 = vmul.f32 %v4576_v21, %v4576_v21  ;;  %v1759_v31 = vadd.f32 0.014752088, %v1758_v58  ;;  %v1714_v9 = vadd.f32 1.1283791, %v1713_v7 }
 0x21a   : > { %v2006_v41 = vmul.f32 %v1990_v24, %v4546_v48  ;;  %v1694_v30 = vsel %vm1693_vm2, %v3248_v37, %v1690_v43  ;;  %v1798_v59 = vmul.f32 %v1797_v25, %v4554_v40  ;;  %v1751_v3 = vmul.f32 %v1750_v44, %v4527_v63 }
 0x21b   : > { %v1788_v29 = vadd.f32 0.0036580483, %v1787_v27  ;;  %v4587_v8 = vmin.f32 %v1823_v28, 16.0  ;;  %v1699_v62 = vsel %vm1696_vm3, %v1698_v16, %v1694_v30  ;;  %v1760_v61 = vmul.f32 %v1759_v31, %v4527_v63 }
 0x21c   : > { %v1302_v38 = vpop.f32.mrf.mxu1  ;;  %2072 = vmatmul.f32.gmra.mxu2 %v2006_v41  ;;  %v1700_v33 = vmul.f32 %v1699_v62, %v1675_v60  ;;  %v3250_v51 = vpop.eup %3249  ;;  %v1737_v39 = vand.u32 2147483648, %v4583_v18  ;;  %v1799_v23 = vadd.f32 0.014752088, %v1798_v59  ;;  %vm1731_vm4 = vweird.f32 %v4583_v18 }
 0x21d   : > { %v4597_v46 = vadd.f32 %v4594_v19, %v1302_v38  ;;  %v1789_v55 = vmul.f32 %v1788_v29, %v4554_v40  ;;  %v1825_v35 = vmul.f32 2.1237322e-06, %v4587_v8  ;;  %v1727_v10 = vmul.f32 %v3250_v51, %v4583_v18 }
 0x21e   : > { %v3073_v12 = vclamps-f32 %v1700_v33, 1.0  ;;  %v1761_v22 = vadd.f32 0.112945676, %v1760_v61  ;;  %vm1732_vm5 = vweird.f32 %v3250_v51  ;;  %v1735_v34 = vand.u32 2147483647, %v4583_v18 }
 0x21f   : > { %v4606_v1 = vmul.f32 0.70710677, %v4597_v46  ;;  %v1790_v37 = vadd.f32 0.05243302, %v1789_v55  ;;  %v1826_v54 = vadd.f32 0.00028619796, %v1825_v35  ;;  %v1800_v14 = vmul.f32 %v1799_v23, %v4554_v40  ;;  %vm1733_vm6 = vmor %vm1731_vm4, %vm1732_vm5 }
 0x220   : > { %v1991_v0 = vadd.f32 1.0, %v3073_v12  ;;  %v1728_v56 = vsub.f32 1.0, %v1727_v10  ;;  %v1762_v42 = vmul.f32 %v1761_v22, %v4527_v63  ;;  %v1738_v17 = vor.u32 1.1754944e-38, %v1737_v39 }
 0x221   : > { %v1863_v48 = vmul.f32 %v4606_v1, %v4606_v1  ;;  %v1791_v6 = vmul.f32 %v1790_v37, %v4554_v40  ;;  %v1827_v27 = vmul.f32 %v1826_v54, %v4587_v8  ;;  %v1836_v52 = vmul.f32 3.8918573e-05, %v4587_v8 }
 0x222   : > { %v2007_v50 = vmul.f32 %v1991_v0, %v1319_v13  ;;  %v1729_v36 = vmul.f32 %v3250_v51, %v1728_v56  ;;  %v1715_v4 = vmul.f32 %v1714_v9, %v4485_v45  ;;  %v1763_v38 = vadd.f32 0.4994258, %v1762_v42 }
 0x223   : > { %v4619_v20 = vmin.f32 %v1863_v48, 16.0  ;;  %v1801_v24 = vadd.f32 0.112945676, %v1800_v14  ;;  %v1752_v43 = vadd.f32 0.18741608, %v1751_v3  ;;  %vm1736_vm7 = vcmp.eq.f32.partialorder %v1735_v34, 8.507059e+37 }
 0x224   : > { %v1305_v11 = vpop.f32.mrf.mxu1  ;;  %2075 = vmatmul.f32.gmra.mxu2 %v2007_v50  ;;  %v1730_v49 = vadd.f32 %v3250_v51, %v1729_v36  ;;  %v1792_v58 = vadd.f32 0.18741608, %v1791_v6  ;;  %v1764_v25 = vmul.f32 %v1763_v38, %v4527_v63  ;;  %v1837_v7 = vadd.f32 0.001143296, %v1836_v52 }
 0x225   : > { %v4616_v57 = vadd.f32 %v4594_v19, %v1305_v11  ;;  %v1865_v29 = vmul.f32 2.1237322e-06, %v4619_v20  ;;  %v1828_v44 = vadd.f32 0.0036580483, %v1827_v27  ;;  %v1802_v33 = vmul.f32 %v1801_v24, %v4554_v40 }
 0x226   : > { %v1734_v16 = vsel %vm1733_vm6, %v3250_v51, %v1730_v49  ;;  %v4644_v35 = vadd.f32 1.0, %v1764_v25  ;;  %v1320_v31 = vmul.f32 0.5, %v4478_v2  ;;  %v1753_v12 = vmul.f32 %v1752_v43, %v4527_v63 }
 0x227   : > { %v4623_v26 = vmul.f32 0.70710677, %v4616_v57  ;;  %v1739_v30 = vsel %vm1736_vm7, %v1738_v17, %v1734_v16  ;;  %v1866_v55 = vadd.f32 0.00028619796, %v1865_v29  ;;  %v1793_v59 = vmul.f32 %v1792_v58, %v4554_v40 }
 0x228   : > { %v1740_v18 = vmul.f32 %v1739_v30, %v1715_v4  ;;  %3251 = vrcp.f32 %v4644_v35  ;;  %v1829_v13 = vmul.f32 %v1828_v44, %v4587_v8  ;;  %v1803_v37 = vadd.f32 0.4994258, %v1802_v33 }
 0x229   : > { %v1903_v28 = vmul.f32 %v4623_v26, %v4623_v26  ;;  %v1867_v2 = vmul.f32 %v1866_v55, %v4619_v20  ;;  %v1876_v54 = vmul.f32 3.8918573e-05, %v4619_v20  ;;  %v1754_v0 = vadd.f32 1.1283791, %v1753_v12 }
 0x22a   : > { %v3074_v48 = vclamps-f32 %v1740_v18, 1.0  ;;  %v1804_v61 = vmul.f32 %v1803_v37, %v4554_v40  ;;  %v1794_v39 = vadd.f32 1.1283791, %v1793_v59  ;;  %v1830_v23 = vadd.f32 0.05243302, %v1829_v13 }
 0x22b   : > { %v4637_v60 = vmin.f32 %v1903_v28, 16.0  ;;  %v1868_v36 = vadd.f32 0.0036580483, %v1867_v2  ;;  %v1877_v27 = vadd.f32 0.001143296, %v1876_v54  ;;  %v4668_v42 = vmul.f32 0.5, %v4508_v47 }
 0x22c   : > { %v1308_v41 = vpop.f32.mrf.mxu1  ;;  %v1992_v10 = vadd.f32 1.0, %v3074_v48  ;;  %v4664_v34 = vadd.f32 1.0, %v1804_v61  ;;  %v1755_v28 = vmul.f32 %v1754_v0, %v4516_v53  ;;  %v4677_v52 = vmul.f32 %v1794_v39, %v4541_v15 }
 0x22d   : > { %v1905_v45 = vmul.f32 2.1237322e-06, %v4637_v60  ;;  %v4642_v62 = vadd.f32 %v4594_v19, %v1308_v41  ;;  %v1838_v19 = vmul.f32 %v1837_v7, %v4587_v8  ;;  %v1916_v49 = vmul.f32 3.8918573e-05, %v4637_v60 }
 0x22e   : > { %v2008_v63 = vmul.f32 %v1992_v10, %v1320_v31  ;;  %v3252_v22 = vpop.eup %3251  ;;  %3253 = vrcp.f32 %v4664_v34  ;;  %v1777_v47 = vand.u32 2147483648, %v4644_v35  ;;  %v1831_v38 = vmul.f32 %v1830_v23, %v4587_v8 }
 0x22f   : > { %v4649_v51 = vmul.f32 0.70710677, %v4642_v62  ;;  %v1906_v9 = vadd.f32 0.00028619796, %v1905_v45  ;;  %v1839_v56 = vadd.f32 0.014752088, %v1838_v19  ;;  %v1767_v40 = vmul.f32 %v3252_v22, %v4644_v35 }
 0x230   : > { %2078 = vmatmul.f32.gmra.mxu2 %v2008_v63  ;;  %v1869_v24 = vmul.f32 %v1868_v36, %v4619_v20  ;;  %v1878_v53 = vmul.f32 %v1877_v27, %v4619_v20  ;;  %vm1772_vm8 = vweird.f32 %v3252_v22  ;;  %v1775_v41 = vand.u32 2147483647, %v4644_v35 }
 0x231   : > { %v1943_v3 = vmul.f32 %v4649_v51, %v4649_v51  ;;  %v1907_v50 = vmul.f32 %v1906_v9, %v4637_v60  ;;  %v1840_v6 = vmul.f32 %v1839_v56, %v4587_v8  ;;  %v1768_v29 = vsub.f32 1.0, %v1767_v40 }
 0x232   : > { %v1879_v15 = vadd.f32 0.014752088, %v1878_v53  ;;  %v1917_v25 = vadd.f32 0.001143296, %v1916_v49  ;;  %vm1771_vm9 = vweird.f32 %v4644_v35  ;;  %v1778_v18 = vor.u32 1.1754944e-38, %v1777_v47 }
 0x233   : > { %v4660_v11 = vmin.f32 %v1943_v3, 16.0  ;;  %v1908_v4 = vadd.f32 0.0036580483, %v1907_v50  ;;  %v1841_v43 = vadd.f32 0.112945676, %v1840_v6  ;;  %v1769_v58 = vmul.f32 %v3252_v22, %v1768_v29  ;;  %vm1773_vm10 = vmor %vm1771_vm9, %vm1772_vm8 }
 0x234   : > { %v3254_v55 = vpop.eup %3253  ;;  %v1880_v31 = vmul.f32 %v1879_v15, %v4619_v20  ;;  %v1918_v48 = vmul.f32 %v1917_v25, %v4637_v60  ;;  %v1870_v59 = vadd.f32 0.05243302, %v1869_v24  ;;  %vm1776_vm11 = vcmp.eq.f32.partialorder %v1775_v41, 8.507059e+37 }
 0x235   : > { %v1945_v14 = vmul.f32 2.1237322e-06, %v4660_v11  ;;  %v1956_v17 = vmul.f32 3.8918573e-05, %v4660_v11  ;;  %v1842_v30 = vmul.f32 %v1841_v43, %v4587_v8  ;;  %v1909_v44 = vmul.f32 %v1908_v4, %v4637_v60 }
 0x236   : > { %v1770_v45 = vadd.f32 %v3252_v22, %v1769_v58  ;;  %v1807_v13 = vmul.f32 %v3254_v55, %v4664_v34  ;;  %v1881_v10 = vadd.f32 0.112945676, %v1880_v31  ;;  %v1817_v63 = vand.u32 2147483648, %v4664_v34 }
 0x237   : > { %v1946_v16 = vadd.f32 0.00028619796, %v1945_v14  ;;  %v1957_v7 = vadd.f32 0.001143296, %v1956_v17  ;;  %v1843_v33 = vadd.f32 0.4994258, %v1842_v30  ;;  %vm1812_vm12 = vweird.f32 %v3254_v55 }
 0x238   : > { %v1774_v19 = vsel %vm1773_vm10, %v3252_v22, %v1770_v45  ;;  %v1910_v2 = vadd.f32 0.05243302, %v1909_v44  ;;  %v1808_v54 = vsub.f32 1.0, %v1807_v13  ;;  %v1882_v61 = vmul.f32 %v1881_v10, %v4619_v20 }
 0x239   : > { %v1958_v12 = vmul.f32 %v1957_v7, %v4660_v11  ;;  %v1947_v9 = vmul.f32 %v1946_v16, %v4660_v11  ;;  %v1779_v3 = vsel %vm1776_vm11, %v1778_v18, %v1774_v19  ;;  %v1844_v35 = vmul.f32 %v1843_v33, %v4587_v8 }
 0x23a   : > { %v1780_v37 = vmul.f32 %v1779_v3, %v1755_v28  ;;  %v1919_v56 = vadd.f32 0.014752088, %v1918_v48  ;;  %v1809_v50 = vmul.f32 %v3254_v55, %v1808_v54  ;;  %v1815_v22 = vand.u32 2147483647, %v4664_v34 }
 0x23b   : > { %v4694_v0 = vadd.f32 1.0, %v1844_v35  ;;  %v1959_v39 = vadd.f32 0.014752088, %v1958_v12  ;;  %v1832_v36 = vadd.f32 0.18741608, %v1831_v38  ;;  %v1871_v6 = vmul.f32 %v1870_v59, %v4619_v20 }
 0x23c   : > { %v3075_v23 = vclamps-f32 %v1780_v37, 1.0  ;;  %v1948_v27 = vadd.f32 0.0036580483, %v1947_v9  ;;  %v1810_v40 = vadd.f32 %v3254_v55, %v1809_v50  ;;  %vm1811_vm13 = vweird.f32 %v4664_v34 }
 0x23d   : > { %3255 = vrcp.f32 %v4694_v0  ;;  %v1883_v28 = vadd.f32 0.4994258, %v1882_v61  ;;  %v1911_v49 = vmul.f32 %v1910_v2, %v4637_v60  ;;  %vm1813_vm14 = vmor %vm1811_vm13, %vm1812_vm12  ;;  %v1818_v17 = vor.u32 1.1754944e-38, %v1817_v63 }
 0x23e   : > { %v1993_v14 = vadd.f32 1.0, %v3075_v23  ;;  %v1920_v4 = vmul.f32 %v1919_v56, %v4637_v60  ;;  %v1960_v29 = vmul.f32 %v1959_v39, %v4660_v11  ;;  %v1814_v38 = vsel %vm1813_vm14, %v3254_v55, %v1810_v40 }
 0x23f   : > { %vm1816_vm15 = vcmp.eq.f32.partialorder %v1815_v22, 8.507059e+37  ;;  %v1884_v24 = vmul.f32 %v1883_v28, %v4619_v20  ;;  %v1949_v43 = vmul.f32 %v1948_v27, %v4660_v11  ;;  %v1833_v58 = vmul.f32 %v1832_v36, %v4587_v8 }
 0x240   : > { %v2009_v47 = vmul.f32 %v1993_v14, %v4668_v42  ;;  %v1819_v53 = vsel %vm1816_vm15, %v1818_v17, %v1814_v38  ;;  %v1921_v16 = vadd.f32 0.112945676, %v1920_v4  ;;  %v1961_v34 = vadd.f32 0.112945676, %v1960_v29  ;;  %v4737_v14 = vld [vmem:[%s5305_s6] ss:$0 sm:$0xff] }
 0x241   : > { %v1820_v41 = vmul.f32 %v1819_v53, %v4677_v52  ;;  %v4709_v30 = vadd.f32 1.0, %v1884_v24  ;;  %v1872_v25 = vadd.f32 0.18741608, %v1871_v6  ;;  %v1322_v44 = vmul.f32 0.5, %v4533_v32 }
 0x242   : > { %2081 = vmatmul.f32.gmra.mxu2 %v2009_v47  ;;  %v1922_v42 = vmul.f32 %v1921_v16, %v4637_v60  ;;  %v1962_v7 = vmul.f32 %v1961_v34, %v4660_v11  ;;  %v1912_v55 = vadd.f32 0.18741608, %v1911_v49  ;;  %v1950_v8 = vadd.f32 0.05243302, %v1949_v43 }
 0x243   : > { %v3256_v15 = vpop.eup %3255  ;;  %v3076_v45 = vclamps-f32 %v1820_v41, 1.0  ;;  %3257 = vrcp.f32 %v4709_v30  ;;  %v1834_v31 = vadd.f32 1.1283791, %v1833_v58  ;;  %v1873_v59 = vmul.f32 %v1872_v25, %v4619_v20 }
 0x244   : > { %v1847_v18 = vmul.f32 %v3256_v15, %v4694_v0  ;;  %v1923_v33 = vadd.f32 0.4994258, %v1922_v42  ;;  %v1963_v12 = vadd.f32 0.4994258, %v1962_v7  ;;  %v1855_v19 = vand.u32 2147483647, %v4694_v0 }
 0x245   : > { %v1994_v52 = vadd.f32 1.0, %v3076_v45  ;;  %v1857_v13 = vand.u32 2147483648, %v4694_v0  ;;  %vm1852_vm0 = vweird.f32 %v3256_v15  ;;  %v1913_v10 = vmul.f32 %v1912_v55, %v4637_v60 }
 0x246   : > { %v1848_v48 = vsub.f32 1.0, %v1847_v18  ;;  %v1924_v32 = vmul.f32 %v1923_v33, %v4637_v60  ;;  %v1964_v35 = vmul.f32 %v1963_v12, %v4660_v11  ;;  %v1951_v2 = vmul.f32 %v1950_v8, %v4660_v11 }
 0x247   : > { %v2010_v9 = vmul.f32 %v1994_v52, %v1322_v44  ;;  %vm1851_vm1 = vweird.f32 %v4694_v0  ;;  %v1835_v61 = vmul.f32 %v1834_v31, %v4576_v21  ;;  %v1858_v56 = vor.u32 1.1754944e-38, %v1857_v13 }
 0x248   : > { %v1849_v3 = vmul.f32 %v3256_v15, %v1848_v48  ;;  %v4723_v37 = vadd.f32 1.0, %v1924_v32  ;;  %v4726_v63 = vadd.f32 1.0, %v1964_v35  ;;  %vm1853_vm2 = vmor %vm1851_vm1, %vm1852_vm0  ;;  %v1874_v60 = vadd.f32 1.1283791, %v1873_v59 }
 0x249   : > { %v3258_v54 = vpop.eup %3257  ;;  %vm1856_vm3 = vcmp.eq.f32.partialorder %v1855_v19, 8.507059e+37  ;;  %v1914_v50 = vadd.f32 1.1283791, %v1913_v10  ;;  %v1952_v22 = vadd.f32 0.18741608, %v1951_v2  ;;  %v1897_v21 = vand.u32 2147483648, %v4709_v30  ;;  %v2052_v40 = vpop.f32.mrf.mxu2 }
 0x24a   : > { %2084 = vmatmul.f32.gmra.mxu2 %v2010_v9  ;;  %v1850_v20 = vadd.f32 %v3256_v15, %v1849_v3  ;;  %v1887_v39 = vmul.f32 %v3258_v54, %v4709_v30  ;;  %3259 = vrcp.f32 %v4723_v37  ;;  %v1895_v27 = vand.u32 2147483647, %v4709_v30 }
 0x24b   : > { %3261 = vrcp.f32 %v4726_v63  ;;  %v1323_v28 = vmul.f32 0.5, %v4564_v5  ;;  %vm1892_vm4 = vweird.f32 %v3258_v54  ;;  %v1324_v17 = vmul.f32 0.5, %v4597_v46 }
 0x24c   : > { %v1854_v23 = vsel %vm1853_vm2, %v3256_v15, %v1850_v20  ;;  %v1888_v6 = vsub.f32 1.0, %v1887_v39  ;;  %v1875_v4 = vmul.f32 %v1874_v60, %v4606_v1  ;;  %v4743_v47 = vadd.f32 %v4737_v14, %v2052_v40 }
 0x24d   : > { %v1859_v36 = vsel %vm1856_vm3, %v1858_v56, %v1854_v23  ;;  %v1915_v24 = vmul.f32 %v1914_v50, %v4623_v26  ;;  %v1953_v43 = vmul.f32 %v1952_v22, %v4660_v11  ;;  %vm1891_vm5 = vweird.f32 %v4709_v30 }
 0x24e   : > { %v1860_v0 = vmul.f32 %v1859_v36, %v1835_v61  ;;  %v1889_v49 = vmul.f32 %v3258_v54, %v1888_v6  ;;  %vm1893_vm6 = vmor %vm1891_vm5, %vm1892_vm4  ;;  %vm1896_vm7 = vcmp.eq.f32.partialorder %v1895_v27, 8.507059e+37  ;;  %v1898_v34 = vor.u32 1.1754944e-38, %v1897_v21 }
 0x24f   : > { %v1935_v58 = vand.u32 2147483647, %v4723_v37  ;;  %v4752_v15 = vmul.f32 0.70710677, %v4743_v47  ;;  %v1937_v30 = vand.u32 2147483648, %v4723_v37  ;;  %v1977_v55 = vand.u32 2147483648, %v4726_v63 }
 0x250   : > { %v3077_v29 = vclamps-f32 %v1860_v0, 1.0  ;;  %v3260_v38 = vpop.eup %3259  ;;  %v1890_v53 = vadd.f32 %v3258_v54, %v1889_v49  ;;  %v1975_v44 = vand.u32 2147483647, %v4726_v63  ;;  %v1954_v12 = vadd.f32 1.1283791, %v1953_v43 }
 0x251   : > { %v3262_v16 = vpop.eup %3261  ;;  %v1927_v46 = vmul.f32 %v3260_v38, %v4723_v37  ;;  %v2132_v45 = vmul.f32 %v4752_v15, %v4752_v15  ;;  %vm1932_vm8 = vweird.f32 %v3260_v38  ;;  %v2055_v8 = vpop.f32.mrf.mxu2  ;;  %vm1931_vm10 = vweird.f32 %v4723_v37  ;;  %v2819_v37 = vld [vmem:[#allocation10 + $0x78] sm:$0xff] }
 0x252   : > { %v1995_v5 = vadd.f32 1.0, %v3077_v29  ;;  %v1894_v1 = vsel %vm1893_vm6, %v3258_v54, %v1890_v53  ;;  %v1967_v41 = vmul.f32 %v3262_v16, %v4726_v63  ;;  %vm1972_vm9 = vweird.f32 %v3262_v16  ;;  %vm1933_vm12 = vmor %vm1931_vm10, %vm1932_vm8  ;;  %2824 = vmatpush.msra.mxu3 %v2819_v37  ;;  %v2818_v29 = vld [vmem:[#allocation10 + $0x70] sm:$0xff] }
 0x253   : > { %v1899_v11 = vsel %vm1896_vm7, %v1898_v34, %v1894_v1  ;;  %v1928_v25 = vsub.f32 1.0, %v1927_v46  ;;  %v4759_v52 = vmin.f32 %v2132_v45, 16.0  ;;  %v4762_v48 = vadd.f32 %v4737_v14, %v2055_v8 }
 0x254   : > { %v2011_v26 = vmul.f32 %v1995_v5, %v1323_v28  ;;  %v1900_v42 = vmul.f32 %v1899_v11, %v1875_v4  ;;  %v1968_v7 = vsub.f32 1.0, %v1967_v41  ;;  %vm1971_vm11 = vweird.f32 %v4726_v63  ;;  %2825 = vmatpush.msra.mxu3 %v2818_v29  ;;  %v2816_v5 = vld [vmem:[#allocation10 + $0x60] sm:$0xff] }
 0x255   : > { %v1929_v18 = vmul.f32 %v3260_v38, %v1928_v25  ;;  %v1938_v13 = vor.u32 1.1754944e-38, %v1937_v30  ;;  %v2134_v9 = vmul.f32 2.1237322e-06, %v4759_v52  ;;  %vm1936_vm13 = vcmp.eq.f32.partialorder %v1935_v58, 8.507059e+37  ;;  %vm1973_vm14 = vmor %vm1971_vm11, %vm1972_vm9 }
 0x256   : > { %2087 = vmatmul.f32.gmra.mxu2 %v2011_v26  ;;  %v3078_v33 = vclamps-f32 %v1900_v42, 1.0  ;;  %v1969_v31 = vmul.f32 %v3262_v16, %v1968_v7  ;;  %v1978_v35 = vor.u32 1.1754944e-38, %v1977_v55  ;;  %v4769_v10 = vmul.f32 0.70710677, %v4762_v48  ;;  %v2815_v26 = vld [vmem:[#allocation10 + $0x58] sm:$0xff] }
 0x257   : > { %v1930_v59 = vadd.f32 %v3260_v38, %v1929_v18  ;;  %vm1976_vm15 = vcmp.eq.f32.partialorder %v1975_v44, 8.507059e+37  ;;  %v1955_v63 = vmul.f32 %v1954_v12, %v4649_v51  ;;  %v2135_v60 = vadd.f32 0.00028619796, %v2134_v9 }
 0x258   : > { %v1996_v19 = vadd.f32 1.0, %v3078_v33  ;;  %v1970_v32 = vadd.f32 %v3262_v16, %v1969_v31  ;;  %v2172_v39 = vmul.f32 %v4769_v10, %v4769_v10  ;;  %v1325_v0 = vmul.f32 0.5, %v4616_v57 }
 0x259   : > { %v1934_v3 = vsel %vm1933_vm12, %v3260_v38, %v1930_v59  ;;  %v2136_v51 = vmul.f32 %v2135_v60, %v4759_v52  ;;  %v2817_v38 = vld [vmem:[#allocation10 + $0x68] sm:$0xff]  ;;  %v1326_v58 = vmul.f32 0.5, %v4642_v62 }
 0x25a   : > { %v2012_v2 = vmul.f32 %v1996_v19, %v1324_v17  ;;  %v1939_v54 = vsel %vm1936_vm13, %v1938_v13, %v1934_v3  ;;  %v1974_v20 = vsel %vm1973_vm14, %v3262_v16, %v1970_v32  ;;  %v4774_v22 = vmin.f32 %v2172_v39, 16.0  ;;  %2826 = vmatpush.msra.mxu3 %v2817_v38  ;;  %v2814_v13 = vld [vmem:[#allocation10 + $0x50] sm:$0xff]  ;;  %v2813_v32 = vld [vmem:[#allocation10 + $0x48] sm:$0xff] }
 0x25b   : > { %v1940_v61 = vmul.f32 %v1939_v54, %v1915_v24  ;;  %v1979_v56 = vsel %vm1976_vm15, %v1978_v35, %v1974_v20  ;;  %v2058_v36 = vpop.f32.mrf.mxu2  ;;  %v2145_v17 = vmul.f32 3.8918573e-05, %v4759_v52  ;;  %v2137_v43 = vadd.f32 0.0036580483, %v2136_v51  ;;  %v2812_v54 = vld [vmem:[#allocation10 + $0x40] sm:$0xff] }
 0x25c   : > { %v1980_v50 = vmul.f32 %v1979_v56, %v1955_v63  ;;  %v4777_v6 = vadd.f32 %v4737_v14, %v2058_v36  ;;  %v2174_v21 = vmul.f32 2.1237322e-06, %v4774_v22  ;;  %2827 = vmatpush.msra.mxu3 %v2816_v5  ;;  %v2185_v62 = vmul.f32 3.8918573e-05, %v4774_v22 }
 0x25d   : > { %v3079_v23 = vclamps-f32 %v1940_v61, 1.0  ;;  %v2146_v24 = vadd.f32 0.001143296, %v2145_v17  ;;  %v2138_v25 = vmul.f32 %v2137_v43, %v4759_v52 }
 0x25e   : > { %2090 = vmatmul.f32.gmra.mxu2 %v2012_v2  ;;  %v4783_v40 = vmul.f32 0.70710677, %v4777_v6  ;;  %v3080_v49 = vclamps-f32 %v1980_v50, 1.0  ;;  %v2175_v57 = vadd.f32 0.00028619796, %v2174_v21  ;;  %2828 = vmatpush.msra.mxu3 %v2815_v26 }
 0x25f   : > { %v1997_v27 = vadd.f32 1.0, %v3079_v23  ;;  %v2147_v34 = vmul.f32 %v2146_v24, %v4759_v52  ;;  %v2139_v8 = vadd.f32 0.05243302, %v2138_v25  ;;  %v2186_v31 = vadd.f32 0.001143296, %v2185_v62  ;;  %v2811_v23 = vld [vmem:[#allocation10 + $0x38] sm:$0xff] }
 0x260   : > { %v2212_v4 = vmul.f32 %v4783_v40, %v4783_v40  ;;  %v1998_v16 = vadd.f32 1.0, %v3080_v49  ;;  %v2176_v30 = vmul.f32 %v2175_v57, %v4774_v22  ;;  %2829 = vmatpush.msra.mxu3 %v2814_v13 }
 0x261   : > { %v2013_v28 = vmul.f32 %v1997_v27, %v1325_v0  ;;  %v2148_v11 = vadd.f32 0.014752088, %v2147_v34  ;;  %v2187_v9 = vmul.f32 %v2186_v31, %v4774_v22  ;;  %v2140_v35 = vmul.f32 %v2139_v8, %v4759_v52  ;;  %v2808_v31 = vld [vmem:[#allocation10 + $0x20] sm:$0xff] }
 0x262   : > { %v4788_v53 = vmin.f32 %v2212_v4, 16.0  ;;  %v2014_v42 = vmul.f32 %v1998_v16, %v1326_v58  ;;  %v2177_v33 = vadd.f32 0.0036580483, %v2176_v30  ;;  %2830 = vmatpush.msra.mxu3 %v2813_v32 }
 0x263   : > { %v2149_v45 = vmul.f32 %v2148_v11, %v4759_v52  ;;  %v2188_v20 = vadd.f32 0.014752088, %v2187_v9  ;;  %v2141_v27 = vadd.f32 0.18741608, %v2140_v35 }
 0x264   : > { %v2214_v46 = vmul.f32 2.1237322e-06, %v4788_v53  ;;  %v2178_v2 = vmul.f32 %v2177_v33, %v4774_v22  ;;  %v2225_v39 = vmul.f32 3.8918573e-05, %v4788_v53  ;;  %2831 = vmatpush.msra.mxu3 %v2812_v54  ;;  %v2807_v54 = vld [vmem:[#allocation10 + $0x18] sm:$0xff] }
 0x265   : > { %v2150_v55 = vadd.f32 0.112945676, %v2149_v45  ;;  %v2189_v50 = vmul.f32 %v2188_v20, %v4774_v22  ;;  %v2142_v38 = vmul.f32 %v2141_v27, %v4759_v52 }
 0x266   : > { %2093 = vmatmul.f32.gmra.mxu2 %v2013_v28  ;;  %v2215_v7 = vadd.f32 0.00028619796, %v2214_v46  ;;  %v2226_v0 = vadd.f32 0.001143296, %v2225_v39  ;;  %v2179_v51 = vadd.f32 0.05243302, %v2178_v2  ;;  %2832 = vmatpush.msra.mxu3 %v2811_v23 }
 0x267   : > { %v2151_v19 = vmul.f32 %v2150_v55, %v4759_v52  ;;  %v2190_v4 = vadd.f32 0.112945676, %v2189_v50 }
 0x268   : > { %v2216_v12 = vmul.f32 %v2215_v7, %v4788_v53  ;;  %v2227_v29 = vmul.f32 %v2226_v0, %v4788_v53  ;;  %v2180_v24 = vmul.f32 %v2179_v51, %v4774_v22  ;;  %v2809_v7 = vld [vmem:[#allocation10 + $0x28] sm:$0xff] }
 0x269   : > { %v2061_v1 = vpop.f32.mrf.mxu2  ;;  %v2152_v3 = vadd.f32 0.4994258, %v2151_v19  ;;  %v2191_v57 = vmul.f32 %v2190_v4, %v4774_v22 }
 0x26a   : > { %v4794_v41 = vadd.f32 %v4737_v14, %v2061_v1  ;;  %v2217_v37 = vadd.f32 0.0036580483, %v2216_v12  ;;  %v2228_v34 = vadd.f32 0.014752088, %v2227_v29  ;;  %v2181_v30 = vadd.f32 0.18741608, %v2180_v24 }
 0x26b   : > { %v2153_v56 = vmul.f32 %v2152_v3, %v4759_v52  ;;  %v2192_v1 = vadd.f32 0.4994258, %v2191_v57  ;;  %v2143_v52 = vadd.f32 1.1283791, %v2142_v38 }
 0x26c   : > { %v4799_v44 = vmul.f32 0.70710677, %v4794_v41  ;;  %v2218_v28 = vmul.f32 %v2217_v37, %v4788_v53  ;;  %v2229_v11 = vmul.f32 %v2228_v34, %v4788_v53  ;;  %v2182_v0 = vmul.f32 %v2181_v30, %v4774_v22 }
 0x26d   : > { %v4819_v36 = vadd.f32 1.0, %v2153_v56  ;;  %v2193_v62 = vmul.f32 %v2192_v1, %v4774_v22 }
 0x26e   : > { %v2252_v18 = vmul.f32 %v4799_v44, %v4799_v44  ;;  %2096 = vmatmul.f32.gmra.mxu2 %v2014_v42  ;;  %v2219_v16 = vadd.f32 0.05243302, %v2218_v28  ;;  %v2810_v42 = vld [vmem:[#allocation10 + $0x30] sm:$0xff]  ;;  %v2230_v8 = vadd.f32 0.112945676, %v2229_v11 }
 0x26f   : > { %3263 = vrcp.f32 %v4819_v36  ;;  %2833 = vmatpush.msra.mxu3 %v2810_v42  ;;  %v2164_v19 = vand.u32 2147483647, %v4819_v36  ;;  %v4843_v13 = vadd.f32 1.0, %v2193_v62  ;;  %v2166_v3 = vand.u32 2147483648, %v4819_v36  ;;  %v2806_v11 = vld [vmem:[#allocation10 + $0x10] sm:$0xff]  ;;  %v2805_v62 = vld [vmem:[#allocation10 + $0x8] sm:$0xff] }
 0x270   : > { %v4806_v59 = vmin.f32 %v2252_v18, 16.0  ;;  %v2220_v18 = vmul.f32 %v2219_v16, %v4788_v53  ;;  %v2231_v35 = vmul.f32 %v2230_v8, %v4788_v53  ;;  %vm2160_vm1 = vweird.f32 %v4819_v36 }
 0x271   : > { %2834 = vmatpush.msra.mxu3 %v2809_v7  ;;  %3265 = vrcp.f32 %v4843_v13  ;;  %vm2165_vm3 = vcmp.eq.f32.partialorder %v2164_v19, 8.507059e+37  ;;  %v2167_v27 = vor.u32 1.1754944e-38, %v2166_v3  ;;  %v2204_v42 = vand.u32 2147483647, %v4843_v13 }
 0x272   : > { %v2254_v63 = vmul.f32 2.1237322e-06, %v4806_v59  ;;  %v2265_v46 = vmul.f32 3.8918573e-05, %v4806_v59  ;;  %v2221_v56 = vadd.f32 0.18741608, %v2220_v18  ;;  %vm2200_vm5 = vweird.f32 %v4843_v13 }
 0x273   : > { %2835 = vmatpush.msra.mxu3 %v2808_v31  ;;  %vm2205_vm7 = vcmp.eq.f32.partialorder %v2204_v42, 8.507059e+37 }
 0x274   : > { %v2255_v49 = vadd.f32 0.00028619796, %v2254_v63  ;;  %v2266_v25 = vadd.f32 0.001143296, %v2265_v46  ;;  %v2100_v63 = vmul.f32 0.5, %v4743_v47 }
 0x275   : > { %v3264_v58 = vpop.eup %3263  ;;  %2836 = vmatpush.msra.mxu3 %v2807_v54  ;;  %v2232_v47 = vadd.f32 0.4994258, %v2231_v35 }
 0x276   : > { %v2064_v61 = vpop.f32.mrf.mxu2  ;;  %v2256_v5 = vmul.f32 %v2255_v49, %v4806_v59  ;;  %v2156_v45 = vmul.f32 %v3264_v58, %v4819_v36  ;;  %v2267_v33 = vmul.f32 %v2266_v25, %v4806_v59  ;;  %vm2161_vm0 = vweird.f32 %v3264_v58 }
 0x277   : > { %v4816_v60 = vadd.f32 %v4737_v14, %v2064_v61  ;;  %v2144_v61 = vmul.f32 %v2143_v52, %v4752_v15  ;;  %vm2162_vm2 = vmor %vm2160_vm1, %vm2161_vm0  ;;  %v2233_v36 = vmul.f32 %v2232_v47, %v4788_v53  ;;  %v3266_v29 = vpop.eup %3265  ;;  %2837 = vmatpush.msra.mxu3 %v2806_v11 }
 0x278   : > { %v2257_v55 = vadd.f32 0.0036580483, %v2256_v5  ;;  %v2157_v12 = vsub.f32 1.0, %v2156_v45  ;;  %v2268_v37 = vadd.f32 0.014752088, %v2267_v33  ;;  %v2196_v34 = vmul.f32 %v3266_v29, %v4843_v13 }
 0x279   : > { %v4822_v21 = vmul.f32 0.70710677, %v4816_v60  ;;  %v2183_v5 = vadd.f32 1.1283791, %v2182_v0  ;;  %v4870_v46 = vadd.f32 1.0, %v2233_v36  ;;  %2838 = vmatpush.msra.mxu3 %v2805_v62  ;;  %vm2201_vm4 = vweird.f32 %v3266_v29 }
 0x27a   : > { %v2158_v20 = vmul.f32 %v3264_v58, %v2157_v12  ;;  %v2258_v39 = vmul.f32 %v2257_v55, %v4806_v59  ;;  %v2269_v49 = vmul.f32 %v2268_v37, %v4806_v59  ;;  %v2197_v30 = vsub.f32 1.0, %v2196_v34  ;;  %vm2202_vm6 = vmor %vm2200_vm5, %vm2201_vm4 }
 0x27b   : > { %v2292_v17 = vmul.f32 %v4822_v21, %v4822_v21  ;;  %3267 = vrcp.f32 %v4870_v46  ;;  %v2206_v55 = vand.u32 2147483648, %v4843_v13  ;;  %v2184_v37 = vmul.f32 %v2183_v5, %v4769_v10 }
 0x27c   : > { %v2159_v50 = vadd.f32 %v3264_v58, %v2158_v20  ;;  %v2259_v38 = vadd.f32 0.05243302, %v2258_v39  ;;  %v2270_v16 = vadd.f32 0.112945676, %v2269_v49  ;;  %v2198_v8 = vmul.f32 %v3266_v29, %v2197_v30 }
 0x27d   : > { %v4831_v43 = vmin.f32 %v2292_v17, 16.0  ;;  %v2222_v17 = vmul.f32 %v2221_v56, %v4788_v53  ;;  %v2207_v56 = vor.u32 1.1754944e-38, %v2206_v55  ;;  %vm2240_vm9 = vweird.f32 %v4870_v46 }
 0x27e   : > { %v2163_v28 = vsel %vm2162_vm2, %v3264_v58, %v2159_v50  ;;  %v2271_v53 = vmul.f32 %v2270_v16, %v4806_v59  ;;  %v2260_v7 = vmul.f32 %v2259_v38, %v4806_v59  ;;  %v2199_v3 = vadd.f32 %v3266_v29, %v2198_v8 }
 0x27f   : > { %v2294_v26 = vmul.f32 2.1237322e-06, %v4831_v43  ;;  %v2168_v4 = vsel %vm2165_vm3, %v2167_v27, %v2163_v28  ;;  %v2305_v22 = vmul.f32 3.8918573e-05, %v4831_v43  ;;  %v2223_v52 = vadd.f32 1.1283791, %v2222_v17 }
 0x280   : > { %v2169_v57 = vmul.f32 %v2168_v4, %v2144_v61  ;;  %v2272_v33 = vadd.f32 0.4994258, %v2271_v53  ;;  %v2261_v61 = vadd.f32 0.18741608, %v2260_v7  ;;  %v2203_v50 = vsel %vm2202_vm6, %v3266_v29, %v2199_v3 }
 0x281   : > { %v2295_v32 = vadd.f32 0.00028619796, %v2294_v26  ;;  %v2306_v1 = vadd.f32 0.001143296, %v2305_v22  ;;  %v3268_v39 = vpop.eup %3267  ;;  %v2101_v27 = vmul.f32 0.5, %v4762_v48  ;;  %v2224_v10 = vmul.f32 %v2223_v52, %v4783_v40 }
 0x282   : > { %v3081_v25 = vclamps-f32 %v2169_v57, 1.0  ;;  %v2273_v35 = vmul.f32 %v2272_v33, %v4806_v59  ;;  %v2262_v4 = vmul.f32 %v2261_v61, %v4806_v59  ;;  %v2244_v29 = vand.u32 2147483647, %v4870_v46 }
 0x283   : > { %v2296_v15 = vmul.f32 %v2295_v32, %v4831_v43  ;;  %v2307_v31 = vmul.f32 %v2306_v1, %v4831_v43  ;;  %v2804_v32 = vld [vmem:[#allocation10] sm:$0xff]  ;;  %v2246_v38 = vand.u32 2147483648, %v4870_v46  ;;  %vm2241_vm8 = vweird.f32 %v3268_v39 }
 0x284   : > { %v2067_v9 = vpop.f32.mrf.mxu2  ;;  %v2772_v18 = vadd.f32 1.0, %v3081_v25  ;;  %2839 = vmatpush.msra.mxu3 %v2804_v32  ;;  %vm2245_vm10 = vcmp.eq.f32.partialorder %v2244_v29, 8.507059e+37  ;;  %vm2242_vm11 = vmor %vm2240_vm9, %vm2241_vm8 }
 0x285   : > { %v4848_v2 = vadd.f32 %v4737_v14, %v2067_v9  ;;  %v2297_v58 = vadd.f32 0.0036580483, %v2296_v15  ;;  %v2308_v54 = vadd.f32 0.014752088, %v2307_v31  ;;  %v2208_v15 = vsel %vm2205_vm7, %v2207_v56, %v2203_v50 }
 0x286   : > { %v2788_v9 = vmul.f32 %v2772_v18, %v2100_v63  ;;  %v4886_v63 = vadd.f32 1.0, %v2273_v35  ;;  %v2209_v17 = vmul.f32 %v2208_v15, %v2184_v37  ;;  %v2247_v30 = vor.u32 1.1754944e-38, %v2246_v38 }
 0x287   : > { %v4855_v23 = vmul.f32 0.70710677, %v4848_v2  ;;  %v2298_v12 = vmul.f32 %v2297_v58, %v4831_v43  ;;  %v2309_v13 = vmul.f32 %v2308_v54, %v4831_v43 }
 0x288   : > { %2840 = vmatmul.f32.vlgmr.msra.gmra.mxu3 %v2788_v9  ;;  %3269 = vrcp.f32 %v4886_v63  ;;  %v3082_v48 = vclamps-f32 %v2209_v17, 1.0  ;;  %v2286_v35 = vand.u32 2147483648, %v4886_v63  ;;  %vm2280_vm13 = vweird.f32 %v4886_v63 }
 0x289   : > { %v2332_v51 = vmul.f32 %v4855_v23, %v4855_v23  ;;  %v2299_v28 = vadd.f32 0.05243302, %v2298_v12  ;;  %v2310_v57 = vadd.f32 0.112945676, %v2309_v13  ;;  %v2284_v13 = vand.u32 2147483647, %v4886_v63 }
 0x28a   : > { %v2773_v1 = vadd.f32 1.0, %v3082_v48 }
 0x28b   : > { %v4867_v24 = vmin.f32 %v2332_v51, 16.0  ;;  %v2236_v51 = vmul.f32 %v3268_v39, %v4870_v46  ;;  %v2300_v59 = vmul.f32 %v2299_v28, %v4831_v43  ;;  %v2311_v58 = vmul.f32 %v2310_v57, %v4831_v43 }
 0x28c   : > { %v2789_v52 = vmul.f32 %v2773_v1, %v2101_v27  ;;  %v2263_v46 = vadd.f32 1.1283791, %v2262_v4  ;;  %vm2285_vm15 = vcmp.eq.f32.partialorder %v2284_v13, 8.507059e+37 }
 0x28d   : > { %v2334_v26 = vmul.f32 2.1237322e-06, %v4867_v24  ;;  %v2345_v20 = vmul.f32 3.8918573e-05, %v4867_v24  ;;  %v2237_v22 = vsub.f32 1.0, %v2236_v51 }
 0x28e   : > { %v3270_v53 = vpop.eup %3269  ;;  %v2312_v42 = vadd.f32 0.4994258, %v2311_v58  ;;  %v2301_v9 = vadd.f32 0.18741608, %v2300_v59  ;;  %v2264_v29 = vmul.f32 %v2263_v46, %v4799_v44 }
 0x28f   : > { %v2335_v45 = vadd.f32 0.00028619796, %v2334_v26  ;;  %v2346_v0 = vadd.f32 0.001143296, %v2345_v20  ;;  %v2238_v34 = vmul.f32 %v3268_v39, %v2237_v22  ;;  %v2276_v55 = vmul.f32 %v3270_v53, %v4886_v63 }
 0x290   : > { %2843 = vmatmul.f32.gmra.mxu3 %v2789_v52  ;;  %v2313_v33 = vmul.f32 %v2312_v42, %v4831_v43  ;;  %vm2281_vm12 = vweird.f32 %v3270_v53 }
 0x291   : > { %v2336_v19 = vmul.f32 %v2335_v45, %v4867_v24  ;;  %v2347_v16 = vmul.f32 %v2346_v0, %v4867_v24  ;;  %v2239_v25 = vadd.f32 %v3268_v39, %v2238_v34  ;;  %v2277_v32 = vsub.f32 1.0, %v2276_v55  ;;  %vm2282_vm14 = vmor %vm2280_vm13, %vm2281_vm12 }
 0x292   : > { %v4916_v54 = vadd.f32 1.0, %v2313_v33  ;;  %v2102_v0 = vmul.f32 0.5, %v4777_v6 }
 0x293   : > { %v2337_v47 = vadd.f32 0.0036580483, %v2336_v19  ;;  %v2348_v26 = vadd.f32 0.014752088, %v2347_v16  ;;  %v2243_v18 = vsel %vm2242_vm11, %v3268_v39, %v2239_v25  ;;  %v2278_v50 = vmul.f32 %v3270_v53, %v2277_v32 }
 0x294   : > { %v2248_v8 = vsel %vm2245_vm10, %v2247_v30, %v2243_v18  ;;  %3271 = vrcp.f32 %v4916_v54  ;;  %v2103_v25 = vmul.f32 0.5, %v4794_v41  ;;  %v2326_v41 = vand.u32 2147483648, %v4916_v54 }
 0x295   : > { %v2338_v40 = vmul.f32 %v2337_v47, %v4867_v24  ;;  %v2349_v7 = vmul.f32 %v2348_v26, %v4867_v24  ;;  %v2249_v19 = vmul.f32 %v2248_v8, %v2224_v10  ;;  %v2279_v51 = vadd.f32 %v3270_v53, %v2278_v50 }
 0x296   : > { %v2287_v10 = vor.u32 1.1754944e-38, %v2286_v35  ;;  %v2324_v46 = vand.u32 2147483647, %v4916_v54  ;;  %vm2320_vm1 = vweird.f32 %v4916_v54 }
 0x297   : > { %v2070_v49 = vpop.f32.mrf.mxu2  ;;  %v2339_v45 = vadd.f32 0.05243302, %v2338_v40  ;;  %v2350_v31 = vadd.f32 0.112945676, %v2349_v7  ;;  %v3083_v56 = vclamps-f32 %v2249_v19, 1.0  ;;  %v2283_v6 = vsel %vm2282_vm14, %v3270_v53, %v2279_v51 }
 0x298   : > { %v4895_v36 = vadd.f32 %v4737_v14, %v2070_v49  ;;  %v2288_v63 = vsel %vm2285_vm15, %v2287_v10, %v2283_v6  ;;  %v2302_v40 = vmul.f32 %v2301_v9, %v4831_v43  ;;  %vm2325_vm3 = vcmp.eq.f32.partialorder %v2324_v46, 8.507059e+37 }
 0x299   : > { %v2351_v20 = vmul.f32 %v2350_v31, %v4867_v24  ;;  %v2340_v37 = vmul.f32 %v2339_v45, %v4867_v24  ;;  %v2774_v15 = vadd.f32 1.0, %v3083_v56  ;;  %v2289_v59 = vmul.f32 %v2288_v63, %v2264_v29 }
 0x29a   : > { %v4902_v5 = vmul.f32 0.70710677, %v4895_v36  ;;  %v3272_v16 = vpop.eup %3271  ;;  %v2303_v42 = vadd.f32 1.1283791, %v2302_v40 }
 0x29b   : > { %v2352_v28 = vadd.f32 0.4994258, %v2351_v20  ;;  %v2341_v49 = vadd.f32 0.18741608, %v2340_v37  ;;  %v2790_v4 = vmul.f32 %v2774_v15, %v2102_v0  ;;  %v2316_v26 = vmul.f32 %v3272_v16, %v4916_v54 }
 0x29c   : > { %v2372_v11 = vmul.f32 %v4902_v5, %v4902_v5  ;;  %v3084_v53 = vclamps-f32 %v2289_v59, 1.0  ;;  %vm2321_vm0 = vweird.f32 %v3272_v16 }
 0x29d   : > { %v2353_v48 = vmul.f32 %v2352_v28, %v4867_v24  ;;  %2846 = vmatmul.f32.gmra.mxu3 %v2790_v4  ;;  %v2342_v58 = vmul.f32 %v2341_v49, %v4867_v24  ;;  %v2104_v24 = vmul.f32 0.5, %v4816_v60  ;;  %v2317_v45 = vsub.f32 1.0, %v2316_v26  ;;  %vm2322_vm2 = vmor %vm2320_vm1, %vm2321_vm0 }
 0x29e   : > { %v4910_v62 = vmin.f32 %v2372_v11, 16.0  ;;  %v2775_v7 = vadd.f32 1.0, %v3084_v53 }
 0x29f   : > { %v2073_v3 = vpop.f32.mrf.mxu2  ;;  %v4939_v1 = vadd.f32 1.0, %v2353_v48  ;;  %v2343_v18 = vadd.f32 1.1283791, %v2342_v58  ;;  %v2318_v31 = vmul.f32 %v3272_v16, %v2317_v45 }
 0x2a0   : > { %v2374_v12 = vmul.f32 2.1237322e-06, %v4910_v62  ;;  %v4921_v61 = vadd.f32 %v4737_v14, %v2073_v3  ;;  %v2385_v39 = vmul.f32 3.8918573e-05, %v4910_v62  ;;  %v2791_v33 = vmul.f32 %v2775_v7, %v2103_v25 }
 0x2a1   : > { %3273 = vrcp.f32 %v4939_v1  ;;  %v2304_v3 = vmul.f32 %v2303_v42, %v4822_v21  ;;  %v2319_v35 = vadd.f32 %v3272_v16, %v2318_v31  ;;  %v2344_v37 = vmul.f32 %v2343_v18, %v4855_v23 }
 0x2a2   : > { %v2375_v27 = vadd.f32 0.00028619796, %v2374_v12  ;;  %v4928_v47 = vmul.f32 0.70710677, %v4921_v61  ;;  %v2386_v22 = vadd.f32 0.001143296, %v2385_v39  ;;  %vm2360_vm5 = vweird.f32 %v4939_v1 }
 0x2a3   : > { %v2327_v39 = vor.u32 1.1754944e-38, %v2326_v41  ;;  %v2323_v13 = vsel %vm2322_vm2, %v3272_v16, %v2319_v35  ;;  %v2364_v54 = vand.u32 2147483647, %v4939_v1 }
 0x2a4   : > { %v2412_v17 = vmul.f32 %v4928_v47, %v4928_v47  ;;  %v2376_v38 = vmul.f32 %v2375_v27, %v4910_v62  ;;  %v2387_v11 = vmul.f32 %v2386_v22, %v4910_v62  ;;  %v2366_v22 = vand.u32 2147483648, %v4939_v1 }
 0x2a5   : > { %2849 = vmatmul.f32.gmra.mxu3 %v2791_v33  ;;  %v2328_v51 = vsel %vm2325_vm3, %v2327_v39, %v2323_v13  ;;  %vm2365_vm6 = vcmp.eq.f32.partialorder %v2364_v54, 8.507059e+37 }
 0x2a6   : > { %v4936_v57 = vmin.f32 %v2412_v17, 16.0  ;;  %v2377_v52 = vadd.f32 0.0036580483, %v2376_v38  ;;  %v2388_v8 = vadd.f32 0.014752088, %v2387_v11  ;;  %v2329_v10 = vmul.f32 %v2328_v51, %v2304_v3 }
 0x2a7   : > { %v2076_v34 = vpop.f32.mrf.mxu2  ;;  %v3274_v9 = vpop.eup %3273  ;;  %v2367_v25 = vor.u32 1.1754944e-38, %v2366_v22 }
 0x2a8   : > { %v4943_v44 = vadd.f32 %v4737_v14, %v2076_v34  ;;  %v2414_v43 = vmul.f32 2.1237322e-06, %v4936_v57  ;;  %v2378_v12 = vmul.f32 %v2377_v52, %v4910_v62  ;;  %v2389_v60 = vmul.f32 %v2388_v8, %v4910_v62 }
 0x2a9   : > { %v2425_v20 = vmul.f32 3.8918573e-05, %v4936_v57  ;;  %v2356_v50 = vmul.f32 %v3274_v9, %v4939_v1  ;;  %vm2361_vm4 = vweird.f32 %v3274_v9  ;;  %v3085_v48 = vclamps-f32 %v2329_v10, 1.0 }
 0x2aa   : > { %v4951_v30 = vmul.f32 0.70710677, %v4943_v44  ;;  %v2415_v19 = vadd.f32 0.00028619796, %v2414_v43  ;;  %v2390_v0 = vadd.f32 0.112945676, %v2389_v60  ;;  %vm2362_vm7 = vmor %vm2360_vm5, %vm2361_vm4 }
 0x2ab   : > { %v2426_v27 = vadd.f32 0.001143296, %v2425_v20  ;;  %v2379_v15 = vadd.f32 0.05243302, %v2378_v12  ;;  %v2357_v28 = vsub.f32 1.0, %v2356_v50  ;;  %v2776_v58 = vadd.f32 1.0, %v3085_v48 }
 0x2ac   : > { %v2452_v55 = vmul.f32 %v4951_v30, %v4951_v30  ;;  %v2416_v21 = vmul.f32 %v2415_v19, %v4936_v57  ;;  %v2391_v23 = vmul.f32 %v2390_v0, %v4910_v62  ;;  %v2105_v20 = vmul.f32 0.5, %v4848_v2 }
 0x2ad   : > { %v2427_v49 = vmul.f32 %v2426_v27, %v4936_v57  ;;  %v2358_v38 = vmul.f32 %v3274_v9, %v2357_v28  ;;  %v2380_v16 = vmul.f32 %v2379_v15, %v4910_v62  ;;  %v2792_v1 = vmul.f32 %v2776_v58, %v2104_v24 }
 0x2ae   : > { %v4959_v32 = vmin.f32 %v2452_v55, 16.0  ;;  %v2392_v63 = vadd.f32 0.4994258, %v2391_v23  ;;  %v2417_v40 = vadd.f32 0.0036580483, %v2416_v21 }
 0x2af   : > { %v2428_v34 = vadd.f32 0.014752088, %v2427_v49  ;;  %v2359_v26 = vadd.f32 %v3274_v9, %v2358_v38  ;;  %2852 = vmatmul.f32.gmra.mxu3 %v2792_v1  ;;  %v2381_v12 = vadd.f32 0.18741608, %v2380_v16 }
 0x2b0   : > { %v2454_v56 = vmul.f32 2.1237322e-06, %v4959_v32  ;;  %v2465_v29 = vmul.f32 3.8918573e-05, %v4959_v32  ;;  %v2393_v53 = vmul.f32 %v2392_v63, %v4910_v62  ;;  %v2418_v45 = vmul.f32 %v2417_v40, %v4936_v57 }
 0x2b1   : > { %v2429_v52 = vmul.f32 %v2428_v34, %v4936_v57  ;;  %v2363_v42 = vsel %vm2362_vm7, %v3274_v9, %v2359_v26  ;;  %v2382_v27 = vmul.f32 %v2381_v12, %v4910_v62 }
 0x2b2   : > { %v2455_v17 = vadd.f32 0.00028619796, %v2454_v56  ;;  %v2466_v7 = vadd.f32 0.001143296, %v2465_v29  ;;  %v2368_v18 = vsel %vm2365_vm6, %v2367_v25, %v2363_v42  ;;  %v4989_v55 = vadd.f32 1.0, %v2393_v53 }
 0x2b3   : > { %v2079_v4 = vpop.f32.mrf.mxu2  ;;  %v2369_v8 = vmul.f32 %v2368_v18, %v2344_v37  ;;  %v2430_v33 = vadd.f32 0.112945676, %v2429_v52  ;;  %v2419_v60 = vadd.f32 0.05243302, %v2418_v45  ;;  %v2383_v29 = vadd.f32 1.1283791, %v2382_v27 }
 0x2b4   : > { %v4975_v6 = vadd.f32 %v4737_v14, %v2079_v4  ;;  %v2456_v11 = vmul.f32 %v2455_v17, %v4959_v32  ;;  %v2467_v31 = vmul.f32 %v2466_v7, %v4959_v32  ;;  %3275 = vrcp.f32 %v4989_v55 }
 0x2b5   : > { %v3086_v19 = vclamps-f32 %v2369_v8, 1.0  ;;  %v2431_v9 = vmul.f32 %v2430_v33, %v4936_v57  ;;  %v2420_v54 = vmul.f32 %v2419_v60, %v4936_v57  ;;  %v2404_v16 = vand.u32 2147483647, %v4989_v55 }
 0x2b6   : > { %v4980_v59 = vmul.f32 0.70710677, %v4975_v6  ;;  %v2457_v46 = vadd.f32 0.0036580483, %v2456_v11  ;;  %v2468_v3 = vadd.f32 0.014752088, %v2467_v31  ;;  %vm2400_vm9 = vweird.f32 %v4989_v55 }
 0x2b7   : > { %v2777_v37 = vadd.f32 1.0, %v3086_v19  ;;  %v2432_v50 = vadd.f32 0.4994258, %v2431_v9  ;;  %v2421_v63 = vadd.f32 0.18741608, %v2420_v54  ;;  %v2406_v40 = vand.u32 2147483648, %v4989_v55 }
 0x2b8   : > { %v2492_v43 = vmul.f32 %v4980_v59, %v4980_v59  ;;  %v2458_v39 = vmul.f32 %v2457_v46, %v4959_v32  ;;  %v2469_v13 = vmul.f32 %v2468_v3, %v4959_v32  ;;  %v2384_v42 = vmul.f32 %v2383_v29, %v4902_v5 }
 0x2b9   : > { %v2793_v21 = vmul.f32 %v2777_v37, %v2105_v20  ;;  %v2433_v10 = vmul.f32 %v2432_v50, %v4936_v57  ;;  %v2407_v7 = vor.u32 1.1754944e-38, %v2406_v40  ;;  %v2422_v18 = vmul.f32 %v2421_v63, %v4936_v57 }
 0x2ba   : > { %v4991_v41 = vmin.f32 %v2492_v43, 16.0  ;;  %v3276_v51 = vpop.eup %3275  ;;  %v2470_v28 = vadd.f32 0.112945676, %v2469_v13  ;;  %v2459_v17 = vadd.f32 0.05243302, %v2458_v39  ;;  %vm2405_vm11 = vcmp.eq.f32.partialorder %v2404_v16, 8.507059e+37 }
 0x2bb   : > { %2855 = vmatmul.f32.gmra.mxu3 %v2793_v21  ;;  %v2396_v49 = vmul.f32 %v3276_v51, %v4989_v55  ;;  %v5007_v4 = vadd.f32 1.0, %v2433_v10  ;;  %vm2401_vm8 = vweird.f32 %v3276_v51  ;;  %v2106_v9 = vmul.f32 0.5, %v4895_v36 }
 0x2bc   : > { %v2494_v24 = vmul.f32 2.1237322e-06, %v4991_v41  ;;  %v2505_v35 = vmul.f32 3.8918573e-05, %v4991_v41  ;;  %v2471_v62 = vmul.f32 %v2470_v28, %v4959_v32  ;;  %v2460_v11 = vmul.f32 %v2459_v17, %v4959_v32  ;;  %vm2402_vm10 = vmor %vm2400_vm9, %vm2401_vm8 }
 0x2bd   : > { %v2397_v38 = vsub.f32 1.0, %v2396_v49  ;;  %3277 = vrcp.f32 %v5007_v4  ;;  %v5035_v3 = vmul.f32 0.5, %v4921_v61  ;;  %v2423_v20 = vadd.f32 1.1283791, %v2422_v18 }
 0x2be   : > { %v2495_v56 = vadd.f32 0.00028619796, %v2494_v24  ;;  %v2506_v0 = vadd.f32 0.001143296, %v2505_v35  ;;  %v2472_v58 = vadd.f32 0.4994258, %v2471_v62  ;;  %vm2440_vm13 = vweird.f32 %v5007_v4 }
 0x2bf   : > { %v2398_v34 = vmul.f32 %v3276_v51, %v2397_v38  ;;  %v2461_v31 = vadd.f32 0.18741608, %v2460_v11  ;;  %v5038_v35 = vmul.f32 0.5, %v4943_v44  ;;  %v2446_v36 = vand.u32 2147483648, %v5007_v4 }
 0x2c0   : > { %v2496_v15 = vmul.f32 %v2495_v56, %v4991_v41  ;;  %v2507_v2 = vmul.f32 %v2506_v0, %v4991_v41  ;;  %v2473_v1 = vmul.f32 %v2472_v58, %v4959_v32  ;;  %v2444_v0 = vand.u32 2147483647, %v5007_v4 }
 0x2c1   : > { %v2399_v43 = vadd.f32 %v3276_v51, %v2398_v34  ;;  %v2462_v50 = vmul.f32 %v2461_v31, %v4959_v32  ;;  %v2424_v32 = vmul.f32 %v2423_v20, %v4928_v47  ;;  %v2447_v47 = vor.u32 1.1754944e-38, %v2446_v36 }
 0x2c2   : > { %v2497_v23 = vadd.f32 0.0036580483, %v2496_v15  ;;  %v2508_v22 = vadd.f32 0.014752088, %v2507_v2  ;;  %v5026_v12 = vadd.f32 1.0, %v2473_v1  ;;  %vm2445_vm15 = vcmp.eq.f32.partialorder %v2444_v0, 8.507059e+37 }
 0x2c3   : > { %v2403_v33 = vsel %vm2402_vm10, %v3276_v51, %v2399_v43  ;;  %v3278_v55 = vpop.eup %3277 }
 0x2c4   : > { %v2498_v48 = vmul.f32 %v2497_v23, %v4991_v41  ;;  %v2509_v26 = vmul.f32 %v2508_v22, %v4991_v41  ;;  %v2408_v46 = vsel %vm2405_vm11, %v2407_v7, %v2403_v33  ;;  %v2436_v57 = vmul.f32 %v3278_v55, %v5007_v4 }
 0x2c5   : > { %v2082_v25 = vpop.f32.mrf.mxu2  ;;  %v2409_v60 = vmul.f32 %v2408_v46, %v2384_v42  ;;  %3279 = vrcp.f32 %v5026_v12  ;;  %vm2441_vm12 = vweird.f32 %v3278_v55  ;;  %v2463_v22 = vadd.f32 1.1283791, %v2462_v50 }
 0x2c6   : > { %v2499_v53 = vadd.f32 0.05243302, %v2498_v48  ;;  %v5018_v52 = vadd.f32 %v4737_v14, %v2082_v25  ;;  %v2510_v45 = vadd.f32 0.112945676, %v2509_v26  ;;  %v2437_v39 = vsub.f32 1.0, %v2436_v57  ;;  %vm2442_vm14 = vmor %vm2440_vm13, %vm2441_vm12 }
 0x2c7   : > { %v3087_v37 = vclamps-f32 %v2409_v60, 1.0  ;;  %v2484_v26 = vand.u32 2147483647, %v5026_v12  ;;  %v2486_v11 = vand.u32 2147483648, %v5026_v12  ;;  %v2464_v1 = vmul.f32 %v2463_v22, %v4951_v30  ;;  %v5080_v30 = vld [vmem:[%s5305_s6] ss:$0 sm:$0xff] }
 0x2c8   : > { %v5024_v8 = vmul.f32 0.70710677, %v5018_v52  ;;  %v2511_v24 = vmul.f32 %v2510_v45, %v4991_v41  ;;  %v2500_v19 = vmul.f32 %v2499_v53, %v4991_v41  ;;  %v2438_v51 = vmul.f32 %v3278_v55, %v2437_v39 }
 0x2c9   : > { %v2778_v21 = vadd.f32 1.0, %v3087_v37  ;;  %vm2480_vm1 = vweird.f32 %v5026_v12  ;;  %vm2485_vm3 = vcmp.eq.f32.partialorder %v2484_v26, 8.507059e+37 }
 0x2ca   : > { %v2532_v5 = vmul.f32 %v5024_v8, %v5024_v8  ;;  %v2512_v27 = vadd.f32 0.4994258, %v2511_v24  ;;  %v2501_v61 = vadd.f32 0.18741608, %v2500_v19  ;;  %v2439_v17 = vadd.f32 %v3278_v55, %v2438_v51 }
 0x2cb   : > { %v2794_v23 = vmul.f32 %v2778_v21, %v2106_v9  ;;  %v3280_v49 = vpop.eup %3279  ;;  %v2487_v19 = vor.u32 1.1754944e-38, %v2486_v11 }
 0x2cc   : > { %v5041_v56 = vmin.f32 %v2532_v5, 16.0  ;;  %v2513_v54 = vmul.f32 %v2512_v27, %v4991_v41  ;;  %v2476_v48 = vmul.f32 %v3280_v49, %v5026_v12  ;;  %v2502_v38 = vmul.f32 %v2501_v61, %v4991_v41 }
 0x2cd   : > { %v2085_v13 = vpop.f32.mrf.mxu2  ;;  %2858 = vmatmul.f32.gmra.mxu3 %v2794_v23  ;;  %v2443_v63 = vsel %vm2442_vm14, %v3278_v55, %v2439_v17  ;;  %vm2481_vm0 = vweird.f32 %v3280_v49 }
 0x2ce   : > { %v2534_v15 = vmul.f32 2.1237322e-06, %v5041_v56  ;;  %v5048_v44 = vadd.f32 %v4737_v14, %v2085_v13  ;;  %v2545_v10 = vmul.f32 3.8918573e-05, %v5041_v56  ;;  %v5057_v14 = vadd.f32 1.0, %v2513_v54  ;;  %vm2482_vm2 = vmor %vm2480_vm1, %vm2481_vm0 }
 0x2cf   : > { %v2448_v40 = vsel %vm2445_vm15, %v2447_v47, %v2443_v63  ;;  %v2477_v34 = vsub.f32 1.0, %v2476_v48  ;;  %v2503_v42 = vadd.f32 1.1283791, %v2502_v38 }
 0x2d0   : > { %v2535_v28 = vadd.f32 0.00028619796, %v2534_v15  ;;  %v5054_v2 = vmul.f32 0.70710677, %v5048_v44  ;;  %v2546_v62 = vadd.f32 0.001143296, %v2545_v10  ;;  %3281 = vrcp.f32 %v5057_v14 }
 0x2d1   : > { %v2449_v58 = vmul.f32 %v2448_v40, %v2424_v32  ;;  %v2478_v41 = vmul.f32 %v3280_v49, %v2477_v34  ;;  %v2504_v12 = vmul.f32 %v2503_v42, %v4980_v59  ;;  %v2524_v27 = vand.u32 2147483647, %v5057_v14 }
 0x2d2   : > { %v2572_v29 = vmul.f32 %v5054_v2, %v5054_v2  ;;  %v2536_v4 = vmul.f32 %v2535_v28, %v5041_v56  ;;  %v2547_v25 = vmul.f32 %v2546_v62, %v5041_v56  ;;  %v2526_v54 = vand.u32 2147483648, %v5057_v14 }
 0x2d3   : > { %v3088_v7 = vclamps-f32 %v2449_v58, 1.0  ;;  %v2479_v55 = vadd.f32 %v3280_v49, %v2478_v41  ;;  %vm2520_vm5 = vweird.f32 %v5057_v14  ;;  %vm2525_vm7 = vcmp.eq.f32.partialorder %v2524_v27, 8.507059e+37 }
 0x2d4   : > { %v5066_v16 = vmin.f32 %v2572_v29, 16.0  ;;  %v2548_v45 = vadd.f32 0.014752088, %v2547_v25  ;;  %v2537_v18 = vadd.f32 0.0036580483, %v2536_v4  ;;  %v2527_v40 = vor.u32 1.1754944e-38, %v2526_v54 }
 0x2d5   : > { %v2779_v24 = vadd.f32 1.0, %v3088_v7  ;;  %v2483_v20 = vsel %vm2482_vm2, %v3280_v49, %v2479_v55 }
 0x2d6   : > { %v2574_v53 = vmul.f32 2.1237322e-06, %v5066_v16  ;;  %v2585_v43 = vmul.f32 3.8918573e-05, %v5066_v16  ;;  %v3282_v31 = vpop.eup %3281  ;;  %v2549_v5 = vmul.f32 %v2548_v45, %v5041_v56  ;;  %v2488_v39 = vsel %vm2485_vm3, %v2487_v19, %v2483_v20 }
 0x2d7   : > { %v2795_v37 = vmul.f32 %v2779_v24, %v5035_v3  ;;  %v2516_v50 = vmul.f32 %v3282_v31, %v5057_v14  ;;  %v2538_v13 = vmul.f32 %v2537_v18, %v5041_v56  ;;  %v2489_v36 = vmul.f32 %v2488_v39, %v2464_v1 }
 0x2d8   : > { %v2575_v33 = vadd.f32 0.00028619796, %v2574_v53  ;;  %v2586_v60 = vadd.f32 0.001143296, %v2585_v43  ;;  %v2550_v21 = vadd.f32 0.112945676, %v2549_v5  ;;  %vm2521_vm4 = vweird.f32 %v3282_v31 }
 0x2d9   : > { %v2088_v46 = vpop.f32.mrf.mxu2  ;;  %2861 = vmatmul.f32.gmra.mxu3 %v2795_v37  ;;  %v2517_v15 = vsub.f32 1.0, %v2516_v50  ;;  %v3089_v3 = vclamps-f32 %v2489_v36, 1.0  ;;  %v2539_v49 = vadd.f32 0.05243302, %v2538_v13  ;;  %vm2522_vm6 = vmor %vm2520_vm5, %vm2521_vm4 }
 0x2da   : > { %v2576_v57 = vmul.f32 %v2575_v33, %v5066_v16  ;;  %v5083_v9 = vadd.f32 %v5080_v30, %v2088_v46  ;;  %v2587_v51 = vmul.f32 %v2586_v60, %v5066_v16  ;;  %v2551_v28 = vmul.f32 %v2550_v21, %v5041_v56 }
 0x2db   : > { %v2518_v32 = vmul.f32 %v3282_v31, %v2517_v15  ;;  %v2780_v62 = vadd.f32 1.0, %v3089_v3  ;;  %v2540_v11 = vmul.f32 %v2539_v49, %v5041_v56 }
 0x2dc   : > { %v2577_v0 = vadd.f32 0.0036580483, %v2576_v57  ;;  %v5091_v61 = vmul.f32 0.70710677, %v5083_v9  ;;  %v2588_v23 = vadd.f32 0.014752088, %v2587_v51 }
 0x2dd   : > { %v2519_v47 = vadd.f32 %v3282_v31, %v2518_v32  ;;  %v2552_v48 = vadd.f32 0.4994258, %v2551_v28  ;;  %v2796_v4 = vmul.f32 %v2780_v62, %v5038_v35  ;;  %v2541_v18 = vadd.f32 0.18741608, %v2540_v11 }
 0x2de   : > { %v2578_v59 = vmul.f32 %v2577_v0, %v5066_v16  ;;  %v2612_v10 = vmul.f32 %v5091_v61, %v5091_v61  ;;  %v2589_v38 = vmul.f32 %v2588_v23, %v5066_v16 }
 0x2df   : > { %v2523_v58 = vsel %vm2522_vm6, %v3282_v31, %v2519_v47  ;;  %v2553_v14 = vmul.f32 %v2552_v48, %v5041_v56  ;;  %v2109_v31 = vmul.f32 0.5, %v4975_v6  ;;  %v2542_v39 = vmul.f32 %v2541_v18, %v5041_v56 }
 0x2e0   : > { %v2579_v17 = vadd.f32 0.05243302, %v2578_v59  ;;  %v5100_v22 = vmin.f32 %v2612_v10, 16.0  ;;  %v2590_v26 = vadd.f32 0.112945676, %v2589_v38  ;;  %v2528_v41 = vsel %vm2525_vm7, %v2527_v40, %v2523_v58 }
 0x2e1   : > { %v2091_v29 = vpop.f32.mrf.mxu2  ;;  %2864 = vmatmul.f32.gmra.mxu3 %v2796_v4  ;;  %v2529_v35 = vmul.f32 %v2528_v41, %v2504_v12  ;;  %v2554_v43 = vadd.f32 1.0, %v2553_v14  ;;  %v2110_v56 = vmul.f32 0.5, %v5018_v52  ;;  %v2543_v59 = vadd.f32 1.1283791, %v2542_v39 }
 0x2e2   : > { %v5104_v63 = vadd.f32 %v5080_v30, %v2091_v29  ;;  %v2614_v34 = vmul.f32 2.1237322e-06, %v5100_v22  ;;  %v2580_v25 = vmul.f32 %v2579_v17, %v5066_v16  ;;  %v2591_v1 = vmul.f32 %v2590_v26, %v5066_v16 }
 0x2e3   : > { %v3090_v45 = vclamps-f32 %v2529_v35, 1.0  ;;  %3283 = vrcp.f32 %v2554_v43  ;;  %v2625_v5 = vmul.f32 3.8918573e-05, %v5100_v22  ;;  %v2564_v10 = vand.u32 2147483647, %v2554_v43 }
 0x2e4   : > { %v5113_v53 = vmul.f32 0.70710677, %v5104_v63  ;;  %v2615_v7 = vadd.f32 0.00028619796, %v2614_v34  ;;  %v2581_v33 = vadd.f32 0.18741608, %v2580_v25  ;;  %v2544_v38 = vmul.f32 %v2543_v59, %v5024_v8 }
 0x2e5   : > { %v2781_v24 = vadd.f32 1.0, %v3090_v45  ;;  %v2592_v19 = vadd.f32 0.4994258, %v2591_v1  ;;  %v2626_v36 = vadd.f32 0.001143296, %v2625_v5  ;;  %v2566_v32 = vand.u32 2147483648, %v2554_v43 }
 0x2e6   : > { %v2652_v42 = vmul.f32 %v5113_v53, %v5113_v53  ;;  %v2616_v20 = vmul.f32 %v2615_v7, %v5100_v22  ;;  %v2582_v50 = vmul.f32 %v2581_v33, %v5066_v16  ;;  %vm2560_vm9 = vweird.f32 %v2554_v43 }
 0x2e7   : > { %v2797_v12 = vmul.f32 %v2781_v24, %v2109_v31  ;;  %v2593_v37 = vmul.f32 %v2592_v19, %v5066_v16  ;;  %v2627_v28 = vmul.f32 %v2626_v36, %v5100_v22  ;;  %vm2565_vm11 = vcmp.eq.f32.partialorder %v2564_v10, 8.507059e+37 }
 0x2e8   : > { %v5118_v55 = vmin.f32 %v2652_v42, 16.0  ;;  %v2617_v21 = vadd.f32 0.0036580483, %v2616_v20  ;;  %v2583_v16 = vadd.f32 1.1283791, %v2582_v50 }
 0x2e9   : > { %v2094_v46 = vpop.f32.mrf.mxu2  ;;  %v3284_v13 = vpop.eup %3283  ;;  %2867 = vmatmul.f32.gmra.mxu3 %v2797_v12  ;;  %v5133_v0 = vadd.f32 1.0, %v2593_v37  ;;  %v2628_v47 = vadd.f32 0.014752088, %v2627_v28 }
 0x2ea   : > { %v2654_v60 = vmul.f32 2.1237322e-06, %v5118_v55  ;;  %v5124_v57 = vadd.f32 %v5080_v30, %v2094_v46  ;;  %v2556_v15 = vmul.f32 %v3284_v13, %v2554_v43  ;;  %v2665_v23 = vmul.f32 3.8918573e-05, %v5118_v55 }
 0x2eb   : > { %3285 = vrcp.f32 %v5133_v0  ;;  %vm2561_vm8 = vweird.f32 %v3284_v13  ;;  %v2618_v29 = vmul.f32 %v2617_v21, %v5100_v22  ;;  %v2584_v4 = vmul.f32 %v2583_v16, %v5054_v2 }
 0x2ec   : > { %v5131_v6 = vmul.f32 0.70710677, %v5124_v57  ;;  %v2655_v27 = vadd.f32 0.00028619796, %v2654_v60  ;;  %v2557_v3 = vsub.f32 1.0, %v2556_v15  ;;  %vm2562_vm10 = vmor %vm2560_vm9, %vm2561_vm8  ;;  %v2629_v14 = vmul.f32 %v2628_v47, %v5100_v22 }
 0x2ed   : > { %v2666_v48 = vadd.f32 0.001143296, %v2665_v23  ;;  %v2619_v8 = vadd.f32 0.05243302, %v2618_v29  ;;  %v2604_v7 = vand.u32 2147483647, %v5133_v0  ;;  %vm2600_vm12 = vweird.f32 %v5133_v0 }
 0x2ee   : > { %v2692_v51 = vmul.f32 %v5131_v6, %v5131_v6  ;;  %v2656_v49 = vmul.f32 %v2655_v27, %v5118_v55  ;;  %v2558_v62 = vmul.f32 %v3284_v13, %v2557_v3  ;;  %v2606_v45 = vand.u32 2147483648, %v5133_v0 }
 0x2ef   : > { %v2667_v26 = vmul.f32 %v2666_v48, %v5118_v55  ;;  %v2630_v33 = vadd.f32 0.112945676, %v2629_v14  ;;  %v2620_v36 = vmul.f32 %v2619_v8, %v5100_v22  ;;  %vm2605_vm15 = vcmp.eq.f32.partialorder %v2604_v7, 8.507059e+37 }
 0x2f0   : > { %v5146_v52 = vmin.f32 %v2692_v51, 16.0  ;;  %v2559_v40 = vadd.f32 %v3284_v13, %v2558_v62  ;;  %v2657_v11 = vadd.f32 0.0036580483, %v2656_v49  ;;  %v2607_v50 = vor.u32 1.1754944e-38, %v2606_v45 }
 0x2f1   : > { %v2097_v54 = vpop.f32.mrf.mxu2  ;;  %v3286_v34 = vpop.eup %3285  ;;  %v2668_v31 = vadd.f32 0.014752088, %v2667_v26  ;;  %v2631_v20 = vmul.f32 %v2630_v33, %v5100_v22  ;;  %v2621_v47 = vadd.f32 0.18741608, %v2620_v36 }
 0x2f2   : > { %v5143_v17 = vadd.f32 %v5080_v30, %v2097_v54  ;;  %v2567_v30 = vor.u32 1.1754944e-38, %v2566_v32  ;;  %v2563_v25 = vsel %vm2562_vm10, %v3284_v13, %v2559_v40  ;;  %v2596_v41 = vmul.f32 %v3286_v34, %v5133_v0 }
 0x2f3   : > { %v2694_v2 = vmul.f32 2.1237322e-06, %v5146_v52  ;;  %v2658_v46 = vmul.f32 %v2657_v11, %v5118_v55  ;;  %vm2601_vm13 = vweird.f32 %v3286_v34  ;;  %v2669_v12 = vmul.f32 %v2668_v31, %v5118_v55 }
 0x2f4   : > { %v5151_v58 = vmul.f32 0.70710677, %v5143_v17  ;;  %v2568_v43 = vsel %vm2565_vm11, %v2567_v30, %v2563_v25  ;;  %v2597_v42 = vsub.f32 1.0, %v2596_v41  ;;  %v2705_v13 = vmul.f32 3.8918573e-05, %v5146_v52  ;;  %vm2602_vm14 = vmor %vm2600_vm12, %vm2601_vm13 }
 0x2f5   : > { %v2569_v1 = vmul.f32 %v2568_v43, %v2544_v38  ;;  %v2695_v5 = vadd.f32 0.00028619796, %v2694_v2  ;;  %v2632_v15 = vadd.f32 0.4994258, %v2631_v20  ;;  %v2670_v21 = vadd.f32 0.112945676, %v2669_v12 }
 0x2f6   : > { %v2732_v35 = vmul.f32 %v5151_v58, %v5151_v58  ;;  %v2598_v19 = vmul.f32 %v3286_v34, %v2597_v42  ;;  %v2659_v51 = vadd.f32 0.05243302, %v2658_v46  ;;  %v2706_v23 = vadd.f32 0.001143296, %v2705_v13 }
 0x2f7   : > { %v3091_v24 = vclamps-f32 %v2569_v1, 1.0  ;;  %v2696_v3 = vmul.f32 %v2695_v5, %v5146_v52  ;;  %v2633_v10 = vmul.f32 %v2632_v15, %v5100_v22  ;;  %v2671_v32 = vmul.f32 %v2670_v21, %v5118_v55 }
 0x2f8   : > { %v5161_v18 = vmin.f32 %v2732_v35, 16.0  ;;  %v2599_v39 = vadd.f32 %v3286_v34, %v2598_v19  ;;  %v2707_v48 = vmul.f32 %v2706_v23, %v5146_v52  ;;  %v2660_v40 = vmul.f32 %v2659_v51, %v5118_v55 }
 0x2f9   : > { %v2782_v37 = vadd.f32 1.0, %v3091_v24  ;;  %v2634_v62 = vadd.f32 1.0, %v2633_v10  ;;  %v2672_v29 = vadd.f32 0.4994258, %v2671_v32  ;;  %v2111_v30 = vmul.f32 0.5, %v5048_v44 }
 0x2fa   : > { %v2734_v60 = vmul.f32 2.1237322e-06, %v5161_v18  ;;  %v2603_v16 = vsel %vm2602_vm14, %v3286_v34, %v2599_v39  ;;  %v2745_v49 = vmul.f32 3.8918573e-05, %v5161_v18  ;;  %v2697_v34 = vadd.f32 0.0036580483, %v2696_v3 }
 0x2fb   : > { %v2798_v59 = vmul.f32 %v2782_v37, %v2110_v56  ;;  %v2608_v54 = vsel %vm2605_vm15, %v2607_v50, %v2603_v16  ;;  %3287 = vrcp.f32 %v2634_v62  ;;  %v2708_v11 = vadd.f32 0.014752088, %v2707_v48 }
 0x2fc   : > { %v2735_v27 = vadd.f32 0.00028619796, %v2734_v60  ;;  %v2609_v28 = vmul.f32 %v2608_v54, %v2584_v4  ;;  %v2746_v38 = vadd.f32 0.001143296, %v2745_v49  ;;  %v2673_v4 = vmul.f32 %v2672_v29, %v5118_v55 }
 0x2fd   : > { %2870 = vmatmul.f32.gmra.mxu3 %v2798_v59  ;;  %v2622_v41 = vmul.f32 %v2621_v47, %v5100_v22  ;;  %v2661_v35 = vadd.f32 0.18741608, %v2660_v40  ;;  %v2698_v43 = vmul.f32 %v2697_v34, %v5146_v52  ;;  %v2709_v1 = vmul.f32 %v2708_v11, %v5146_v52 }
 0x2fe   : > { %v2736_v0 = vmul.f32 %v2735_v27, %v5161_v18  ;;  %v3092_v56 = vclamps-f32 %v2609_v28, 1.0  ;;  %v2747_v25 = vmul.f32 %v2746_v38, %v5161_v18  ;;  %v5183_v2 = vadd.f32 1.0, %v2673_v4 }
 0x2ff   : > { %v2710_v45 = vadd.f32 0.112945676, %v2709_v1  ;;  %v2623_v31 = vadd.f32 1.1283791, %v2622_v41  ;;  %v2662_v46 = vmul.f32 %v2661_v35, %v5118_v55  ;;  %v2699_v24 = vadd.f32 0.05243302, %v2698_v43 }
 0x300   : > { %v2783_v14 = vadd.f32 1.0, %v3092_v56  ;;  %v2737_v26 = vadd.f32 0.0036580483, %v2736_v0  ;;  %v2748_v42 = vadd.f32 0.014752088, %v2747_v25  ;;  %3289 = vrcp.f32 %v5183_v2 }
 0x301   : > { %v3288_v44 = vpop.eup %3287  ;;  %v2711_v19 = vmul.f32 %v2710_v45, %v5146_v52  ;;  %v2644_v20 = vand.u32 2147483647, %v2634_v62  ;;  %v2646_v37 = vand.u32 2147483648, %v2634_v62  ;;  %v2624_v36 = vmul.f32 %v2623_v31, %v5091_v61  ;;  %v5209_v56 = vld [vmem:[%s5307_s8] ss:$0 sm:$0xff] }
 0x302   : > { %v2799_v8 = vmul.f32 %v2783_v14, %v2111_v30  ;;  %v2738_v7 = vmul.f32 %v2737_v26, %v5161_v18  ;;  %v2749_v33 = vmul.f32 %v2748_v42, %v5161_v18  ;;  %v2636_v22 = vmul.f32 %v3288_v44, %v2634_v62 }
 0x303   : > { %v2712_v39 = vadd.f32 0.4994258, %v2711_v19  ;;  %vm2641_vm0 = vweird.f32 %v3288_v44  ;;  %v2663_v15 = vadd.f32 1.1283791, %v2662_v46  ;;  %v2700_v21 = vmul.f32 %v2699_v24, %v5146_v52 }
 0x304   : > { %v2750_v5 = vadd.f32 0.112945676, %v2749_v33  ;;  %v2637_v60 = vsub.f32 1.0, %v2636_v22  ;;  %v2739_v12 = vadd.f32 0.05243302, %v2738_v7  ;;  %vm2640_vm1 = vweird.f32 %v2634_v62 }
 0x305   : > { %2873 = vmatmul.f32.gmra.mxu3 %v2799_v8  ;;  %v2713_v51 = vmul.f32 %v2712_v39, %v5146_v52  ;;  %vm2645_vm2 = vcmp.eq.f32.partialorder %v2644_v20, 8.507059e+37  ;;  %vm2642_vm3 = vmor %vm2640_vm1, %vm2641_vm0  ;;  %v2647_v54 = vor.u32 1.1754944e-38, %v2646_v37  ;;  %v2684_v28 = vand.u32 2147483647, %v5183_v2 }
 0x306   : > { %v2751_v50 = vmul.f32 %v2750_v5, %v5161_v18  ;;  %v3290_v13 = vpop.eup %3289  ;;  %v2638_v27 = vmul.f32 %v3288_v44, %v2637_v60  ;;  %v2740_v3 = vmul.f32 %v2739_v12, %v5161_v18  ;;  %v2686_v23 = vand.u32 2147483648, %v5183_v2 }
 0x307   : > { %v2676_v55 = vmul.f32 %v3290_v13, %v5183_v2  ;;  %v5198_v32 = vadd.f32 1.0, %v2713_v51  ;;  %vm2681_vm4 = vweird.f32 %v3290_v13  ;;  %v2701_v38 = vadd.f32 0.18741608, %v2700_v21 }
 0x308   : > { %v2639_v59 = vadd.f32 %v3288_v44, %v2638_v27  ;;  %v2752_v16 = vadd.f32 0.4994258, %v2751_v50  ;;  %vm2680_vm5 = vweird.f32 %v5183_v2  ;;  %v2687_v30 = vor.u32 1.1754944e-38, %v2686_v23 }
 0x309   : > { %v2677_v10 = vsub.f32 1.0, %v2676_v55  ;;  %3291 = vrcp.f32 %v5198_v32  ;;  %vm2682_vm6 = vmor %vm2680_vm5, %vm2681_vm4  ;;  %v2664_v14 = vmul.f32 %v2663_v15, %v5113_v53  ;;  %v2741_v4 = vadd.f32 0.18741608, %v2740_v3 }
 0x30a   : > { %v2643_v61 = vsel %vm2642_vm3, %v3288_v44, %v2639_v59  ;;  %v2753_v49 = vmul.f32 %v2752_v16, %v5161_v18  ;;  %vm2685_vm7 = vcmp.eq.f32.partialorder %v2684_v28, 8.507059e+37  ;;  %v2112_v11 = vmul.f32 0.5, %v5083_v9 }
 0x30b   : > { %v2648_v0 = vsel %vm2645_vm2, %v2647_v54, %v2643_v61  ;;  %v2678_v29 = vmul.f32 %v3290_v13, %v2677_v10  ;;  %v2841_v48 = vpop.f32.mrf.mxu3  ;;  %v2702_v2 = vmul.f32 %v2701_v38, %v5146_v52  ;;  %v2742_v53 = vmul.f32 %v2741_v4, %v5161_v18 }
 0x30c   : > { %v2649_v62 = vmul.f32 %v2648_v0, %v2624_v36  ;;  %v5204_v47 = vadd.f32 1.0, %v2753_v49  ;;  %v2842_v8 = vadd.f32 %v5209_v56, %v2841_v48  ;;  %v2113_v7 = vmul.f32 0.5, %v5104_v63 }
 0x30d   : > { %v2679_v40 = vadd.f32 %v3290_v13, %v2678_v29  ;;  %v2703_v33 = vadd.f32 1.1283791, %v2702_v2  ;;  %v2726_v31 = vand.u32 2147483648, %v5198_v32  ;;  %v2724_v19 = vand.u32 2147483647, %v5198_v32 }
 0x30e   : > { %v3093_v34 = vclamps-f32 %v2649_v62, 1.0  ;;  %3293 = vrcp.f32 %v5204_v47  ;;  %2889 = vst [vmem:[%s5220_s15] sm:$0xff] %v2842_v8  ;;  %v2743_v5 = vadd.f32 1.1283791, %v2742_v53  ;;  %vm2720_vm9 = vweird.f32 %v5198_v32 }
 0x30f   : > { %v2683_v26 = vsel %vm2682_vm6, %v3290_v13, %v2679_v40  ;;  %v3292_v35 = vpop.eup %3291  ;;  %v2766_v12 = vand.u32 2147483648, %v5204_v47  ;;  %v2727_v37 = vor.u32 1.1754944e-38, %v2726_v31  ;;  %v2764_v50 = vand.u32 2147483647, %v5204_v47 }
 0x310   : > { %v2784_v25 = vadd.f32 1.0, %v3093_v34  ;;  %v2688_v41 = vsel %vm2685_vm7, %v2687_v30, %v2683_v26  ;;  %v2716_v42 = vmul.f32 %v3292_v35, %v5198_v32  ;;  %vm2721_vm8 = vweird.f32 %v3292_v35 }
 0x311   : > { %v2689_v43 = vmul.f32 %v2688_v41, %v2664_v14  ;;  %vm2722_vm10 = vmor %vm2720_vm9, %vm2721_vm8  ;;  %v2704_v13 = vmul.f32 %v2703_v33, %v5131_v6  ;;  %vm2725_vm12 = vcmp.eq.f32.partialorder %v2724_v19, 8.507059e+37  ;;  %vm2760_vm13 = vweird.f32 %v5204_v47 }
 0x312   : > { %v2800_v1 = vmul.f32 %v2784_v25, %v2112_v11  ;;  %v2717_v45 = vsub.f32 1.0, %v2716_v42  ;;  %v2767_v55 = vor.u32 1.1754944e-38, %v2766_v12  ;;  %v2744_v51 = vmul.f32 %v2743_v5, %v5151_v58 }
 0x313   : > { %v3094_v44 = vclamps-f32 %v2689_v43, 1.0  ;;  %v2844_v46 = vpop.f32.mrf.mxu3  ;;  %vm2765_vm15 = vcmp.eq.f32.partialorder %v2764_v50, 8.507059e+37  ;;  %v2114_v32 = vmul.f32 0.5, %v5124_v57  ;;  %v2115_v49 = vmul.f32 0.5, %v5143_v17 }
 0x314   : > { %v3294_v9 = vpop.eup %3293  ;;  %2876 = vmatmul.f32.gmra.mxu3 %v2800_v1  ;;  %v2718_v24 = vmul.f32 %v3292_v35, %v2717_v45  ;;  %v2845_v18 = vadd.f32 %v5209_v56, %v2844_v46 }
 0x315   : > { %v2785_v52 = vadd.f32 1.0, %v3094_v44  ;;  %v2756_v22 = vmul.f32 %v3294_v9, %v5204_v47  ;;  %vm2761_vm11 = vweird.f32 %v3294_v9 }
 0x316   : > { %v2719_v63 = vadd.f32 %v3292_v35, %v2718_v24  ;;  %2890 = vst [vmem:[%s5220_s15 + $0x8] sm:$0xff] %v2845_v18  ;;  %vm2762_vm14 = vmor %vm2760_vm13, %vm2761_vm11 }
 0x317   : > { %v2757_v60 = vsub.f32 1.0, %v2756_v22  ;;  %v2801_v20 = vmul.f32 %v2785_v52, %v2113_v7 }
 0x318   : > { %v2723_v36 = vsel %vm2722_vm10, %v3292_v35, %v2719_v63 }
 0x319   : > { %v2758_v39 = vmul.f32 %v3294_v9, %v2757_v60  ;;  %v2728_v27 = vsel %vm2725_vm12, %v2727_v37, %v2723_v36 }
 0x31a   : > { %v2729_v21 = vmul.f32 %v2728_v27, %v2704_v13 }
 0x31b   : > { %v2759_v15 = vadd.f32 %v3294_v9, %v2758_v39 }
 0x31c   : > { %2879 = vmatmul.f32.gmra.mxu3 %v2801_v20  ;;  %v3095_v16 = vclamps-f32 %v2729_v21, 1.0 }
 0x31d   : > { %v2763_v59 = vsel %vm2762_vm14, %v3294_v9, %v2759_v15 }
 0x31e   : > { %v2768_v3 = vsel %vm2765_vm15, %v2767_v55, %v2763_v59  ;;  %v2786_v61 = vadd.f32 1.0, %v3095_v16 }
 0x31f   : > { %v2769_v6 = vmul.f32 %v2768_v3, %v2744_v51 }
 0x320   : > { %v2847_v54 = vpop.f32.mrf.mxu3  ;;  %v2802_v23 = vmul.f32 %v2786_v61, %v2114_v32 }
 0x321   : > { %v2848_v10 = vadd.f32 %v5209_v56, %v2847_v54  ;;  %v3096_v28 = vclamps-f32 %v2769_v6, 1.0 }
 0x323   : > { %2891 = vst [vmem:[%s5220_s15 + $0x10] sm:$0xff] %v2848_v10  ;;  %v2787_v58 = vadd.f32 1.0, %v3096_v28 }
 0x324   : > { %2882 = vmatmul.f32.gmra.mxu3 %v2802_v23 }
 0x325   : > { %v2803_v29 = vmul.f32 %v2787_v58, %v2115_v49 }
 0x328   : > { %v2850_v0 = vpop.f32.mrf.mxu3 }
 0x329   : > { %v2851_v62 = vadd.f32 %v5209_v56, %v2850_v0 }
 0x32b   : > { %2892 = vst [vmem:[%s5220_s15 + $0x18] sm:$0xff] %v2851_v62 }
 0x32c   : > { %2885 = vmatmul.f32.gmra.mxu3 %v2803_v29 }
 0x332   : > { %v2853_v47 = vpop.f32.mrf.mxu3 }
 0x333   : > { %v2854_v57 = vadd.f32 %v5209_v56, %v2853_v47 }
 0x335   : > { %2893 = vst [vmem:[%s5220_s15 + $0x20] sm:$0xff] %v2854_v57 }
 0x33e   : > { %v2856_v48 = vpop.f32.mrf.mxu3 }
 0x33f   : > { %v2857_v38 = vadd.f32 %v5209_v56, %v2856_v48 }
 0x341   : > { %2894 = vst [vmem:[%s5220_s15 + $0x28] sm:$0xff] %v2857_v38 }
 0x350   : > { %v2859_v40 = vpop.f32.mrf.mxu3 }
 0x351   : > { %v2860_v17 = vadd.f32 %v5209_v56, %v2859_v40 }
 0x353   : > { %2895 = vst [vmem:[%s5220_s15 + $0x30] sm:$0xff] %v2860_v17 }
 0x35c   : > { %v2862_v34 = vpop.f32.mrf.mxu3 }
 0x35d   : > { %v2863_v30 = vadd.f32 %v5209_v56, %v2862_v34 }
 0x35f   : > { %2896 = vst [vmem:[%s5220_s15 + $0x38] sm:$0xff] %v2863_v30 }
 0x364   : > { %v2865_v14 = vpop.f32.mrf.mxu3 }
 0x365   : > { %v2866_v4 = vadd.f32 %v5209_v56, %v2865_v14 }
 0x367   : > { %2897 = vst [vmem:[%s5220_s15 + $0x40] sm:$0xff] %v2866_v4 }
 0x36c   : > { %v2868_v26 = vpop.f32.mrf.mxu3 }
 0x36d   : > { %v2869_v11 = vadd.f32 %v5209_v56, %v2868_v26 }
 0x36f   : > { %2898 = vst [vmem:[%s5220_s15 + $0x48] sm:$0xff] %v2869_v11 }
 0x380   : > { %v2871_v25 = vpop.f32.mrf.mxu3 }
 0x381   : > { %v2872_v41 = vadd.f32 %v5209_v56, %v2871_v25 }
 0x383   : > { %2899 = vst [vmem:[%s5220_s15 + $0x50] sm:$0xff] %v2872_v41 }
 0x388   : > { %v2874_v8 = vpop.f32.mrf.mxu3 }
 0x389   : > { %v2875_v35 = vadd.f32 %v5209_v56, %v2874_v8 }
 0x38b   : > { %2900 = vst [vmem:[%s5220_s15 + $0x58] sm:$0xff] %v2875_v35 }
 0x397   : > { %v2877_v2 = vpop.f32.mrf.mxu3 }
 0x398   : > { %v2878_v43 = vadd.f32 %v5209_v56, %v2877_v2 }
 0x39a   : > { %2901 = vst [vmem:[%s5220_s15 + $0x60] sm:$0xff] %v2878_v43 }
 0x39f   : > { %v2880_v1 = vpop.f32.mrf.mxu3 }
 0x3a0   : > { %v2881_v42 = vadd.f32 %v5209_v56, %v2880_v1 }
 0x3a2   : > { %2902 = vst [vmem:[%s5220_s15 + $0x68] sm:$0xff] %v2881_v42 }
 0x3a7   : > { %v2883_v53 = vpop.f32.mrf.mxu3 }
 0x3a8   : > { %v2884_v44 = vadd.f32 %v5209_v56, %v2883_v53 }
 0x3aa   : > { %2903 = vst [vmem:[%s5220_s15 + $0x70] sm:$0xff] %v2884_v44 }
 0x3af   : > { %v2886_v9 = vpop.f32.mrf.mxu3 }
 0x3b0   : > { %v2887_v7 = vadd.f32 %v5209_v56, %v2886_v9 }
 0x3b2   : > { %2904 = vst [vmem:[%s5220_s15 + $0x78] sm:$0xff] %v2887_v7 }
 0x3b3   : > { %3475 = shalt.err (!%p3472_p10)
}
 0x3b4   : > { %s3530_s24 = smov 128   ;;  %s3531_s15 = smov 8  }
 0x3b5   : > { %3122 = dma.vmem_to_hbm [thread:$0]  (%p3677_p0), %s2919_s18, 2048, %s2921_s27, %s2906_s29, %s3530_s24, %s3530_s24, %s3531_s15  }
 0x3b6 PF: > { %p3154_p11 = scmp.ge.s32.totalorder %s3522_s12, 2  ;;  %s2935_s3 = sand.u32 1, %s3510_s30  }
 0x3b7   : > { %s2936_s20 = scalar_lea.sflag [#allocation4], %s2935_s3 }
 0x3b8   : > { %p3142_p12 = pnand %p3154_p11, %p3617_p6 }
 0x3ba   : > { %p3143_p13 = pneg %p3142_p12 }
 0x3bc   : > { %3505 = dma.done.wait (%p3143_p13), %s2936_s20, 2048  }
 0x3bd   : > { %3507 = vsyncadd (%p3143_p13), %s2936_s20, 4294965248  ;;  %p24_p3 = scmp.ge.s32.totalorder %s3667_s14, 6   ;;  %s5327_s30 = smov %s3514_s10 }
 0x3be   : > { %s5328_s10 = smov %s3518_s11  ;;  %s5329_s11 = smov %s3683_s22 }
 0x3bf   : > { %s5330_s12 = smov %s3667_s14  ;;  %26 = sbr.rel (!%p24_p3) target bundleno = 11 (0xb), region = 117 }
 0x3c4   :  { %2942 = vsyncpa [#allocation3], 1 }
 0x3c5   :  { %2944 = vsyncpa [#allocation3 + $0x1], 1 }
 0x3c6   :  { %2945 = vsyncpa [#allocation6], 1 }
 0x3c7   :  { %2946 = vsyncpa [#allocation9], 1 }
 0x3c8   :  { %2947 = vsyncpa [#allocation4], 1 }
 0x3c9   :  { %2949 = vsyncpa [#allocation4 + $0x1], 1 }

</bundles_post_ra>
